<compile_context>
chip_gen: v7x
topology: tpu7x:2x2x1
jax: 0.10.0
libtpu: 0.0.40
codegen_flags: <defaults>
</compile_context>

<pallas_src>
import functools

import jax
import jax.numpy as jnp
import numpy as np
from jax.experimental import pallas as pl
from jax.experimental.pallas import tpu as pltpu

EPS = 1e-5  # nn.GroupNorm default


def _encoder_kernel(x_ref, m1_ref, gw1_ref, gb1_ref, w1_ref,
                    m2_ref, gw2_ref, gb2_ref, w2_ref,
                    out_ref, pad_ref, col_ref,
                    *, D2, H2, W2, Cin, C1, Cout, cs1, cs2):
    DSP = D2 * H2 * W2
    Dp, Hp, Wp = D2 + 2, H2 + 2, W2 + 2
    D0, H0 = 2 * D2, 2 * H2

    # ---- MaxPool3d(kernel=2) ----
    # W pairs were pre-folded into the channel dim by a free wrapper reshape, so the
    # W reduction is a lane slice + max; D/H reductions use layout-free (major-dim
    # only) reshapes.
    xw = x_ref[0]                                            # (D0, H0, W2, 2*Cin)
    xw = jnp.maximum(xw[..., :Cin], xw[..., Cin:])           # (D0, H0, W2, Cin)
    xw = xw.reshape(D2, 2, H0, W2, Cin)
    xw = jnp.maximum(xw[:, 0], xw[:, 1])                     # (D2, H0, W2, Cin)
    xw = xw.reshape(D2, H2, 2, W2, Cin)
    pooled = jnp.maximum(xw[:, :, 0], xw[:, :, 1])           # (D2, H2, W2, Cin)

    def group_norm(x2, m_ref, w_ref, b_ref, cs):
        # Two-pass GroupNorm on a (rows, C) view.  m_ref[i, j] == 1 iff channels i, j
        # share a group, so one tiny matmul broadcasts group stats back to channels.
        cnt = float(x2.shape[0] * cs)
        s = jnp.sum(x2, axis=0, keepdims=True)                               # (1, C)
        mean = jnp.dot(s, m_ref[...], preferred_element_type=jnp.float32) / cnt
        d = x2 - mean
        ss = jnp.sum(d * d, axis=0, keepdims=True)                           # (1, C)
        var = jnp.dot(ss, m_ref[...], preferred_element_type=jnp.float32) / cnt
        scale = w_ref[...] * jax.lax.rsqrt(var + EPS)
        return d * scale + b_ref[...]

    # ---- zero only the 6 halo faces of the shared padded buffer ----
    # (the interior is fully rewritten below; no full-volume re-zero each grid step)
    pad_ref[0:1, :, :, :] = jnp.zeros((1, Hp, Wp, C1), jnp.float32)
    pad_ref[Dp - 1:Dp, :, :, :] = jnp.zeros((1, Hp, Wp, C1), jnp.float32)
    pad_ref[:, 0:1, :, :] = jnp.zeros((Dp, 1, Wp, C1), jnp.float32)
    pad_ref[:, Hp - 1:Hp, :, :] = jnp.zeros((Dp, 1, Wp, C1), jnp.float32)
    pad_ref[:, :, 0:1, :] = jnp.zeros((Dp, Hp, 1, C1), jnp.float32)
    pad_ref[:, :, Wp - 1:Wp, :] = jnp.zeros((Dp, Hp, 1, C1), jnp.float32)

    def conv3x3x3(C, w_ref):
        # im2col: scatter the 27 shifted windows into (DSP, 27*C) columns of the
        # shared scratch (bounded live ranges), then ONE large-K MXU matmul.
        t = 0
        for kd in range(3):
            for kh in range(3):
                for kw in range(3):
                    xs = pad_ref[kd:kd + D2, kh:kh + H2, kw:kw + W2, 0:C]
                    col_ref[:, t * C:(t + 1) * C] = xs.reshape(DSP, C)
                    t += 1
        return jnp.dot(col_ref[:, 0:27 * C], w_ref[...],
                       preferred_element_type=jnp.float32)

    # ---- SingleConv1: GroupNorm -> Conv3d(no bias) -> ReLU ----
    y1 = group_norm(pooled.reshape(DSP, Cin), m1_ref, gw1_ref, gb1_ref, cs1)
    pad_ref[1:1 + D2, 1:1 + H2, 1:1 + W2, 0:Cin] = y1.reshape(D2, H2, W2, Cin)
    h1 = jnp.maximum(conv3x3x3(Cin, w1_ref), 0.0)            # (DSP, C1)

    # ---- SingleConv2: GroupNorm -> Conv3d(no bias) -> ReLU ----
    y2 = group_norm(h1, m2_ref, gw2_ref, gb2_ref, cs2)
    pad_ref[1:1 + D2, 1:1 + H2, 1:1 + W2, 0:C1] = y2.reshape(D2, H2, W2, C1)
    h2 = jnp.maximum(conv3x3x3(C1, w2_ref), 0.0)             # (DSP, Cout)

    out_ref[0] = h2


def _num_groups(num_channels, num_groups=8):
    if num_channels < num_groups:
        num_groups = 1
    assert num_channels % num_groups == 0
    return num_groups


def _membership_matrix(C, G):
    cs = C // G
    gid = np.arange(C) // cs
    return jnp.asarray((gid[:, None] == gid[None, :]).astype(np.float32))


def _taps_flat(w_oidhw):
    # (Cout, Cin, 3, 3, 3) -> (27*Cin, Cout); rows ordered (kd, kh, kw, cin),
    # matching the im2col column order in the kernel.
    cout, cin = w_oidhw.shape[:2]
    return jnp.transpose(w_oidhw, (2, 3, 4, 1, 0)).reshape(27 * cin, cout)


def encoder_forward(x_ncdhw, gw1, gb1, w1, gw2, gb2, w2):
    N, Cin, D0, H0, W0 = x_ncdhw.shape
    C1 = w1.shape[0]
    Cout = w2.shape[0]
    assert D0 % 2 == 0 and H0 % 2 == 0 and W0 % 2 == 0
    assert C1 >= Cin  # DoubleConv(encoder=True): conv1_out = max(out//2, in) >= in
    D2, H2, W2 = D0 // 2, H0 // 2, W0 // 2
    DSP = D2 * H2 * W2
    G1, G2 = _num_groups(Cin), _num_groups(C1)
    cs1, cs2 = Cin // G1, C1 // G2

    # NCDHW -> NDHWC (the only HBM relayout), then fold the W-pooling pairs into the
    # channel dim with a *free* reshape -- no extra 8-offset HBM pre-gather pass.
    x = jnp.transpose(x_ncdhw, (0, 2, 3, 4, 1)).reshape(N, D0, H0, W2, 2 * Cin)

    m1 = _membership_matrix(Cin, G1)
    m2 = _membership_matrix(C1, G2)
    w1t, w2t = _taps_flat(w1), _taps_flat(w2)
    gw1r, gb1r = gw1.reshape(1, Cin), gb1.reshape(1, Cin)
    gw2r, gb2r = gw2.reshape(1, C1), gb2.reshape(1, C1)

    kernel = functools.partial(_encoder_kernel, D2=D2, H2=H2, W2=W2,
                               Cin=Cin, C1=C1, Cout=Cout, cs1=cs1, cs2=cs2)

    # TODO(synk): for large volumes add a depth-tile grid axis with a 1-voxel halo
    # (plus explicit vmem_limit_bytes) so the working set fits v7x's 64 MiB VMEM;
    # at the shapes exercised here one batch element fits comfortably.
    out = pl.pallas_call(
        kernel,
        out_shape=jax.ShapeDtypeStruct((N, DSP, Cout), jnp.float32),
        grid_spec=pltpu.PrefetchScalarGridSpec(
            num_scalar_prefetch=0,
            grid=(N,),
            in_specs=[
                pl.BlockSpec((1, D0, H0, W2, 2 * Cin), lambda n: (n, 0, 0, 0, 0)),
                pl.BlockSpec((Cin, Cin), lambda n: (0, 0)),
                pl.BlockSpec((1, Cin), lambda n: (0, 0)),
                pl.BlockSpec((1, Cin), lambda n: (0, 0)),
                pl.BlockSpec((27 * Cin, C1), lambda n: (0, 0)),
                pl.BlockSpec((C1, C1), lambda n: (0, 0)),
                pl.BlockSpec((1, C1), lambda n: (0, 0)),
                pl.BlockSpec((1, C1), lambda n: (0, 0)),
                pl.BlockSpec((27 * C1, Cout), lambda n: (0, 0)),
            ],
            out_specs=pl.BlockSpec((1, DSP, Cout), lambda n: (n, 0, 0)),
            scratch_shapes=[
                pltpu.VMEM((D2 + 2, H2 + 2, W2 + 2, C1), jnp.float32),  # shared pad
                pltpu.VMEM((DSP, 27 * C1), jnp.float32),                # shared im2col
            ],
        ),
        compiler_params=pltpu.CompilerParams(dimension_semantics=("parallel",)),
    )(x, m1, gw1r, gb1r, w1t, m2, gw2r, gb2r, w2t)

    out = out.reshape(N, D2, H2, W2, Cout)
    return jnp.transpose(out, (0, 4, 1, 2, 3))   # back to NCDHW


# ----------------------------- pure-JAX reference -----------------------------
def _ref_gn(x, G, w, b):
    N, C = x.shape[0], x.shape[1]
    xr = x.reshape(N, G, -1)
    m = xr.mean(axis=2, keepdims=True)
    v = xr.var(axis=2, keepdims=True)
    xn = ((xr - m) / jnp.sqrt(v + EPS)).reshape(x.shape)
    return xn * w.reshape(1, C, 1, 1, 1) + b.reshape(1, C, 1, 1, 1)


def _ref_conv(x, w):
    return jax.lax.conv_general_dilated(
        x, w, window_strides=(1, 1, 1), padding=[(1, 1)] * 3,
        dimension_numbers=('NCDHW', 'OIDHW', 'NCDHW'),
        precision=jax.lax.Precision.HIGHEST)


def encoder_reference(x, gw1, gb1, w1, gw2, gb2, w2):
    N, C, D, H, W = x.shape
    x = x.reshape(N, C, D // 2, 2, H // 2, 2, W // 2, 2).max(axis=(3, 5, 7))
    x = _ref_gn(x, _num_groups(C), gw1, gb1)
    x = jax.nn.relu(_ref_conv(x, w1))
    x = _ref_gn(x, _num_groups(w1.shape[0]), gw2, gb2)
    x = jax.nn.relu(_ref_conv(x, w2))
    return x


if __name__ == "__main__":
    N, Cin, D0 = 2, 4, 8
    out_channels = 16
    # DoubleConv(encoder=True): conv1_out = max(out_channels // 2, in_channels)
    C1 = max(out_channels // 2, Cin)
    Cout = out_channels

    key = jax.random.PRNGKey(0)
    ks = jax.random.split(key, 8)
    x = jax.random.normal(ks[0], (N, Cin, D0, D0, D0), jnp.float32)
    gw1 = 1.0 + 0.1 * jax.random.normal(ks[1], (Cin,), jnp.float32)
    gb1 = 0.1 * jax.random.normal(ks[2], (Cin,), jnp.float32)
    w1 = jax.random.normal(ks[3], (C1, Cin, 3, 3, 3), jnp.float32) / np.sqrt(Cin * 27)
    gw2 = 1.0 + 0.1 * jax.random.normal(ks[4], (C1,), jnp.float32)
    gb2 = 0.1 * jax.random.normal(ks[5], (C1,), jnp.float32)
    w2 = jax.random.normal(ks[6], (Cout, C1, 3, 3, 3), jnp.float32) / np.sqrt(C1 * 27)

    out = jax.block_until_ready(encoder_forward(x, gw1, gb1, w1, gw2, gb2, w2))
    ref = jax.block_until_ready(encoder_reference(x, gw1, gb1, w1, gw2, gb2, w2))
    np.testing.assert_allclose(np.asarray(out), np.asarray(ref), rtol=5e-3, atol=5e-3)
    print("KERNEL_OK")
</pallas_src>

<mosaic_0001>
module attributes {stable_mosaic.version = 11 : i64} {
  func.func @_encoder_kernel(%arg0: i32, %arg1: memref<1x8x8x4x8xf32, #tpu.memory_space<vmem>>, %arg2: memref<4x4xf32, #tpu.memory_space<vmem>>, %arg3: memref<1x4xf32, #tpu.memory_space<vmem>>, %arg4: memref<1x4xf32, #tpu.memory_space<vmem>>, %arg5: memref<108x8xf32, #tpu.memory_space<vmem>>, %arg6: memref<8x8xf32, #tpu.memory_space<vmem>>, %arg7: memref<1x8xf32, #tpu.memory_space<vmem>>, %arg8: memref<1x8xf32, #tpu.memory_space<vmem>>, %arg9: memref<216x16xf32, #tpu.memory_space<vmem>>, %arg10: memref<1x64x16xf32, #tpu.memory_space<vmem>>, %arg11: memref<6x6x6x8xf32, #tpu.memory_space<vmem>>, %arg12: memref<64x216xf32, #tpu.memory_space<vmem>>) attributes {dimension_semantics = [#tpu.dimension_semantics<parallel>], iteration_bounds = array<i64: 2>, scalar_prefetch = 0 : i64, scratch_operands = 2 : i64, tpu.core_type = #tpu.core_type<tc>, window_params = [{transform_indices = @transform_0, window_bounds = array<i64: 1, 8, 8, 4, 8>}, {pipeline_mode = #tpu.pipeline_mode<synchronous>, transform_indices = @transform_1, window_bounds = array<i64: 4, 4>}, {pipeline_mode = #tpu.pipeline_mode<synchronous>, transform_indices = @transform_2, window_bounds = array<i64: 1, 4>}, {pipeline_mode = #tpu.pipeline_mode<synchronous>, transform_indices = @transform_3, window_bounds = array<i64: 1, 4>}, {pipeline_mode = #tpu.pipeline_mode<synchronous>, transform_indices = @transform_4, window_bounds = array<i64: 108, 8>}, {pipeline_mode = #tpu.pipeline_mode<synchronous>, transform_indices = @transform_5, window_bounds = array<i64: 8, 8>}, {pipeline_mode = #tpu.pipeline_mode<synchronous>, transform_indices = @transform_6, window_bounds = array<i64: 1, 8>}, {pipeline_mode = #tpu.pipeline_mode<synchronous>, transform_indices = @transform_7, window_bounds = array<i64: 1, 8>}, {pipeline_mode = #tpu.pipeline_mode<synchronous>, transform_indices = @transform_8, window_bounds = array<i64: 216, 16>}, {transform_indices = @transform_9, window_bounds = array<i64: 1, 64, 16>}]} {
    %c0 = arith.constant 0 : index
    %c0_0 = arith.constant 0 : index
    %c0_1 = arith.constant 0 : index
    %c0_2 = arith.constant 0 : index
    %c0_3 = arith.constant 0 : index
    %0 = vector.load %arg1[%c0, %c0_0, %c0_1, %c0_2, %c0_3] : memref<1x8x8x4x8xf32, #tpu.memory_space<vmem>>, vector<1x8x8x4x8xf32>
    %1 = vector.shape_cast %0 : vector<1x8x8x4x8xf32> to vector<8x8x4x8xf32>
    %2 = vector.extract_strided_slice %1 {offsets = [0, 0, 0, 0], sizes = [8, 8, 4, 4], strides = [1, 1, 1, 1]} : vector<8x8x4x8xf32> to vector<8x8x4x4xf32>
    %3 = vector.extract_strided_slice %1 {offsets = [0, 0, 0, 4], sizes = [8, 8, 4, 4], strides = [1, 1, 1, 1]} : vector<8x8x4x8xf32> to vector<8x8x4x4xf32>
    %4 = arith.maximumf %2, %3 : vector<8x8x4x4xf32>
    %5 = vector.shape_cast %4 : vector<8x8x4x4xf32> to vector<4x2x8x4x4xf32>
    %6 = vector.extract_strided_slice %5 {offsets = [0, 0, 0, 0, 0], sizes = [4, 1, 8, 4, 4], strides = [1, 1, 1, 1, 1]} : vector<4x2x8x4x4xf32> to vector<4x1x8x4x4xf32>
    %7 = vector.shape_cast %6 : vector<4x1x8x4x4xf32> to vector<4x8x4x4xf32>
    %8 = vector.extract_strided_slice %5 {offsets = [0, 1, 0, 0, 0], sizes = [4, 1, 8, 4, 4], strides = [1, 1, 1, 1, 1]} : vector<4x2x8x4x4xf32> to vector<4x1x8x4x4xf32>
    %9 = vector.shape_cast %8 : vector<4x1x8x4x4xf32> to vector<4x8x4x4xf32>
    %10 = arith.maximumf %7, %9 : vector<4x8x4x4xf32>
    %11 = vector.shape_cast %10 : vector<4x8x4x4xf32> to vector<4x4x2x4x4xf32>
    %12 = vector.extract_strided_slice %11 {offsets = [0, 0, 0, 0, 0], sizes = [4, 4, 1, 4, 4], strides = [1, 1, 1, 1, 1]} : vector<4x4x2x4x4xf32> to vector<4x4x1x4x4xf32>
    %13 = vector.shape_cast %12 : vector<4x4x1x4x4xf32> to vector<4x4x4x4xf32>
    %14 = vector.extract_strided_slice %11 {offsets = [0, 0, 1, 0, 0], sizes = [4, 4, 1, 4, 4], strides = [1, 1, 1, 1, 1]} : vector<4x4x2x4x4xf32> to vector<4x4x1x4x4xf32>
    %15 = vector.shape_cast %14 : vector<4x4x1x4x4xf32> to vector<4x4x4x4xf32>
    %16 = arith.maximumf %13, %15 : vector<4x4x4x4xf32>
    %cst = arith.constant 0.000000e+00 : f32
    %17 = vector.broadcast %cst : f32 to vector<1x6x6x8xf32>
    %c0_4 = arith.constant 0 : index
    %c0_5 = arith.constant 0 : index
    %c0_6 = arith.constant 0 : index
    %c0_7 = arith.constant 0 : index
    %18 = vector.load %arg11[%c0_4, %c0_5, %c0_6, %c0_7] : memref<6x6x6x8xf32, #tpu.memory_space<vmem>>, vector<1x6x6x8xf32>
    tpu.vector_store %arg11[%c0_4, %c0_5, %c0_6, %c0_7], %17 {strides = array<i32>} : memref<6x6x6x8xf32, #tpu.memory_space<vmem>>, vector<1x6x6x8xf32>,
    %cst_8 = arith.constant 0.000000e+00 : f32
    %19 = vector.broadcast %cst_8 : f32 to vector<1x6x6x8xf32>
    %c5 = arith.constant 5 : index
    %c0_9 = arith.constant 0 : index
    %c0_10 = arith.constant 0 : index
    %c0_11 = arith.constant 0 : index
    %20 = vector.load %arg11[%c5, %c0_9, %c0_10, %c0_11] : memref<6x6x6x8xf32, #tpu.memory_space<vmem>>, vector<1x6x6x8xf32>
    tpu.vector_store %arg11[%c5, %c0_9, %c0_10, %c0_11], %19 {strides = array<i32>} : memref<6x6x6x8xf32, #tpu.memory_space<vmem>>, vector<1x6x6x8xf32>,
    %cst_12 = arith.constant 0.000000e+00 : f32
    %21 = vector.broadcast %cst_12 : f32 to vector<6x1x6x8xf32>
    %c0_13 = arith.constant 0 : index
    %c0_14 = arith.constant 0 : index
    %c0_15 = arith.constant 0 : index
    %c0_16 = arith.constant 0 : index
    %22 = vector.load %arg11[%c0_13, %c0_14, %c0_15, %c0_16] : memref<6x6x6x8xf32, #tpu.memory_space<vmem>>, vector<6x1x6x8xf32>
    tpu.vector_store %arg11[%c0_13, %c0_14, %c0_15, %c0_16], %21 {strides = array<i32>} : memref<6x6x6x8xf32, #tpu.memory_space<vmem>>, vector<6x1x6x8xf32>,
    %cst_17 = arith.constant 0.000000e+00 : f32
    %23 = vector.broadcast %cst_17 : f32 to vector<6x1x6x8xf32>
    %c0_18 = arith.constant 0 : index
    %c5_19 = arith.constant 5 : index
    %c0_20 = arith.constant 0 : index
    %c0_21 = arith.constant 0 : index
    %24 = vector.load %arg11[%c0_18, %c5_19, %c0_20, %c0_21] : memref<6x6x6x8xf32, #tpu.memory_space<vmem>>, vector<6x1x6x8xf32>
    tpu.vector_store %arg11[%c0_18, %c5_19, %c0_20, %c0_21], %23 {strides = array<i32>} : memref<6x6x6x8xf32, #tpu.memory_space<vmem>>, vector<6x1x6x8xf32>,
    %cst_22 = arith.constant 0.000000e+00 : f32
    %25 = vector.broadcast %cst_22 : f32 to vector<6x6x1x8xf32>
    %c0_23 = arith.constant 0 : index
    %c0_24 = arith.constant 0 : index
    %c0_25 = arith.constant 0 : index
    %c0_26 = arith.constant 0 : index
    %26 = vector.load %arg11[%c0_23, %c0_24, %c0_25, %c0_26] : memref<6x6x6x8xf32, #tpu.memory_space<vmem>>, vector<6x6x1x8xf32>
    tpu.vector_store %arg11[%c0_23, %c0_24, %c0_25, %c0_26], %25 {strides = array<i32>} : memref<6x6x6x8xf32, #tpu.memory_space<vmem>>, vector<6x6x1x8xf32>,
    %cst_27 = arith.constant 0.000000e+00 : f32
    %27 = vector.broadcast %cst_27 : f32 to vector<6x6x1x8xf32>
    %c0_28 = arith.constant 0 : index
    %c0_29 = arith.constant 0 : index
    %c5_30 = arith.constant 5 : index
    %c0_31 = arith.constant 0 : index
    %28 = vector.load %arg11[%c0_28, %c0_29, %c5_30, %c0_31] : memref<6x6x6x8xf32, #tpu.memory_space<vmem>>, vector<6x6x1x8xf32>
    tpu.vector_store %arg11[%c0_28, %c0_29, %c5_30, %c0_31], %27 {strides = array<i32>} : memref<6x6x6x8xf32, #tpu.memory_space<vmem>>, vector<6x6x1x8xf32>,
    %29 = vector.shape_cast %16 : vector<4x4x4x4xf32> to vector<64x4xf32>
    %cst_32 = arith.constant dense<0.000000e+00> : vector<4xf32>
    %30 = vector.multi_reduction <add>, %29, %cst_32 [0] : vector<64x4xf32> to vector<4xf32>
    %31 = vector.shape_cast %30 : vector<4xf32> to vector<1x4xf32>
    %c0_33 = arith.constant 0 : index
    %c0_34 = arith.constant 0 : index
    %32 = vector.load %arg2[%c0_33, %c0_34] : memref<4x4xf32, #tpu.memory_space<vmem>>, vector<4x4xf32>
    %cst_35 = arith.constant dense<0.000000e+00> : vector<1x4xf32>
    %33 = tpu.matmul %31, %32, %cst_35 {dimension_numbers = #tpu.dot_dimension_numbers<[1], [0], [0], [1], [0, 0, 1, 1], [], []>} : vector<1x4xf32>, vector<4x4xf32>, vector<1x4xf32> -> vector<1x4xf32>
    %cst_36 = arith.constant 2.560000e+02 : f32
    %34 = vector.broadcast %cst_36 : f32 to vector<1x4xf32>
    %35 = arith.divf %33, %34 : vector<1x4xf32>
    %36 = vector.broadcast %35 : vector<1x4xf32> to vector<64x4xf32>
    %37 = arith.subf %29, %36 : vector<64x4xf32>
    %38 = arith.mulf %37, %37 : vector<64x4xf32>
    %cst_37 = arith.constant dense<0.000000e+00> : vector<4xf32>
    %39 = vector.multi_reduction <add>, %38, %cst_37 [0] : vector<64x4xf32> to vector<4xf32>
    %40 = vector.shape_cast %39 : vector<4xf32> to vector<1x4xf32>
    %c0_38 = arith.constant 0 : index
    %c0_39 = arith.constant 0 : index
    %41 = vector.load %arg2[%c0_38, %c0_39] : memref<4x4xf32, #tpu.memory_space<vmem>>, vector<4x4xf32>
    %cst_40 = arith.constant dense<0.000000e+00> : vector<1x4xf32>
    %42 = tpu.matmul %40, %41, %cst_40 {dimension_numbers = #tpu.dot_dimension_numbers<[1], [0], [0], [1], [0, 0, 1, 1], [], []>} : vector<1x4xf32>, vector<4x4xf32>, vector<1x4xf32> -> vector<1x4xf32>
    %cst_41 = arith.constant 2.560000e+02 : f32
    %43 = vector.broadcast %cst_41 : f32 to vector<1x4xf32>
    %44 = arith.divf %42, %43 : vector<1x4xf32>
    %c0_42 = arith.constant 0 : index
    %c0_43 = arith.constant 0 : index
    %45 = vector.load %arg3[%c0_42, %c0_43] : memref<1x4xf32, #tpu.memory_space<vmem>>, vector<1x4xf32>
    %cst_44 = arith.constant 9.99999974E-6 : f32
    %46 = vector.broadcast %cst_44 : f32 to vector<1x4xf32>
    %47 = arith.addf %44, %46 : vector<1x4xf32>
    %48 = math.rsqrt %47 : vector<1x4xf32>
    %49 = arith.mulf %45, %48 : vector<1x4xf32>
    %50 = vector.broadcast %49 : vector<1x4xf32> to vector<64x4xf32>
    %51 = arith.mulf %37, %50 : vector<64x4xf32>
    %c0_45 = arith.constant 0 : index
    %c0_46 = arith.constant 0 : index
    %52 = vector.load %arg4[%c0_45, %c0_46] : memref<1x4xf32, #tpu.memory_space<vmem>>, vector<1x4xf32>
    %53 = vector.broadcast %52 : vector<1x4xf32> to vector<64x4xf32>
    %54 = arith.addf %51, %53 : vector<64x4xf32>
    %55 = vector.shape_cast %54 : vector<64x4xf32> to vector<4x4x4x4xf32>
    %c1 = arith.constant 1 : index
    %c1_47 = arith.constant 1 : index
    %c1_48 = arith.constant 1 : index
    %c0_49 = arith.constant 0 : index
    %56 = vector.load %arg11[%c1, %c1_47, %c1_48, %c0_49] : memref<6x6x6x8xf32, #tpu.memory_space<vmem>>, vector<4x4x4x4xf32>
    tpu.vector_store %arg11[%c1, %c1_47, %c1_48, %c0_49], %55 {strides = array<i32>} : memref<6x6x6x8xf32, #tpu.memory_space<vmem>>, vector<4x4x4x4xf32>,
    %c0_50 = arith.constant 0 : index
    %c0_51 = arith.constant 0 : index
    %c0_52 = arith.constant 0 : index
    %c0_53 = arith.constant 0 : index
    %57 = vector.load %arg11[%c0_50, %c0_51, %c0_52, %c0_53] : memref<6x6x6x8xf32, #tpu.memory_space<vmem>>, vector<4x4x4x4xf32>
    %58 = vector.shape_cast %57 : vector<4x4x4x4xf32> to vector<64x4xf32>
    %c0_54 = arith.constant 0 : index
    %c0_55 = arith.constant 0 : index
    %59 = vector.load %arg12[%c0_54, %c0_55] : memref<64x216xf32, #tpu.memory_space<vmem>>, vector<64x4xf32>
    tpu.vector_store %arg12[%c0_54, %c0_55], %58 {strides = array<i32>} : memref<64x216xf32, #tpu.memory_space<vmem>>, vector<64x4xf32>,
    %c0_56 = arith.constant 0 : index
    %c0_57 = arith.constant 0 : index
    %c1_58 = arith.constant 1 : index
    %c0_59 = arith.constant 0 : index
    %60 = vector.load %arg11[%c0_56, %c0_57, %c1_58, %c0_59] : memref<6x6x6x8xf32, #tpu.memory_space<vmem>>, vector<4x4x4x4xf32>
    %61 = vector.shape_cast %60 : vector<4x4x4x4xf32> to vector<64x4xf32>
    %c0_60 = arith.constant 0 : index
    %c4 = arith.constant 4 : index
    %62 = vector.load %arg12[%c0_60, %c4] : memref<64x216xf32, #tpu.memory_space<vmem>>, vector<64x4xf32>
    tpu.vector_store %arg12[%c0_60, %c4], %61 {strides = array<i32>} : memref<64x216xf32, #tpu.memory_space<vmem>>, vector<64x4xf32>,
    %c0_61 = arith.constant 0 : index
    %c0_62 = arith.constant 0 : index
    %c2 = arith.constant 2 : index
    %c0_63 = arith.constant 0 : index
    %63 = vector.load %arg11[%c0_61, %c0_62, %c2, %c0_63] : memref<6x6x6x8xf32, #tpu.memory_space<vmem>>, vector<4x4x4x4xf32>
    %64 = vector.shape_cast %63 : vector<4x4x4x4xf32> to vector<64x4xf32>
    %c0_64 = arith.constant 0 : index
    %c8 = arith.constant 8 : index
    %65 = vector.load %arg12[%c0_64, %c8] : memref<64x216xf32, #tpu.memory_space<vmem>>, vector<64x4xf32>
    tpu.vector_store %arg12[%c0_64, %c8], %64 {strides = array<i32>} : memref<64x216xf32, #tpu.memory_space<vmem>>, vector<64x4xf32>,
    %c0_65 = arith.constant 0 : index
    %c1_66 = arith.constant 1 : index
    %c0_67 = arith.constant 0 : index
    %c0_68 = arith.constant 0 : index
    %66 = vector.load %arg11[%c0_65, %c1_66, %c0_67, %c0_68] : memref<6x6x6x8xf32, #tpu.memory_space<vmem>>, vector<4x4x4x4xf32>
    %67 = vector.shape_cast %66 : vector<4x4x4x4xf32> to vector<64x4xf32>
    %c0_69 = arith.constant 0 : index
    %c12 = arith.constant 12 : index
    %68 = vector.load %arg12[%c0_69, %c12] : memref<64x216xf32, #tpu.memory_space<vmem>>, vector<64x4xf32>
    tpu.vector_store %arg12[%c0_69, %c12], %67 {strides = array<i32>} : memref<64x216xf32, #tpu.memory_space<vmem>>, vector<64x4xf32>,
    %c0_70 = arith.constant 0 : index
    %c1_71 = arith.constant 1 : index
    %c1_72 = arith.constant 1 : index
    %c0_73 = arith.constant 0 : index
    %69 = vector.load %arg11[%c0_70, %c1_71, %c1_72, %c0_73] : memref<6x6x6x8xf32, #tpu.memory_space<vmem>>, vector<4x4x4x4xf32>
    %70 = vector.shape_cast %69 : vector<4x4x4x4xf32> to vector<64x4xf32>
    %c0_74 = arith.constant 0 : index
    %c16 = arith.constant 16 : index
    %71 = vector.load %arg12[%c0_74, %c16] : memref<64x216xf32, #tpu.memory_space<vmem>>, vector<64x4xf32>
    tpu.vector_store %arg12[%c0_74, %c16], %70 {strides = array<i32>} : memref<64x216xf32, #tpu.memory_space<vmem>>, vector<64x4xf32>,
    %c0_75 = arith.constant 0 : index
    %c1_76 = arith.constant 1 : index
    %c2_77 = arith.constant 2 : index
    %c0_78 = arith.constant 0 : index
    %72 = vector.load %arg11[%c0_75, %c1_76, %c2_77, %c0_78] : memref<6x6x6x8xf32, #tpu.memory_space<vmem>>, vector<4x4x4x4xf32>
    %73 = vector.shape_cast %72 : vector<4x4x4x4xf32> to vector<64x4xf32>
    %c0_79 = arith.constant 0 : index
    %c20 = arith.constant 20 : index
    %74 = vector.load %arg12[%c0_79, %c20] : memref<64x216xf32, #tpu.memory_space<vmem>>, vector<64x4xf32>
    tpu.vector_store %arg12[%c0_79, %c20], %73 {strides = array<i32>} : memref<64x216xf32, #tpu.memory_space<vmem>>, vector<64x4xf32>,
    %c0_80 = arith.constant 0 : index
    %c2_81 = arith.constant 2 : index
    %c0_82 = arith.constant 0 : index
    %c0_83 = arith.constant 0 : index
    %75 = vector.load %arg11[%c0_80, %c2_81, %c0_82, %c0_83] : memref<6x6x6x8xf32, #tpu.memory_space<vmem>>, vector<4x4x4x4xf32>
    %76 = vector.shape_cast %75 : vector<4x4x4x4xf32> to vector<64x4xf32>
    %c0_84 = arith.constant 0 : index
    %c24 = arith.constant 24 : index
    %77 = vector.load %arg12[%c0_84, %c24] : memref<64x216xf32, #tpu.memory_space<vmem>>, vector<64x4xf32>
    tpu.vector_store %arg12[%c0_84, %c24], %76 {strides = array<i32>} : memref<64x216xf32, #tpu.memory_space<vmem>>, vector<64x4xf32>,
    %c0_85 = arith.constant 0 : index
    %c2_86 = arith.constant 2 : index
    %c1_87 = arith.constant 1 : index
    %c0_88 = arith.constant 0 : index
    %78 = vector.load %arg11[%c0_85, %c2_86, %c1_87, %c0_88] : memref<6x6x6x8xf32, #tpu.memory_space<vmem>>, vector<4x4x4x4xf32>
    %79 = vector.shape_cast %78 : vector<4x4x4x4xf32> to vector<64x4xf32>
    %c0_89 = arith.constant 0 : index
    %c28 = arith.constant 28 : index
    %80 = vector.load %arg12[%c0_89, %c28] : memref<64x216xf32, #tpu.memory_space<vmem>>, vector<64x4xf32>
    tpu.vector_store %arg12[%c0_89, %c28], %79 {strides = array<i32>} : memref<64x216xf32, #tpu.memory_space<vmem>>, vector<64x4xf32>,
    %c0_90 = arith.constant 0 : index
    %c2_91 = arith.constant 2 : index
    %c2_92 = arith.constant 2 : index
    %c0_93 = arith.constant 0 : index
    %81 = vector.load %arg11[%c0_90, %c2_91, %c2_92, %c0_93] : memref<6x6x6x8xf32, #tpu.memory_space<vmem>>, vector<4x4x4x4xf32>
    %82 = vector.shape_cast %81 : vector<4x4x4x4xf32> to vector<64x4xf32>
    %c0_94 = arith.constant 0 : index
    %c32 = arith.constant 32 : index
    %83 = vector.load %arg12[%c0_94, %c32] : memref<64x216xf32, #tpu.memory_space<vmem>>, vector<64x4xf32>
    tpu.vector_store %arg12[%c0_94, %c32], %82 {strides = array<i32>} : memref<64x216xf32, #tpu.memory_space<vmem>>, vector<64x4xf32>,
    %c1_95 = arith.constant 1 : index
    %c0_96 = arith.constant 0 : index
    %c0_97 = arith.constant 0 : index
    %c0_98 = arith.constant 0 : index
    %84 = vector.load %arg11[%c1_95, %c0_96, %c0_97, %c0_98] : memref<6x6x6x8xf32, #tpu.memory_space<vmem>>, vector<4x4x4x4xf32>
    %85 = vector.shape_cast %84 : vector<4x4x4x4xf32> to vector<64x4xf32>
    %c0_99 = arith.constant 0 : index
    %c36 = arith.constant 36 : index
    %86 = vector.load %arg12[%c0_99, %c36] : memref<64x216xf32, #tpu.memory_space<vmem>>, vector<64x4xf32>
    tpu.vector_store %arg12[%c0_99, %c36], %85 {strides = array<i32>} : memref<64x216xf32, #tpu.memory_space<vmem>>, vector<64x4xf32>,
    %c1_100 = arith.constant 1 : index
    %c0_101 = arith.constant 0 : index
    %c1_102 = arith.constant 1 : index
    %c0_103 = arith.constant 0 : index
    %87 = vector.load %arg11[%c1_100, %c0_101, %c1_102, %c0_103] : memref<6x6x6x8xf32, #tpu.memory_space<vmem>>, vector<4x4x4x4xf32>
    %88 = vector.shape_cast %87 : vector<4x4x4x4xf32> to vector<64x4xf32>
    %c0_104 = arith.constant 0 : index
    %c40 = arith.constant 40 : index
    %89 = vector.load %arg12[%c0_104, %c40] : memref<64x216xf32, #tpu.memory_space<vmem>>, vector<64x4xf32>
    tpu.vector_store %arg12[%c0_104, %c40], %88 {strides = array<i32>} : memref<64x216xf32, #tpu.memory_space<vmem>>, vector<64x4xf32>,
    %c1_105 = arith.constant 1 : index
    %c0_106 = arith.constant 0 : index
    %c2_107 = arith.constant 2 : index
    %c0_108 = arith.constant 0 : index
    %90 = vector.load %arg11[%c1_105, %c0_106, %c2_107, %c0_108] : memref<6x6x6x8xf32, #tpu.memory_space<vmem>>, vector<4x4x4x4xf32>
    %91 = vector.shape_cast %90 : vector<4x4x4x4xf32> to vector<64x4xf32>
    %c0_109 = arith.constant 0 : index
    %c44 = arith.constant 44 : index
    %92 = vector.load %arg12[%c0_109, %c44] : memref<64x216xf32, #tpu.memory_space<vmem>>, vector<64x4xf32>
    tpu.vector_store %arg12[%c0_109, %c44], %91 {strides = array<i32>} : memref<64x216xf32, #tpu.memory_space<vmem>>, vector<64x4xf32>,
    %c1_110 = arith.constant 1 : index
    %c1_111 = arith.constant 1 : index
    %c0_112 = arith.constant 0 : index
    %c0_113 = arith.constant 0 : index
    %93 = vector.load %arg11[%c1_110, %c1_111, %c0_112, %c0_113] : memref<6x6x6x8xf32, #tpu.memory_space<vmem>>, vector<4x4x4x4xf32>
    %94 = vector.shape_cast %93 : vector<4x4x4x4xf32> to vector<64x4xf32>
    %c0_114 = arith.constant 0 : index
    %c48 = arith.constant 48 : index
    %95 = vector.load %arg12[%c0_114, %c48] : memref<64x216xf32, #tpu.memory_space<vmem>>, vector<64x4xf32>
    tpu.vector_store %arg12[%c0_114, %c48], %94 {strides = array<i32>} : memref<64x216xf32, #tpu.memory_space<vmem>>, vector<64x4xf32>,
    %c1_115 = arith.constant 1 : index
    %c1_116 = arith.constant 1 : index
    %c1_117 = arith.constant 1 : index
    %c0_118 = arith.constant 0 : index
    %96 = vector.load %arg11[%c1_115, %c1_116, %c1_117, %c0_118] : memref<6x6x6x8xf32, #tpu.memory_space<vmem>>, vector<4x4x4x4xf32>
    %97 = vector.shape_cast %96 : vector<4x4x4x4xf32> to vector<64x4xf32>
    %c0_119 = arith.constant 0 : index
    %c52 = arith.constant 52 : index
    %98 = vector.load %arg12[%c0_119, %c52] : memref<64x216xf32, #tpu.memory_space<vmem>>, vector<64x4xf32>
    tpu.vector_store %arg12[%c0_119, %c52], %97 {strides = array<i32>} : memref<64x216xf32, #tpu.memory_space<vmem>>, vector<64x4xf32>,
    %c1_120 = arith.constant 1 : index
    %c1_121 = arith.constant 1 : index
    %c2_122 = arith.constant 2 : index
    %c0_123 = arith.constant 0 : index
    %99 = vector.load %arg11[%c1_120, %c1_121, %c2_122, %c0_123] : memref<6x6x6x8xf32, #tpu.memory_space<vmem>>, vector<4x4x4x4xf32>
    %100 = vector.shape_cast %99 : vector<4x4x4x4xf32> to vector<64x4xf32>
    %c0_124 = arith.constant 0 : index
    %c56 = arith.constant 56 : index
    %101 = vector.load %arg12[%c0_124, %c56] : memref<64x216xf32, #tpu.memory_space<vmem>>, vector<64x4xf32>
    tpu.vector_store %arg12[%c0_124, %c56], %100 {strides = array<i32>} : memref<64x216xf32, #tpu.memory_space<vmem>>, vector<64x4xf32>,
    %c1_125 = arith.constant 1 : index
    %c2_126 = arith.constant 2 : index
    %c0_127 = arith.constant 0 : index
    %c0_128 = arith.constant 0 : index
    %102 = vector.load %arg11[%c1_125, %c2_126, %c0_127, %c0_128] : memref<6x6x6x8xf32, #tpu.memory_space<vmem>>, vector<4x4x4x4xf32>
    %103 = vector.shape_cast %102 : vector<4x4x4x4xf32> to vector<64x4xf32>
    %c0_129 = arith.constant 0 : index
    %c60 = arith.constant 60 : index
    %104 = vector.load %arg12[%c0_129, %c60] : memref<64x216xf32, #tpu.memory_space<vmem>>, vector<64x4xf32>
    tpu.vector_store %arg12[%c0_129, %c60], %103 {strides = array<i32>} : memref<64x216xf32, #tpu.memory_space<vmem>>, vector<64x4xf32>,
    %c1_130 = arith.constant 1 : index
    %c2_131 = arith.constant 2 : index
    %c1_132 = arith.constant 1 : index
    %c0_133 = arith.constant 0 : index
    %105 = vector.load %arg11[%c1_130, %c2_131, %c1_132, %c0_133] : memref<6x6x6x8xf32, #tpu.memory_space<vmem>>, vector<4x4x4x4xf32>
    %106 = vector.shape_cast %105 : vector<4x4x4x4xf32> to vector<64x4xf32>
    %c0_134 = arith.constant 0 : index
    %c64 = arith.constant 64 : index
    %107 = vector.load %arg12[%c0_134, %c64] : memref<64x216xf32, #tpu.memory_space<vmem>>, vector<64x4xf32>
    tpu.vector_store %arg12[%c0_134, %c64], %106 {strides = array<i32>} : memref<64x216xf32, #tpu.memory_space<vmem>>, vector<64x4xf32>,
    %c1_135 = arith.constant 1 : index
    %c2_136 = arith.constant 2 : index
    %c2_137 = arith.constant 2 : index
    %c0_138 = arith.constant 0 : index
    %108 = vector.load %arg11[%c1_135, %c2_136, %c2_137, %c0_138] : memref<6x6x6x8xf32, #tpu.memory_space<vmem>>, vector<4x4x4x4xf32>
    %109 = vector.shape_cast %108 : vector<4x4x4x4xf32> to vector<64x4xf32>
    %c0_139 = arith.constant 0 : index
    %c68 = arith.constant 68 : index
    %110 = vector.load %arg12[%c0_139, %c68] : memref<64x216xf32, #tpu.memory_space<vmem>>, vector<64x4xf32>
    tpu.vector_store %arg12[%c0_139, %c68], %109 {strides = array<i32>} : memref<64x216xf32, #tpu.memory_space<vmem>>, vector<64x4xf32>,
    %c2_140 = arith.constant 2 : index
    %c0_141 = arith.constant 0 : index
    %c0_142 = arith.constant 0 : index
    %c0_143 = arith.constant 0 : index
    %111 = vector.load %arg11[%c2_140, %c0_141, %c0_142, %c0_143] : memref<6x6x6x8xf32, #tpu.memory_space<vmem>>, vector<4x4x4x4xf32>
    %112 = vector.shape_cast %111 : vector<4x4x4x4xf32> to vector<64x4xf32>
    %c0_144 = arith.constant 0 : index
    %c72 = arith.constant 72 : index
    %113 = vector.load %arg12[%c0_144, %c72] : memref<64x216xf32, #tpu.memory_space<vmem>>, vector<64x4xf32>
    tpu.vector_store %arg12[%c0_144, %c72], %112 {strides = array<i32>} : memref<64x216xf32, #tpu.memory_space<vmem>>, vector<64x4xf32>,
    %c2_145 = arith.constant 2 : index
    %c0_146 = arith.constant 0 : index
    %c1_147 = arith.constant 1 : index
    %c0_148 = arith.constant 0 : index
    %114 = vector.load %arg11[%c2_145, %c0_146, %c1_147, %c0_148] : memref<6x6x6x8xf32, #tpu.memory_space<vmem>>, vector<4x4x4x4xf32>
    %115 = vector.shape_cast %114 : vector<4x4x4x4xf32> to vector<64x4xf32>
    %c0_149 = arith.constant 0 : index
    %c76 = arith.constant 76 : index
    %116 = vector.load %arg12[%c0_149, %c76] : memref<64x216xf32, #tpu.memory_space<vmem>>, vector<64x4xf32>
    tpu.vector_store %arg12[%c0_149, %c76], %115 {strides = array<i32>} : memref<64x216xf32, #tpu.memory_space<vmem>>, vector<64x4xf32>,
    %c2_150 = arith.constant 2 : index
    %c0_151 = arith.constant 0 : index
    %c2_152 = arith.constant 2 : index
    %c0_153 = arith.constant 0 : index
    %117 = vector.load %arg11[%c2_150, %c0_151, %c2_152, %c0_153] : memref<6x6x6x8xf32, #tpu.memory_space<vmem>>, vector<4x4x4x4xf32>
    %118 = vector.shape_cast %117 : vector<4x4x4x4xf32> to vector<64x4xf32>
    %c0_154 = arith.constant 0 : index
    %c80 = arith.constant 80 : index
    %119 = vector.load %arg12[%c0_154, %c80] : memref<64x216xf32, #tpu.memory_space<vmem>>, vector<64x4xf32>
    tpu.vector_store %arg12[%c0_154, %c80], %118 {strides = array<i32>} : memref<64x216xf32, #tpu.memory_space<vmem>>, vector<64x4xf32>,
    %c2_155 = arith.constant 2 : index
    %c1_156 = arith.constant 1 : index
    %c0_157 = arith.constant 0 : index
    %c0_158 = arith.constant 0 : index
    %120 = vector.load %arg11[%c2_155, %c1_156, %c0_157, %c0_158] : memref<6x6x6x8xf32, #tpu.memory_space<vmem>>, vector<4x4x4x4xf32>
    %121 = vector.shape_cast %120 : vector<4x4x4x4xf32> to vector<64x4xf32>
    %c0_159 = arith.constant 0 : index
    %c84 = arith.constant 84 : index
    %122 = vector.load %arg12[%c0_159, %c84] : memref<64x216xf32, #tpu.memory_space<vmem>>, vector<64x4xf32>
    tpu.vector_store %arg12[%c0_159, %c84], %121 {strides = array<i32>} : memref<64x216xf32, #tpu.memory_space<vmem>>, vector<64x4xf32>,
    %c2_160 = arith.constant 2 : index
    %c1_161 = arith.constant 1 : index
    %c1_162 = arith.constant 1 : index
    %c0_163 = arith.constant 0 : index
    %123 = vector.load %arg11[%c2_160, %c1_161, %c1_162, %c0_163] : memref<6x6x6x8xf32, #tpu.memory_space<vmem>>, vector<4x4x4x4xf32>
    %124 = vector.shape_cast %123 : vector<4x4x4x4xf32> to vector<64x4xf32>
    %c0_164 = arith.constant 0 : index
    %c88 = arith.constant 88 : index
    %125 = vector.load %arg12[%c0_164, %c88] : memref<64x216xf32, #tpu.memory_space<vmem>>, vector<64x4xf32>
    tpu.vector_store %arg12[%c0_164, %c88], %124 {strides = array<i32>} : memref<64x216xf32, #tpu.memory_space<vmem>>, vector<64x4xf32>,
    %c2_165 = arith.constant 2 : index
    %c1_166 = arith.constant 1 : index
    %c2_167 = arith.constant 2 : index
    %c0_168 = arith.constant 0 : index
    %126 = vector.load %arg11[%c2_165, %c1_166, %c2_167, %c0_168] : memref<6x6x6x8xf32, #tpu.memory_space<vmem>>, vector<4x4x4x4xf32>
    %127 = vector.shape_cast %126 : vector<4x4x4x4xf32> to vector<64x4xf32>
    %c0_169 = arith.constant 0 : index
    %c92 = arith.constant 92 : index
    %128 = vector.load %arg12[%c0_169, %c92] : memref<64x216xf32, #tpu.memory_space<vmem>>, vector<64x4xf32>
    tpu.vector_store %arg12[%c0_169, %c92], %127 {strides = array<i32>} : memref<64x216xf32, #tpu.memory_space<vmem>>, vector<64x4xf32>,
    %c2_170 = arith.constant 2 : index
    %c2_171 = arith.constant 2 : index
    %c0_172 = arith.constant 0 : index
    %c0_173 = arith.constant 0 : index
    %129 = vector.load %arg11[%c2_170, %c2_171, %c0_172, %c0_173] : memref<6x6x6x8xf32, #tpu.memory_space<vmem>>, vector<4x4x4x4xf32>
    %130 = vector.shape_cast %129 : vector<4x4x4x4xf32> to vector<64x4xf32>
    %c0_174 = arith.constant 0 : index
    %c96 = arith.constant 96 : index
    %131 = vector.load %arg12[%c0_174, %c96] : memref<64x216xf32, #tpu.memory_space<vmem>>, vector<64x4xf32>
    tpu.vector_store %arg12[%c0_174, %c96], %130 {strides = array<i32>} : memref<64x216xf32, #tpu.memory_space<vmem>>, vector<64x4xf32>,
    %c2_175 = arith.constant 2 : index
    %c2_176 = arith.constant 2 : index
    %c1_177 = arith.constant 1 : index
    %c0_178 = arith.constant 0 : index
    %132 = vector.load %arg11[%c2_175, %c2_176, %c1_177, %c0_178] : memref<6x6x6x8xf32, #tpu.memory_space<vmem>>, vector<4x4x4x4xf32>
    %133 = vector.shape_cast %132 : vector<4x4x4x4xf32> to vector<64x4xf32>
    %c0_179 = arith.constant 0 : index
    %c100 = arith.constant 100 : index
    %134 = vector.load %arg12[%c0_179, %c100] : memref<64x216xf32, #tpu.memory_space<vmem>>, vector<64x4xf32>
    tpu.vector_store %arg12[%c0_179, %c100], %133 {strides = array<i32>} : memref<64x216xf32, #tpu.memory_space<vmem>>, vector<64x4xf32>,
    %c2_180 = arith.constant 2 : index
    %c2_181 = arith.constant 2 : index
    %c2_182 = arith.constant 2 : index
    %c0_183 = arith.constant 0 : index
    %135 = vector.load %arg11[%c2_180, %c2_181, %c2_182, %c0_183] : memref<6x6x6x8xf32, #tpu.memory_space<vmem>>, vector<4x4x4x4xf32>
    %136 = vector.shape_cast %135 : vector<4x4x4x4xf32> to vector<64x4xf32>
    %c0_184 = arith.constant 0 : index
    %c104 = arith.constant 104 : index
    %137 = vector.load %arg12[%c0_184, %c104] : memref<64x216xf32, #tpu.memory_space<vmem>>, vector<64x4xf32>
    tpu.vector_store %arg12[%c0_184, %c104], %136 {strides = array<i32>} : memref<64x216xf32, #tpu.memory_space<vmem>>, vector<64x4xf32>,
    %c0_185 = arith.constant 0 : index
    %c0_186 = arith.constant 0 : index
    %138 = vector.load %arg12[%c0_185, %c0_186] : memref<64x216xf32, #tpu.memory_space<vmem>>, vector<64x108xf32>
    %c0_187 = arith.constant 0 : index
    %c0_188 = arith.constant 0 : index
    %139 = vector.load %arg5[%c0_187, %c0_188] : memref<108x8xf32, #tpu.memory_space<vmem>>, vector<108x8xf32>
    %cst_189 = arith.constant dense<0.000000e+00> : vector<64x8xf32>
    %140 = tpu.matmul %138, %139, %cst_189 {dimension_numbers = #tpu.dot_dimension_numbers<[1], [0], [0], [1], [0, 0, 1, 1], [], []>} : vector<64x108xf32>, vector<108x8xf32>, vector<64x8xf32> -> vector<64x8xf32>
    %cst_190 = arith.constant 0.000000e+00 : f32
    %141 = vector.broadcast %cst_190 : f32 to vector<64x8xf32>
    %142 = arith.maximumf %140, %141 : vector<64x8xf32>
    %cst_191 = arith.constant dense<0.000000e+00> : vector<8xf32>
    %143 = vector.multi_reduction <add>, %142, %cst_191 [0] : vector<64x8xf32> to vector<8xf32>
    %144 = vector.shape_cast %143 : vector<8xf32> to vector<1x8xf32>
    %c0_192 = arith.constant 0 : index
    %c0_193 = arith.constant 0 : index
    %145 = vector.load %arg6[%c0_192, %c0_193] : memref<8x8xf32, #tpu.memory_space<vmem>>, vector<8x8xf32>
    %cst_194 = arith.constant dense<0.000000e+00> : vector<1x8xf32>
    %146 = tpu.matmul %144, %145, %cst_194 {dimension_numbers = #tpu.dot_dimension_numbers<[1], [0], [0], [1], [0, 0, 1, 1], [], []>} : vector<1x8xf32>, vector<8x8xf32>, vector<1x8xf32> -> vector<1x8xf32>
    %cst_195 = arith.constant 6.400000e+01 : f32
    %147 = vector.broadcast %cst_195 : f32 to vector<1x8xf32>
    %148 = arith.divf %146, %147 : vector<1x8xf32>
    %149 = vector.broadcast %148 : vector<1x8xf32> to vector<64x8xf32>
    %150 = arith.subf %142, %149 : vector<64x8xf32>
    %151 = arith.mulf %150, %150 : vector<64x8xf32>
    %cst_196 = arith.constant dense<0.000000e+00> : vector<8xf32>
    %152 = vector.multi_reduction <add>, %151, %cst_196 [0] : vector<64x8xf32> to vector<8xf32>
    %153 = vector.shape_cast %152 : vector<8xf32> to vector<1x8xf32>
    %c0_197 = arith.constant 0 : index
    %c0_198 = arith.constant 0 : index
    %154 = vector.load %arg6[%c0_197, %c0_198] : memref<8x8xf32, #tpu.memory_space<vmem>>, vector<8x8xf32>
    %cst_199 = arith.constant dense<0.000000e+00> : vector<1x8xf32>
    %155 = tpu.matmul %153, %154, %cst_199 {dimension_numbers = #tpu.dot_dimension_numbers<[1], [0], [0], [1], [0, 0, 1, 1], [], []>} : vector<1x8xf32>, vector<8x8xf32>, vector<1x8xf32> -> vector<1x8xf32>
    %cst_200 = arith.constant 6.400000e+01 : f32
    %156 = vector.broadcast %cst_200 : f32 to vector<1x8xf32>
    %157 = arith.divf %155, %156 : vector<1x8xf32>
    %c0_201 = arith.constant 0 : index
    %c0_202 = arith.constant 0 : index
    %158 = vector.load %arg7[%c0_201, %c0_202] : memref<1x8xf32, #tpu.memory_space<vmem>>, vector<1x8xf32>
    %cst_203 = arith.constant 9.99999974E-6 : f32
    %159 = vector.broadcast %cst_203 : f32 to vector<1x8xf32>
    %160 = arith.addf %157, %159 : vector<1x8xf32>
    %161 = math.rsqrt %160 : vector<1x8xf32>
    %162 = arith.mulf %158, %161 : vector<1x8xf32>
    %163 = vector.broadcast %162 : vector<1x8xf32> to vector<64x8xf32>
    %164 = arith.mulf %150, %163 : vector<64x8xf32>
    %c0_204 = arith.constant 0 : index
    %c0_205 = arith.constant 0 : index
    %165 = vector.load %arg8[%c0_204, %c0_205] : memref<1x8xf32, #tpu.memory_space<vmem>>, vector<1x8xf32>
    %166 = vector.broadcast %165 : vector<1x8xf32> to vector<64x8xf32>
    %167 = arith.addf %164, %166 : vector<64x8xf32>
    %168 = vector.shape_cast %167 : vector<64x8xf32> to vector<4x4x4x8xf32>
    %c1_206 = arith.constant 1 : index
    %c1_207 = arith.constant 1 : index
    %c1_208 = arith.constant 1 : index
    %c0_209 = arith.constant 0 : index
    %169 = vector.load %arg11[%c1_206, %c1_207, %c1_208, %c0_209] : memref<6x6x6x8xf32, #tpu.memory_space<vmem>>, vector<4x4x4x8xf32>
    tpu.vector_store %arg11[%c1_206, %c1_207, %c1_208, %c0_209], %168 {strides = array<i32>} : memref<6x6x6x8xf32, #tpu.memory_space<vmem>>, vector<4x4x4x8xf32>,
    %c0_210 = arith.constant 0 : index
    %c0_211 = arith.constant 0 : index
    %c0_212 = arith.constant 0 : index
    %c0_213 = arith.constant 0 : index
    %170 = vector.load %arg11[%c0_210, %c0_211, %c0_212, %c0_213] : memref<6x6x6x8xf32, #tpu.memory_space<vmem>>, vector<4x4x4x8xf32>
    %171 = vector.shape_cast %170 : vector<4x4x4x8xf32> to vector<64x8xf32>
    %c0_214 = arith.constant 0 : index
    %c0_215 = arith.constant 0 : index
    %172 = vector.load %arg12[%c0_214, %c0_215] : memref<64x216xf32, #tpu.memory_space<vmem>>, vector<64x8xf32>
    tpu.vector_store %arg12[%c0_214, %c0_215], %171 {strides = array<i32>} : memref<64x216xf32, #tpu.memory_space<vmem>>, vector<64x8xf32>,
    %c0_216 = arith.constant 0 : index
    %c0_217 = arith.constant 0 : index
    %c1_218 = arith.constant 1 : index
    %c0_219 = arith.constant 0 : index
    %173 = vector.load %arg11[%c0_216, %c0_217, %c1_218, %c0_219] : memref<6x6x6x8xf32, #tpu.memory_space<vmem>>, vector<4x4x4x8xf32>
    %174 = vector.shape_cast %173 : vector<4x4x4x8xf32> to vector<64x8xf32>
    %c0_220 = arith.constant 0 : index
    %c8_221 = arith.constant 8 : index
    %175 = vector.load %arg12[%c0_220, %c8_221] : memref<64x216xf32, #tpu.memory_space<vmem>>, vector<64x8xf32>
    tpu.vector_store %arg12[%c0_220, %c8_221], %174 {strides = array<i32>} : memref<64x216xf32, #tpu.memory_space<vmem>>, vector<64x8xf32>,
    %c0_222 = arith.constant 0 : index
    %c0_223 = arith.constant 0 : index
    %c2_224 = arith.constant 2 : index
    %c0_225 = arith.constant 0 : index
    %176 = vector.load %arg11[%c0_222, %c0_223, %c2_224, %c0_225] : memref<6x6x6x8xf32, #tpu.memory_space<vmem>>, vector<4x4x4x8xf32>
    %177 = vector.shape_cast %176 : vector<4x4x4x8xf32> to vector<64x8xf32>
    %c0_226 = arith.constant 0 : index
    %c16_227 = arith.constant 16 : index
    %178 = vector.load %arg12[%c0_226, %c16_227] : memref<64x216xf32, #tpu.memory_space<vmem>>, vector<64x8xf32>
    tpu.vector_store %arg12[%c0_226, %c16_227], %177 {strides = array<i32>} : memref<64x216xf32, #tpu.memory_space<vmem>>, vector<64x8xf32>,
    %c0_228 = arith.constant 0 : index
    %c1_229 = arith.constant 1 : index
    %c0_230 = arith.constant 0 : index
    %c0_231 = arith.constant 0 : index
    %179 = vector.load %arg11[%c0_228, %c1_229, %c0_230, %c0_231] : memref<6x6x6x8xf32, #tpu.memory_space<vmem>>, vector<4x4x4x8xf32>
    %180 = vector.shape_cast %179 : vector<4x4x4x8xf32> to vector<64x8xf32>
    %c0_232 = arith.constant 0 : index
    %c24_233 = arith.constant 24 : index
    %181 = vector.load %arg12[%c0_232, %c24_233] : memref<64x216xf32, #tpu.memory_space<vmem>>, vector<64x8xf32>
    tpu.vector_store %arg12[%c0_232, %c24_233], %180 {strides = array<i32>} : memref<64x216xf32, #tpu.memory_space<vmem>>, vector<64x8xf32>,
    %c0_234 = arith.constant 0 : index
    %c1_235 = arith.constant 1 : index
    %c1_236 = arith.constant 1 : index
    %c0_237 = arith.constant 0 : index
    %182 = vector.load %arg11[%c0_234, %c1_235, %c1_236, %c0_237] : memref<6x6x6x8xf32, #tpu.memory_space<vmem>>, vector<4x4x4x8xf32>
    %183 = vector.shape_cast %182 : vector<4x4x4x8xf32> to vector<64x8xf32>
    %c0_238 = arith.constant 0 : index
    %c32_239 = arith.constant 32 : index
    %184 = vector.load %arg12[%c0_238, %c32_239] : memref<64x216xf32, #tpu.memory_space<vmem>>, vector<64x8xf32>
    tpu.vector_store %arg12[%c0_238, %c32_239], %183 {strides = array<i32>} : memref<64x216xf32, #tpu.memory_space<vmem>>, vector<64x8xf32>,
    %c0_240 = arith.constant 0 : index
    %c1_241 = arith.constant 1 : index
    %c2_242 = arith.constant 2 : index
    %c0_243 = arith.constant 0 : index
    %185 = vector.load %arg11[%c0_240, %c1_241, %c2_242, %c0_243] : memref<6x6x6x8xf32, #tpu.memory_space<vmem>>, vector<4x4x4x8xf32>
    %186 = vector.shape_cast %185 : vector<4x4x4x8xf32> to vector<64x8xf32>
    %c0_244 = arith.constant 0 : index
    %c40_245 = arith.constant 40 : index
    %187 = vector.load %arg12[%c0_244, %c40_245] : memref<64x216xf32, #tpu.memory_space<vmem>>, vector<64x8xf32>
    tpu.vector_store %arg12[%c0_244, %c40_245], %186 {strides = array<i32>} : memref<64x216xf32, #tpu.memory_space<vmem>>, vector<64x8xf32>,
    %c0_246 = arith.constant 0 : index
    %c2_247 = arith.constant 2 : index
    %c0_248 = arith.constant 0 : index
    %c0_249 = arith.constant 0 : index
    %188 = vector.load %arg11[%c0_246, %c2_247, %c0_248, %c0_249] : memref<6x6x6x8xf32, #tpu.memory_space<vmem>>, vector<4x4x4x8xf32>
    %189 = vector.shape_cast %188 : vector<4x4x4x8xf32> to vector<64x8xf32>
    %c0_250 = arith.constant 0 : index
    %c48_251 = arith.constant 48 : index
    %190 = vector.load %arg12[%c0_250, %c48_251] : memref<64x216xf32, #tpu.memory_space<vmem>>, vector<64x8xf32>
    tpu.vector_store %arg12[%c0_250, %c48_251], %189 {strides = array<i32>} : memref<64x216xf32, #tpu.memory_space<vmem>>, vector<64x8xf32>,
    %c0_252 = arith.constant 0 : index
    %c2_253 = arith.constant 2 : index
    %c1_254 = arith.constant 1 : index
    %c0_255 = arith.constant 0 : index
    %191 = vector.load %arg11[%c0_252, %c2_253, %c1_254, %c0_255] : memref<6x6x6x8xf32, #tpu.memory_space<vmem>>, vector<4x4x4x8xf32>
    %192 = vector.shape_cast %191 : vector<4x4x4x8xf32> to vector<64x8xf32>
    %c0_256 = arith.constant 0 : index
    %c56_257 = arith.constant 56 : index
    %193 = vector.load %arg12[%c0_256, %c56_257] : memref<64x216xf32, #tpu.memory_space<vmem>>, vector<64x8xf32>
    tpu.vector_store %arg12[%c0_256, %c56_257], %192 {strides = array<i32>} : memref<64x216xf32, #tpu.memory_space<vmem>>, vector<64x8xf32>,
    %c0_258 = arith.constant 0 : index
    %c2_259 = arith.constant 2 : index
    %c2_260 = arith.constant 2 : index
    %c0_261 = arith.constant 0 : index
    %194 = vector.load %arg11[%c0_258, %c2_259, %c2_260, %c0_261] : memref<6x6x6x8xf32, #tpu.memory_space<vmem>>, vector<4x4x4x8xf32>
    %195 = vector.shape_cast %194 : vector<4x4x4x8xf32> to vector<64x8xf32>
    %c0_262 = arith.constant 0 : index
    %c64_263 = arith.constant 64 : index
    %196 = vector.load %arg12[%c0_262, %c64_263] : memref<64x216xf32, #tpu.memory_space<vmem>>, vector<64x8xf32>
    tpu.vector_store %arg12[%c0_262, %c64_263], %195 {strides = array<i32>} : memref<64x216xf32, #tpu.memory_space<vmem>>, vector<64x8xf32>,
    %c1_264 = arith.constant 1 : index
    %c0_265 = arith.constant 0 : index
    %c0_266 = arith.constant 0 : index
    %c0_267 = arith.constant 0 : index
    %197 = vector.load %arg11[%c1_264, %c0_265, %c0_266, %c0_267] : memref<6x6x6x8xf32, #tpu.memory_space<vmem>>, vector<4x4x4x8xf32>
    %198 = vector.shape_cast %197 : vector<4x4x4x8xf32> to vector<64x8xf32>
    %c0_268 = arith.constant 0 : index
    %c72_269 = arith.constant 72 : index
    %199 = vector.load %arg12[%c0_268, %c72_269] : memref<64x216xf32, #tpu.memory_space<vmem>>, vector<64x8xf32>
    tpu.vector_store %arg12[%c0_268, %c72_269], %198 {strides = array<i32>} : memref<64x216xf32, #tpu.memory_space<vmem>>, vector<64x8xf32>,
    %c1_270 = arith.constant 1 : index
    %c0_271 = arith.constant 0 : index
    %c1_272 = arith.constant 1 : index
    %c0_273 = arith.constant 0 : index
    %200 = vector.load %arg11[%c1_270, %c0_271, %c1_272, %c0_273] : memref<6x6x6x8xf32, #tpu.memory_space<vmem>>, vector<4x4x4x8xf32>
    %201 = vector.shape_cast %200 : vector<4x4x4x8xf32> to vector<64x8xf32>
    %c0_274 = arith.constant 0 : index
    %c80_275 = arith.constant 80 : index
    %202 = vector.load %arg12[%c0_274, %c80_275] : memref<64x216xf32, #tpu.memory_space<vmem>>, vector<64x8xf32>
    tpu.vector_store %arg12[%c0_274, %c80_275], %201 {strides = array<i32>} : memref<64x216xf32, #tpu.memory_space<vmem>>, vector<64x8xf32>,
    %c1_276 = arith.constant 1 : index
    %c0_277 = arith.constant 0 : index
    %c2_278 = arith.constant 2 : index
    %c0_279 = arith.constant 0 : index
    %203 = vector.load %arg11[%c1_276, %c0_277, %c2_278, %c0_279] : memref<6x6x6x8xf32, #tpu.memory_space<vmem>>, vector<4x4x4x8xf32>
    %204 = vector.shape_cast %203 : vector<4x4x4x8xf32> to vector<64x8xf32>
    %c0_280 = arith.constant 0 : index
    %c88_281 = arith.constant 88 : index
    %205 = vector.load %arg12[%c0_280, %c88_281] : memref<64x216xf32, #tpu.memory_space<vmem>>, vector<64x8xf32>
    tpu.vector_store %arg12[%c0_280, %c88_281], %204 {strides = array<i32>} : memref<64x216xf32, #tpu.memory_space<vmem>>, vector<64x8xf32>,
    %c1_282 = arith.constant 1 : index
    %c1_283 = arith.constant 1 : index
    %c0_284 = arith.constant 0 : index
    %c0_285 = arith.constant 0 : index
    %206 = vector.load %arg11[%c1_282, %c1_283, %c0_284, %c0_285] : memref<6x6x6x8xf32, #tpu.memory_space<vmem>>, vector<4x4x4x8xf32>
    %207 = vector.shape_cast %206 : vector<4x4x4x8xf32> to vector<64x8xf32>
    %c0_286 = arith.constant 0 : index
    %c96_287 = arith.constant 96 : index
    %208 = vector.load %arg12[%c0_286, %c96_287] : memref<64x216xf32, #tpu.memory_space<vmem>>, vector<64x8xf32>
    tpu.vector_store %arg12[%c0_286, %c96_287], %207 {strides = array<i32>} : memref<64x216xf32, #tpu.memory_space<vmem>>, vector<64x8xf32>,
    %c1_288 = arith.constant 1 : index
    %c1_289 = arith.constant 1 : index
    %c1_290 = arith.constant 1 : index
    %c0_291 = arith.constant 0 : index
    %209 = vector.load %arg11[%c1_288, %c1_289, %c1_290, %c0_291] : memref<6x6x6x8xf32, #tpu.memory_space<vmem>>, vector<4x4x4x8xf32>
    %210 = vector.shape_cast %209 : vector<4x4x4x8xf32> to vector<64x8xf32>
    %c0_292 = arith.constant 0 : index
    %c104_293 = arith.constant 104 : index
    %211 = vector.load %arg12[%c0_292, %c104_293] : memref<64x216xf32, #tpu.memory_space<vmem>>, vector<64x8xf32>
    tpu.vector_store %arg12[%c0_292, %c104_293], %210 {strides = array<i32>} : memref<64x216xf32, #tpu.memory_space<vmem>>, vector<64x8xf32>,
    %c1_294 = arith.constant 1 : index
    %c1_295 = arith.constant 1 : index
    %c2_296 = arith.constant 2 : index
    %c0_297 = arith.constant 0 : index
    %212 = vector.load %arg11[%c1_294, %c1_295, %c2_296, %c0_297] : memref<6x6x6x8xf32, #tpu.memory_space<vmem>>, vector<4x4x4x8xf32>
    %213 = vector.shape_cast %212 : vector<4x4x4x8xf32> to vector<64x8xf32>
    %c0_298 = arith.constant 0 : index
    %c112 = arith.constant 112 : index
    %214 = vector.load %arg12[%c0_298, %c112] : memref<64x216xf32, #tpu.memory_space<vmem>>, vector<64x8xf32>
    tpu.vector_store %arg12[%c0_298, %c112], %213 {strides = array<i32>} : memref<64x216xf32, #tpu.memory_space<vmem>>, vector<64x8xf32>,
    %c1_299 = arith.constant 1 : index
    %c2_300 = arith.constant 2 : index
    %c0_301 = arith.constant 0 : index
    %c0_302 = arith.constant 0 : index
    %215 = vector.load %arg11[%c1_299, %c2_300, %c0_301, %c0_302] : memref<6x6x6x8xf32, #tpu.memory_space<vmem>>, vector<4x4x4x8xf32>
    %216 = vector.shape_cast %215 : vector<4x4x4x8xf32> to vector<64x8xf32>
    %c0_303 = arith.constant 0 : index
    %c120 = arith.constant 120 : index
    %217 = vector.load %arg12[%c0_303, %c120] : memref<64x216xf32, #tpu.memory_space<vmem>>, vector<64x8xf32>
    tpu.vector_store %arg12[%c0_303, %c120], %216 {strides = array<i32>} : memref<64x216xf32, #tpu.memory_space<vmem>>, vector<64x8xf32>,
    %c1_304 = arith.constant 1 : index
    %c2_305 = arith.constant 2 : index
    %c1_306 = arith.constant 1 : index
    %c0_307 = arith.constant 0 : index
    %218 = vector.load %arg11[%c1_304, %c2_305, %c1_306, %c0_307] : memref<6x6x6x8xf32, #tpu.memory_space<vmem>>, vector<4x4x4x8xf32>
    %219 = vector.shape_cast %218 : vector<4x4x4x8xf32> to vector<64x8xf32>
    %c0_308 = arith.constant 0 : index
    %c128 = arith.constant 128 : index
    %220 = vector.load %arg12[%c0_308, %c128] : memref<64x216xf32, #tpu.memory_space<vmem>>, vector<64x8xf32>
    tpu.vector_store %arg12[%c0_308, %c128], %219 {strides = array<i32>} : memref<64x216xf32, #tpu.memory_space<vmem>>, vector<64x8xf32>,
    %c1_309 = arith.constant 1 : index
    %c2_310 = arith.constant 2 : index
    %c2_311 = arith.constant 2 : index
    %c0_312 = arith.constant 0 : index
    %221 = vector.load %arg11[%c1_309, %c2_310, %c2_311, %c0_312] : memref<6x6x6x8xf32, #tpu.memory_space<vmem>>, vector<4x4x4x8xf32>
    %222 = vector.shape_cast %221 : vector<4x4x4x8xf32> to vector<64x8xf32>
    %c0_313 = arith.constant 0 : index
    %c136 = arith.constant 136 : index
    %223 = vector.load %arg12[%c0_313, %c136] : memref<64x216xf32, #tpu.memory_space<vmem>>, vector<64x8xf32>
    tpu.vector_store %arg12[%c0_313, %c136], %222 {strides = array<i32>} : memref<64x216xf32, #tpu.memory_space<vmem>>, vector<64x8xf32>,
    %c2_314 = arith.constant 2 : index
    %c0_315 = arith.constant 0 : index
    %c0_316 = arith.constant 0 : index
    %c0_317 = arith.constant 0 : index
    %224 = vector.load %arg11[%c2_314, %c0_315, %c0_316, %c0_317] : memref<6x6x6x8xf32, #tpu.memory_space<vmem>>, vector<4x4x4x8xf32>
    %225 = vector.shape_cast %224 : vector<4x4x4x8xf32> to vector<64x8xf32>
    %c0_318 = arith.constant 0 : index
    %c144 = arith.constant 144 : index
    %226 = vector.load %arg12[%c0_318, %c144] : memref<64x216xf32, #tpu.memory_space<vmem>>, vector<64x8xf32>
    tpu.vector_store %arg12[%c0_318, %c144], %225 {strides = array<i32>} : memref<64x216xf32, #tpu.memory_space<vmem>>, vector<64x8xf32>,
    %c2_319 = arith.constant 2 : index
    %c0_320 = arith.constant 0 : index
    %c1_321 = arith.constant 1 : index
    %c0_322 = arith.constant 0 : index
    %227 = vector.load %arg11[%c2_319, %c0_320, %c1_321, %c0_322] : memref<6x6x6x8xf32, #tpu.memory_space<vmem>>, vector<4x4x4x8xf32>
    %228 = vector.shape_cast %227 : vector<4x4x4x8xf32> to vector<64x8xf32>
    %c0_323 = arith.constant 0 : index
    %c152 = arith.constant 152 : index
    %229 = vector.load %arg12[%c0_323, %c152] : memref<64x216xf32, #tpu.memory_space<vmem>>, vector<64x8xf32>
    tpu.vector_store %arg12[%c0_323, %c152], %228 {strides = array<i32>} : memref<64x216xf32, #tpu.memory_space<vmem>>, vector<64x8xf32>,
    %c2_324 = arith.constant 2 : index
    %c0_325 = arith.constant 0 : index
    %c2_326 = arith.constant 2 : index
    %c0_327 = arith.constant 0 : index
    %230 = vector.load %arg11[%c2_324, %c0_325, %c2_326, %c0_327] : memref<6x6x6x8xf32, #tpu.memory_space<vmem>>, vector<4x4x4x8xf32>
    %231 = vector.shape_cast %230 : vector<4x4x4x8xf32> to vector<64x8xf32>
    %c0_328 = arith.constant 0 : index
    %c160 = arith.constant 160 : index
    %232 = vector.load %arg12[%c0_328, %c160] : memref<64x216xf32, #tpu.memory_space<vmem>>, vector<64x8xf32>
    tpu.vector_store %arg12[%c0_328, %c160], %231 {strides = array<i32>} : memref<64x216xf32, #tpu.memory_space<vmem>>, vector<64x8xf32>,
    %c2_329 = arith.constant 2 : index
    %c1_330 = arith.constant 1 : index
    %c0_331 = arith.constant 0 : index
    %c0_332 = arith.constant 0 : index
    %233 = vector.load %arg11[%c2_329, %c1_330, %c0_331, %c0_332] : memref<6x6x6x8xf32, #tpu.memory_space<vmem>>, vector<4x4x4x8xf32>
    %234 = vector.shape_cast %233 : vector<4x4x4x8xf32> to vector<64x8xf32>
    %c0_333 = arith.constant 0 : index
    %c168 = arith.constant 168 : index
    %235 = vector.load %arg12[%c0_333, %c168] : memref<64x216xf32, #tpu.memory_space<vmem>>, vector<64x8xf32>
    tpu.vector_store %arg12[%c0_333, %c168], %234 {strides = array<i32>} : memref<64x216xf32, #tpu.memory_space<vmem>>, vector<64x8xf32>,
    %c2_334 = arith.constant 2 : index
    %c1_335 = arith.constant 1 : index
    %c1_336 = arith.constant 1 : index
    %c0_337 = arith.constant 0 : index
    %236 = vector.load %arg11[%c2_334, %c1_335, %c1_336, %c0_337] : memref<6x6x6x8xf32, #tpu.memory_space<vmem>>, vector<4x4x4x8xf32>
    %237 = vector.shape_cast %236 : vector<4x4x4x8xf32> to vector<64x8xf32>
    %c0_338 = arith.constant 0 : index
    %c176 = arith.constant 176 : index
    %238 = vector.load %arg12[%c0_338, %c176] : memref<64x216xf32, #tpu.memory_space<vmem>>, vector<64x8xf32>
    tpu.vector_store %arg12[%c0_338, %c176], %237 {strides = array<i32>} : memref<64x216xf32, #tpu.memory_space<vmem>>, vector<64x8xf32>,
    %c2_339 = arith.constant 2 : index
    %c1_340 = arith.constant 1 : index
    %c2_341 = arith.constant 2 : index
    %c0_342 = arith.constant 0 : index
    %239 = vector.load %arg11[%c2_339, %c1_340, %c2_341, %c0_342] : memref<6x6x6x8xf32, #tpu.memory_space<vmem>>, vector<4x4x4x8xf32>
    %240 = vector.shape_cast %239 : vector<4x4x4x8xf32> to vector<64x8xf32>
    %c0_343 = arith.constant 0 : index
    %c184 = arith.constant 184 : index
    %241 = vector.load %arg12[%c0_343, %c184] : memref<64x216xf32, #tpu.memory_space<vmem>>, vector<64x8xf32>
    tpu.vector_store %arg12[%c0_343, %c184], %240 {strides = array<i32>} : memref<64x216xf32, #tpu.memory_space<vmem>>, vector<64x8xf32>,
    %c2_344 = arith.constant 2 : index
    %c2_345 = arith.constant 2 : index
    %c0_346 = arith.constant 0 : index
    %c0_347 = arith.constant 0 : index
    %242 = vector.load %arg11[%c2_344, %c2_345, %c0_346, %c0_347] : memref<6x6x6x8xf32, #tpu.memory_space<vmem>>, vector<4x4x4x8xf32>
    %243 = vector.shape_cast %242 : vector<4x4x4x8xf32> to vector<64x8xf32>
    %c0_348 = arith.constant 0 : index
    %c192 = arith.constant 192 : index
    %244 = vector.load %arg12[%c0_348, %c192] : memref<64x216xf32, #tpu.memory_space<vmem>>, vector<64x8xf32>
    tpu.vector_store %arg12[%c0_348, %c192], %243 {strides = array<i32>} : memref<64x216xf32, #tpu.memory_space<vmem>>, vector<64x8xf32>,
    %c2_349 = arith.constant 2 : index
    %c2_350 = arith.constant 2 : index
    %c1_351 = arith.constant 1 : index
    %c0_352 = arith.constant 0 : index
    %245 = vector.load %arg11[%c2_349, %c2_350, %c1_351, %c0_352] : memref<6x6x6x8xf32, #tpu.memory_space<vmem>>, vector<4x4x4x8xf32>
    %246 = vector.shape_cast %245 : vector<4x4x4x8xf32> to vector<64x8xf32>
    %c0_353 = arith.constant 0 : index
    %c200 = arith.constant 200 : index
    %247 = vector.load %arg12[%c0_353, %c200] : memref<64x216xf32, #tpu.memory_space<vmem>>, vector<64x8xf32>
    tpu.vector_store %arg12[%c0_353, %c200], %246 {strides = array<i32>} : memref<64x216xf32, #tpu.memory_space<vmem>>, vector<64x8xf32>,
    %c2_354 = arith.constant 2 : index
    %c2_355 = arith.constant 2 : index
    %c2_356 = arith.constant 2 : index
    %c0_357 = arith.constant 0 : index
    %248 = vector.load %arg11[%c2_354, %c2_355, %c2_356, %c0_357] : memref<6x6x6x8xf32, #tpu.memory_space<vmem>>, vector<4x4x4x8xf32>
    %249 = vector.shape_cast %248 : vector<4x4x4x8xf32> to vector<64x8xf32>
    %c0_358 = arith.constant 0 : index
    %c208 = arith.constant 208 : index
    %250 = vector.load %arg12[%c0_358, %c208] : memref<64x216xf32, #tpu.memory_space<vmem>>, vector<64x8xf32>
    tpu.vector_store %arg12[%c0_358, %c208], %249 {strides = array<i32>} : memref<64x216xf32, #tpu.memory_space<vmem>>, vector<64x8xf32>,
    %c0_359 = arith.constant 0 : index
    %c0_360 = arith.constant 0 : index
    %251 = vector.load %arg12[%c0_359, %c0_360] : memref<64x216xf32, #tpu.memory_space<vmem>>, vector<64x216xf32>
    %c0_361 = arith.constant 0 : index
    %c0_362 = arith.constant 0 : index
    %252 = vector.load %arg9[%c0_361, %c0_362] : memref<216x16xf32, #tpu.memory_space<vmem>>, vector<216x16xf32>
    %cst_363 = arith.constant dense<0.000000e+00> : vector<64x16xf32>
    %253 = tpu.matmul %251, %252, %cst_363 {dimension_numbers = #tpu.dot_dimension_numbers<[1], [0], [0], [1], [0, 0, 1, 1], [], []>} : vector<64x216xf32>, vector<216x16xf32>, vector<64x16xf32> -> vector<64x16xf32>
    %cst_364 = arith.constant 0.000000e+00 : f32
    %254 = vector.broadcast %cst_364 : f32 to vector<64x16xf32>
    %255 = arith.maximumf %253, %254 : vector<64x16xf32>
    %c0_365 = arith.constant 0 : index
    %c0_366 = arith.constant 0 : index
    %c0_367 = arith.constant 0 : index
    %256 = vector.load %arg10[%c0_365, %c0_366, %c0_367] : memref<1x64x16xf32, #tpu.memory_space<vmem>>, vector<1x64x16xf32>
    %257 = vector.shape_cast %256 : vector<1x64x16xf32> to vector<64x16xf32>
    %258 = vector.shape_cast %255 : vector<64x16xf32> to vector<1x64x16xf32>
    tpu.vector_store %arg10[%c0_365, %c0_366, %c0_367], %258 {strides = array<i32>} : memref<1x64x16xf32, #tpu.memory_space<vmem>>, vector<1x64x16xf32>,
    return
  }
  func.func @transform_0(%arg0: i32) -> (i32, i32, i32, i32, i32) {
    %c0_i32 = arith.constant 0 : i32
    %c0_i32_0 = arith.constant 0 : i32
    %c0_i32_1 = arith.constant 0 : i32
    %c0_i32_2 = arith.constant 0 : i32
    %c0_i32_3 = arith.constant 0 : i32
    return %arg0, %c0_i32, %c0_i32_0, %c0_i32_1, %c0_i32_2 : i32, i32, i32, i32, i32
  }
  func.func @transform_1(%arg0: i32) -> (i32, i32) {
    %c0_i32 = arith.constant 0 : i32
    %c0_i32_0 = arith.constant 0 : i32
    %c0_i32_1 = arith.constant 0 : i32
    return %c0_i32, %c0_i32_0 : i32, i32
  }
  func.func @transform_2(%arg0: i32) -> (i32, i32) {
    %c0_i32 = arith.constant 0 : i32
    %c0_i32_0 = arith.constant 0 : i32
    %c0_i32_1 = arith.constant 0 : i32
    return %c0_i32, %c0_i32_0 : i32, i32
  }
  func.func @transform_3(%arg0: i32) -> (i32, i32) {
    %c0_i32 = arith.constant 0 : i32
    %c0_i32_0 = arith.constant 0 : i32
    %c0_i32_1 = arith.constant 0 : i32
    return %c0_i32, %c0_i32_0 : i32, i32
  }
  func.func @transform_4(%arg0: i32) -> (i32, i32) {
    %c0_i32 = arith.constant 0 : i32
    %c0_i32_0 = arith.constant 0 : i32
    %c0_i32_1 = arith.constant 0 : i32
    return %c0_i32, %c0_i32_0 : i32, i32
  }
  func.func @transform_5(%arg0: i32) -> (i32, i32) {
    %c0_i32 = arith.constant 0 : i32
    %c0_i32_0 = arith.constant 0 : i32
    %c0_i32_1 = arith.constant 0 : i32
    return %c0_i32, %c0_i32_0 : i32, i32
  }
  func.func @transform_6(%arg0: i32) -> (i32, i32) {
    %c0_i32 = arith.constant 0 : i32
    %c0_i32_0 = arith.constant 0 : i32
    %c0_i32_1 = arith.constant 0 : i32
    return %c0_i32, %c0_i32_0 : i32, i32
  }
  func.func @transform_7(%arg0: i32) -> (i32, i32) {
    %c0_i32 = arith.constant 0 : i32
    %c0_i32_0 = arith.constant 0 : i32
    %c0_i32_1 = arith.constant 0 : i32
    return %c0_i32, %c0_i32_0 : i32, i32
  }
  func.func @transform_8(%arg0: i32) -> (i32, i32) {
    %c0_i32 = arith.constant 0 : i32
    %c0_i32_0 = arith.constant 0 : i32
    %c0_i32_1 = arith.constant 0 : i32
    return %c0_i32, %c0_i32_0 : i32, i32
  }
  func.func @transform_9(%arg0: i32) -> (i32, i32, i32) {
    %c0_i32 = arith.constant 0 : i32
    %c0_i32_0 = arith.constant 0 : i32
    %c0_i32_1 = arith.constant 0 : i32
    return %arg0, %c0_i32, %c0_i32_0 : i32, i32, i32
  }
}

</mosaic_0001>

<bundles_post_ra>
// kernel: tpu_custom_call.1
= control target key start
LH: loop header
LB: loop body
LE: loop exit
PB: predicated region body
PF: predicated region fallthrough
CT: control target
= control target key end

     0   :  { %s9164_s0 = inlined_call_operand.hbm [shape: f32[2,8,8,4,8], index: 0, kind: input, shape index: {}]   ;;  %s9165_s1 = inlined_call_operand.vmem [shape: f32[4,4], index: 1, kind: input, shape index: {}]   ;;  %s9166_s2 = inlined_call_operand.vmem [shape: f32[1,4], index: 2, kind: input, shape index: {}]   ;;  %s9167_s3 = inlined_call_operand.vmem [shape: f32[1,4], index: 3, kind: input, shape index: {}]   ;;  %s9168_s4 = inlined_call_operand.vmem [shape: f32[108,8], index: 4, kind: input, shape index: {}]   ;;  %s9169_s5 = inlined_call_operand.vmem [shape: f32[8,8], index: 5, kind: input, shape index: {}]   ;;  %s9170_s6 = inlined_call_operand.vmem [shape: f32[1,8], index: 6, kind: input, shape index: {}]   ;;  %s9171_s7 = inlined_call_operand.vmem [shape: f32[1,8], index: 7, kind: input, shape index: {}]   ;;  %s9172_s8 = inlined_call_operand.vmem [shape: f32[216,16], index: 8, kind: input, shape index: {}]   ;;  %s9173_s9 = inlined_call_operand.vmem [shape: f32[2,64,16], index: 9, kind: output, shape index: {}]  }
   0x1   :  { %9254 = sst [smem:[#allocation63_spill]] %s9164_s0 }
   0x2   :  { %9255 = sst [smem:[#allocation64_spill]] %s9165_s1 }
   0x3   :  { %9256 = sst [smem:[#allocation65_spill]] %s9166_s2 }
   0x4   :  { %9257 = sst [smem:[#allocation66_spill]] %s9167_s3 }
   0x5   :  { %14 = vsyncpa [#allocation5], 0 }
   0x6   :  { %16 = vsyncpa [#allocation5 + $0x1], 0  ;;  %s6711_s30 = smov 0   ;;  %s6713_s10 = smov 0  }
   0x7   :  { %s6715_s11 = smov 0   ;;  %s6717_s12 = smov 0  }
   0x8 LB: > { %s6730_s13 = sadd.s32 4294967295, %s6623_s12   ;;  %s6733_s14 = sadd.s32 1, %s6623_s12   ;;  %s6623_s12 = sphi %s6717_s12, %s9403_s12   ;;  %s6619_s11 = sphi %s6715_s11, %s9402_s11   ;;  %s6615_s10 = sphi %s6713_s10, %s9401_s10   ;;  %s6611_s30 = sphi %s6711_s30, %s9400_s30  }
   0x9   : > { %s26_s15 = ssub.s32 %s6623_s12, %s6733_s14  ;;  %s29_s16 = sadd.s32 1, %s6619_s11 }
   0xa   : > { %p27_p0 = scmp.eq.s32.totalorder %s26_s15, 0  ;;  %p36_p1 = scmp.ne.s32.totalorder %s6619_s11, %s6615_s10 }
   0xb   : > { %p37_p2 = scmp.eq.s32.totalorder %s6623_s12, 0  ;;  %p42_p3 = scmp.ne.s32.totalorder %s6615_s10, %s6611_s30 }
   0xc   : > { %s6743_s17 = scalar_select %p27_p0, %s6619_s11, %s29_s16  }
   0xd   : > { %p38_p4 = por %p37_p2, %p36_p1  ;;  %p43_p5 = scmp.eq.s32.totalorder %s6730_s13, 0 }
   0xe   : > { %p6055_p6 = scmp.lt.s32.totalorder %s6623_s12, 2  ;;  %s284_s19 = sand.u32 1, %s6619_s11  }
   0xf   : > { %p6747_p7 = por %p43_p5, %p42_p3  ;;  %s5854_s20 = sshll.u32 %s284_s19, 8 }
  0x10   : > { %s5888_s21 = sshll.u32 %s6623_s12, 12  ;;  %s9259_s0 = sld [smem:[#allocation63_spill]] }
  0x11   : > { %s288_s25 = scalar_lea.vmem [#allocation4], %s5854_s20  ;;  %p6760_p8 = pnand %p6055_p6, %p38_p4 }
  0x12   : > { %s295_s26 = sshll.u32 %s288_s25, 4  ;;  %s6765_s28 = scalar_lea.sflag [#allocation5], %s284_s19  ;;  %s6758_s26 = int_to_ptr.vmem [resolvable:$true] %s295_s26 }
  0x13   : > { %p6561_p11 = pneg %p6760_p8 }
  0x16   : > { %s6756_s24 = scalar_lea.hbm %s9259_s0, %s5888_s21  ;;  %s6564_s16 = scalar_lea.hbm %s9259_s0, 8192 }
  0x17   : > { %s6559_s29 = scalar_lea.hbm %s6756_s24, 4096  ;;  %p6565_p0 = scmp.lt.u32.totalorder %s6756_s24, %s9259_s0 }
  0x18   : > { %p6560_p10 = scmp.ne.s32.totalorder %s6756_s24, %s6559_s29  ;;  %p6566_p1 = scmp.lt.u32.totalorder %s6564_s16, %s6559_s29 }
  0x19   : > { %p6568_p3 = scmp.lt.u32.totalorder %s6559_s29, %s6756_s24 }
  0x1a   : > { %p6562_p12 = pnand %p6561_p11, %p6560_p10  ;;  %p6567_p2 = por %p6566_p1, %p6565_p0 }
  0x1c   : > { %p6563_p13 = pneg %p6562_p12  ;;  %p6569_p4 = por %p6568_p3, %p6567_p2 }
  0x1e   : > { %p6570_p5 = pnand %p6569_p4, %p6563_p13 }
  0x20   : > { %6573 = shalt.err (!%p6570_p5)
}
  0x21   : > { %s6574_s19 = scalar_lea.vmem %s6758_s26, 4096  ;;  %s6625_s22 = smov [#allocation4]  }
  0x22   : > { %p6575_p6 = scmp.ne.s32.totalorder %s6758_s26, %s6574_s19  ;;  %s6579_s23 = sshll.u32 %s6625_s22, 4  ;;  %s6580_s23 = int_to_ptr.vmem [resolvable:$false] %s6579_s23 }
  0x23   : > { %s6581_s25 = scalar_lea.vmem %s6580_s23, 8192  ;;  %p6582_p9 = scmp.lt.s32.totalorder %s6758_s26, %s6580_s23 }
  0x24   : > { %p6577_p10 = pnand %p6575_p6, %p6561_p11  ;;  %p6583_p0 = scmp.lt.s32.totalorder %s6581_s25, %s6574_s19 }
  0x26   : > { %p6578_p12 = pneg %p6577_p10  ;;  %p6584_p1 = por %p6583_p0, %p6582_p9 }
  0x28   : > { %p6585_p2 = pnand %p6584_p1, %p6578_p12 }
  0x2a   : > { %6588 = shalt.err (!%p6585_p2)
}
  0x2b   : > { %s6626_s29 = smov 64   ;;  %s6627_s30 = smov 4  }
  0x2c   : > { %6054 = dma.hbm_to_vmem [thread:$0]  (!%p6760_p8), %s6756_s24, 4096, %s6758_s26, %s6765_s28, %s6626_s29, %s6626_s29, %s6627_s30  }
  0x2d   : > { %p303_p11 = scmp.lt.s32.totalorder %s6623_s12, 3  ;;  %p9261_p13 = scmp.ge.s32.totalorder %s6623_s12, 1 }
  0x2f   : > { %p304_p3 = pnand %p9261_p13, %p303_p11 }
  0x31   : > { %307 = sbr.rel (%p304_p3) target bundleno = 2697 (0xa89), region = 56 }
  0x38   : > { %s309_s15 = sand.u32 1, %s6615_s10  }
  0x39   : > { %s5858_s16 = sshll.u32 %s309_s15, 8  ;;  %s310_s20 = scalar_lea.sflag [#allocation5], %s309_s15 }
  0x3a   : > { %s6797_s21 = scalar_lea.vmem [#allocation4], %s5858_s16 }
  0x3b   : > { %6606 = dma.done.wait (%p6747_p7), %s310_s20, 4096  }
  0x3c   : > { %6608 = vsyncadd (%p6747_p7), %s310_s20, 4294963200  ;;  %v6804_v0 = vld [vmem:[%s6797_s21 + $0x8] sm:$0xf]  ;;  %v6807_v1 = vld [vmem:[%s6797_s21] sm:$0xf]  ;;  %s6628_s12 = smov 124  }
  0x3d   : > { %485 = vrot.lane.b32.xlu1 %v6804_v0, %s6628_s12  ;;  %481 = vrot.lane.b32.xlu0 %v6807_v1, %s6628_s12  ;;  %v6814_v2 = vld [vmem:[%s6797_s21 + $0xc] sm:$0xf]  ;;  %v6817_v3 = vld [vmem:[%s6797_s21 + $0x4] sm:$0xf]  ;;  %s9299_s1 = sld [smem:[#allocation64_spill]]  ;;  %vm943_vm0 = vcmask 1043456  }
  0x3e   : > { %v6824_v4 = vld [vmem:[%s6797_s21 + $0x14] sm:$0xf]  ;;  %v6827_v5 = vld [vmem:[%s6797_s21 + $0x10] sm:$0xf]  ;;  %v6834_v6 = vld [vmem:[%s6797_s21 + $0x1c] sm:$0xf] }
  0x3f   : > { %v6837_v7 = vld [vmem:[%s6797_s21 + $0x18] sm:$0xf]  ;;  %v6844_v8 = vld [vmem:[%s6797_s21 + $0x24] sm:$0xf]  ;;  %v6847_v9 = vld [vmem:[%s6797_s21 + $0x20] sm:$0xf] }
  0x40   : > { %v6854_v10 = vld [vmem:[%s6797_s21 + $0x2c] sm:$0xf]  ;;  %v6857_v11 = vld [vmem:[%s6797_s21 + $0x28] sm:$0xf]  ;;  %v6864_v12 = vld [vmem:[%s6797_s21 + $0x34] sm:$0xf] }
  0x41   : > { %487 = vrot.lane.b32.xlu1 %v6814_v2, %s6628_s12  ;;  %483 = vrot.lane.b32.xlu0 %v6817_v3, %s6628_s12  ;;  %v6867_v13 = vld [vmem:[%s6797_s21 + $0x30] sm:$0xf]  ;;  %v6874_v14 = vld [vmem:[%s6797_s21 + $0x3c] sm:$0xf]  ;;  %vm9231_vm1 = vmmov 0   ;;  %vm917_vm2 = vcmask 31744  }
  0x42   : > { %v6877_v15 = vld [vmem:[%s6797_s21 + $0x38] sm:$0xf]  ;;  %v6884_v16 = vld [vmem:[%s6797_s21 + $0x44] sm:$0xf]  ;;  %v6887_v17 = vld [vmem:[%s6797_s21 + $0x40] sm:$0xf] }
  0x43   : > { %v6894_v18 = vld [vmem:[%s6797_s21 + $0x4c] sm:$0xf]  ;;  %v6897_v19 = vld [vmem:[%s6797_s21 + $0x48] sm:$0xf]  ;;  %v6904_v20 = vld [vmem:[%s6797_s21 + $0x64] sm:$0xf] }
  0x44   : > { %v6907_v21 = vld [vmem:[%s6797_s21 + $0x60] sm:$0xf]  ;;  %v6914_v22 = vld [vmem:[%s6797_s21 + $0x6c] sm:$0xf]  ;;  %v6917_v23 = vld [vmem:[%s6797_s21 + $0x68] sm:$0xf] }
  0x45   : > { %491 = vrot.lane.b32.xlu1 %v6824_v4, %s6628_s12  ;;  %489 = vrot.lane.b32.xlu0 %v6827_v5, %s6628_s12  ;;  %v6924_v24 = vld [vmem:[%s6797_s21 + $0x54] sm:$0xf]  ;;  %v6927_v25 = vld [vmem:[%s6797_s21 + $0x50] sm:$0xf]  ;;  %vm785_vm3 = vcmask 62464   ;;  %vm812_vm4 = vcmask 57344  }
  0x46   : > { %9262 = vst [vmem:[#allocation7_spill] sm:$0xff] %v6924_v24  ;;  %9263 = vst [vmem:[#allocation8_spill] sm:$0xff] %v6927_v25  ;;  %v6934_v26 = vld [vmem:[%s6797_s21 + $0x5c] sm:$0xf]  ;;  %v6937_v27 = vld [vmem:[%s6797_s21 + $0x58] sm:$0xf] }
  0x47   : > { %9264 = vst [vmem:[#allocation9_spill] sm:$0xff] %v6934_v26  ;;  %9265 = vst [vmem:[#allocation10_spill] sm:$0xff] %v6937_v27  ;;  %v6944_v28 = vld [vmem:[%s6797_s21 + $0x74] sm:$0xf]  ;;  %v6947_v29 = vld [vmem:[%s6797_s21 + $0x70] sm:$0xf] }
  0x48   : > { %9266 = vst [vmem:[#allocation11_spill] sm:$0xff] %v6944_v28  ;;  %9267 = vst [vmem:[#allocation12_spill] sm:$0xff] %v6947_v29  ;;  %v6954_v30 = vld [vmem:[%s6797_s21 + $0x7c] sm:$0xf]  ;;  %v6957_v31 = vld [vmem:[%s6797_s21 + $0x78] sm:$0xf] }
  0x49   : > { %495 = vrot.lane.b32.xlu1 %v6834_v6, %s6628_s12  ;;  %493 = vrot.lane.b32.xlu0 %v6837_v7, %s6628_s12  ;;  %v6964_v32 = vld [vmem:[%s6797_s21 + $0x84] sm:$0xf]  ;;  %v6967_v33 = vld [vmem:[%s6797_s21 + $0x80] sm:$0xf]  ;;  %s6631_s26 = smov 4   ;;  %s9226_s27 = smov 8  }
  0x4a   : > { %9268 = vst [vmem:[#allocation13_spill] sm:$0xff] %v6964_v32  ;;  %9269 = vst [vmem:[#allocation14_spill] sm:$0xff] %v6967_v33  ;;  %v6974_v34 = vld [vmem:[%s6797_s21 + $0x8c] sm:$0xf]  ;;  %v6977_v35 = vld [vmem:[%s6797_s21 + $0x88] sm:$0xf] }
  0x4b   : > { %9270 = vst [vmem:[#allocation15_spill] sm:$0xff] %v6974_v34  ;;  %9271 = vst [vmem:[#allocation16_spill] sm:$0xff] %v6977_v35  ;;  %v6984_v36 = vld [vmem:[%s6797_s21 + $0xa4] sm:$0xf]  ;;  %v6987_v37 = vld [vmem:[%s6797_s21 + $0xa0] sm:$0xf] }
  0x4c   : > { %9272 = vst [vmem:[#allocation17_spill] sm:$0xff] %v6984_v36  ;;  %9273 = vst [vmem:[#allocation18_spill] sm:$0xff] %v6987_v37  ;;  %v6994_v38 = vld [vmem:[%s6797_s21 + $0xac] sm:$0xf]  ;;  %v6997_v39 = vld [vmem:[%s6797_s21 + $0xa8] sm:$0xf] }
  0x4d   : > { %499 = vrot.lane.b32.xlu1 %v6844_v8, %s6628_s12  ;;  %497 = vrot.lane.b32.xlu0 %v6847_v9, %s6628_s12  ;;  %9274 = vst [vmem:[#allocation19_spill] sm:$0xff] %v6997_v39  ;;  %v7004_v40 = vld [vmem:[%s6797_s21 + $0x94] sm:$0xf]  ;;  %v7007_v41 = vld [vmem:[%s6797_s21 + $0x90] sm:$0xf]  ;;  %s6633_s28 = smov 12  }
  0x4e   : > { %9275 = vst [vmem:[#allocation20_spill] sm:$0xff] %v7004_v40  ;;  %9276 = vst [vmem:[#allocation21_spill] sm:$0xff] %v7007_v41  ;;  %v7014_v42 = vld [vmem:[%s6797_s21 + $0x9c] sm:$0xf]  ;;  %v7017_v43 = vld [vmem:[%s6797_s21 + $0x98] sm:$0xf] }
  0x4f   : > { %9277 = vst [vmem:[#allocation22_spill] sm:$0xff] %v7014_v42  ;;  %9278 = vst [vmem:[#allocation23_spill] sm:$0xff] %v7017_v43  ;;  %v7024_v44 = vld [vmem:[%s6797_s21 + $0xb4] sm:$0xf]  ;;  %v7027_v45 = vld [vmem:[%s6797_s21 + $0xb0] sm:$0xf] }
  0x50   : > { %9279 = vst [vmem:[#allocation24_spill] sm:$0xff] %v7024_v44  ;;  %9280 = vst [vmem:[#allocation25_spill] sm:$0xff] %v7027_v45  ;;  %v7034_v46 = vld [vmem:[%s6797_s21 + $0xbc] sm:$0xf]  ;;  %v7037_v47 = vld [vmem:[%s6797_s21 + $0xb8] sm:$0xf] }
  0x51   : > { %503 = vrot.lane.b32.xlu1 %v6854_v10, %s6628_s12  ;;  %501 = vrot.lane.b32.xlu0 %v6857_v11, %s6628_s12  ;;  %9281 = vst [vmem:[#allocation26_spill] sm:$0xff] %v7034_v46  ;;  %9282 = vst [vmem:[#allocation27_spill] sm:$0xff] %v7037_v47  ;;  %v7044_v48 = vld [vmem:[%s6797_s21 + $0xc4] sm:$0xf]  ;;  %v7047_v49 = vld [vmem:[%s6797_s21 + $0xc0] sm:$0xf] }
  0x52   : > { %9283 = vst [vmem:[#allocation28_spill] sm:$0xff] %v7044_v48  ;;  %9284 = vst [vmem:[#allocation29_spill] sm:$0xff] %v7047_v49  ;;  %v7054_v50 = vld [vmem:[%s6797_s21 + $0xcc] sm:$0xf]  ;;  %v7057_v51 = vld [vmem:[%s6797_s21 + $0xc8] sm:$0xf] }
  0x53   : > { %9285 = vst [vmem:[#allocation30_spill] sm:$0xff] %v7054_v50  ;;  %9286 = vst [vmem:[#allocation31_spill] sm:$0xff] %v7057_v51  ;;  %v7064_v52 = vld [vmem:[%s6797_s21 + $0xe4] sm:$0xf]  ;;  %v7067_v53 = vld [vmem:[%s6797_s21 + $0xe0] sm:$0xf] }
  0x54   : > { %9287 = vst [vmem:[#allocation32_spill] sm:$0xff] %v7064_v52  ;;  %9288 = vst [vmem:[#allocation33_spill] sm:$0xff] %v7067_v53  ;;  %v7074_v54 = vld [vmem:[%s6797_s21 + $0xec] sm:$0xf]  ;;  %v7077_v55 = vld [vmem:[%s6797_s21 + $0xe8] sm:$0xf] }
  0x55   : > { %507 = vrot.lane.b32.xlu1 %v6864_v12, %s6628_s12  ;;  %505 = vrot.lane.b32.xlu0 %v6867_v13, %s6628_s12  ;;  %9289 = vst [vmem:[#allocation34_spill] sm:$0xff] %v7074_v54  ;;  %9290 = vst [vmem:[#allocation35_spill] sm:$0xff] %v7077_v55  ;;  %v7084_v56 = vld [vmem:[%s6797_s21 + $0xd4] sm:$0xf]  ;;  %v7087_v57 = vld [vmem:[%s6797_s21 + $0xd0] sm:$0xf] }
  0x56   : > { %9291 = vst [vmem:[#allocation36_spill] sm:$0xff] %v7084_v56  ;;  %9292 = vst [vmem:[#allocation37_spill] sm:$0xff] %v7087_v57  ;;  %v7094_v58 = vld [vmem:[%s6797_s21 + $0xdc] sm:$0xf]  ;;  %v7097_v59 = vld [vmem:[%s6797_s21 + $0xd8] sm:$0xf] }
  0x57   : > { %9293 = vst [vmem:[#allocation38_spill] sm:$0xff] %v7094_v58  ;;  %9294 = vst [vmem:[#allocation39_spill] sm:$0xff] %v7097_v59  ;;  %v7108_v62 = vld [vmem:[%s6797_s21 + $0xf4] sm:$0xf]  ;;  %v7111_v63 = vld [vmem:[%s6797_s21 + $0xf0] sm:$0xf] }
  0x58   : > { %9295 = vst [vmem:[#allocation40_spill] sm:$0xff] %v7108_v62  ;;  %9296 = vst [vmem:[#allocation41_spill] sm:$0xff] %v7111_v63  ;;  %s9239_s19 = smov 16   ;;  %s6635_s22 = smov 20   ;;  %vm1376_vm5 = vcmask 64544   ;;  %vm1449_vm6 = vcmask 97344  }
  0x59   : > { %511 = vrot.lane.b32.xlu1 %v6874_v14, %s6628_s12  ;;  %509 = vrot.lane.b32.xlu0 %v6877_v15, %s6628_s12  ;;  %s9237_s23 = smov 24   ;;  %s6637_s25 = smov 28   ;;  %vm1523_vm7 = vcmask 130144   ;;  %vm1596_vm8 = vcmask 162944   ;;  %vm1669_vm9 = vcmask 195744   ;;  %vm1743_vm10 = vcmask 228544  }
  0x5a   : > { %s9235_s29 = smov 32   ;;  %s9246_s30 = smov 72   ;;  %vm1816_vm11 = vcmask 261344   ;;  %vm1889_vm12 = vcmask 294144   ;;  %vm1239_vm13 = vcmask 27648   ;;  %vm1963_vm14 = vcmask 326944  }
  0x5b   : > { %s6640_s15 = smov 76   ;;  %s9224_s16 = smov 80   ;;  %vm9243_vm15 = vcmask 359744  }
  0x5c   : > { %s9222_s20 = smov 84   ;;  %s9216_s18 = smov 96  }
  0x5d   : > { %515 = vrot.lane.b32.xlu1 %v6884_v16, %s6628_s12  ;;  %513 = vrot.lane.b32.xlu0 %v6887_v17, %s6628_s12  ;;  %s9214_s24 = smov 100   ;;  %s9376_s2 = sld [smem:[#allocation65_spill]] }
  0x5e   : > { %s9377_s3 = sld [smem:[#allocation66_spill]]  ;;  %s9396_s0 = smov 56  }
  0x5f   : > { %p348_p7 = scmp.lt.s32.totalorder %s6730_s13, 1 }
  0x61   : > { %519 = vrot.lane.b32.xlu1 %v6894_v18, %s6628_s12  ;;  %517 = vrot.lane.b32.xlu0 %v6897_v19, %s6628_s12  ;;  %s9405_s13 = smov (!%p348_p7, %s6730_s13), 1 }
  0x65   : > { %531 = vrot.lane.b32.xlu1 %v6904_v20, %s6628_s12  ;;  %529 = vrot.lane.b32.xlu0 %v6907_v21, %s6628_s12 }
  0x69   : > { %535 = vrot.lane.b32.xlu1 %v6914_v22, %s6628_s12  ;;  %533 = vrot.lane.b32.xlu0 %v6917_v23, %s6628_s12 }
  0x6d   : > { %523 = vrot.lane.b32.xlu1 %v6924_v24, %s6628_s12  ;;  %521 = vrot.lane.b32.xlu0 %v6927_v25, %s6628_s12 }
  0x71   : > { %527 = vrot.lane.b32.xlu1 %v6934_v26, %s6628_s12  ;;  %525 = vrot.lane.b32.xlu0 %v6937_v27, %s6628_s12 }
  0x75   : > { %539 = vrot.lane.b32.xlu1 %v6944_v28, %s6628_s12  ;;  %537 = vrot.lane.b32.xlu0 %v6947_v29, %s6628_s12 }
  0x79   : > { %543 = vrot.lane.b32.xlu1 %v6954_v30, %s6628_s12  ;;  %541 = vrot.lane.b32.xlu0 %v6957_v31, %s6628_s12 }
  0x7d   : > { %547 = vrot.lane.b32.xlu1 %v6964_v32, %s6628_s12  ;;  %545 = vrot.lane.b32.xlu0 %v6967_v33, %s6628_s12 }
  0x81   : > { %551 = vrot.lane.b32.xlu1 %v6974_v34, %s6628_s12  ;;  %549 = vrot.lane.b32.xlu0 %v6977_v35, %s6628_s12 }
  0x85   : > { %563 = vrot.lane.b32.xlu1 %v6984_v36, %s6628_s12  ;;  %561 = vrot.lane.b32.xlu0 %v6987_v37, %s6628_s12 }
  0x89   : > { %567 = vrot.lane.b32.xlu1 %v6994_v38, %s6628_s12  ;;  %565 = vrot.lane.b32.xlu0 %v6997_v39, %s6628_s12 }
  0x8d   : > { %555 = vrot.lane.b32.xlu1 %v7004_v40, %s6628_s12  ;;  %553 = vrot.lane.b32.xlu0 %v7007_v41, %s6628_s12  ;;  %v7134_v41 = vld [vmem:[%s9299_s1] sm:$0xf]  ;;  %v9194_v40 = vmov 0.0   ;;  %s9398_s1 = smov 72  }
  0x8e   : > { %9300 = vst [vmem:[#allocation44_spill] sm:$0xff] %v7134_v41  ;;  %5920 = vmatprep.subr.mxu0 %v9194_v40  ;;  %5922 = vmatprep.mubr.msk.f32.mxu0 %vm9231_vm1, %v9194_v40 }
  0x8f   : > { %5921 = vmatpush3.msk.msra.mxu0 %vm943_vm0, %v7134_v41 }
  0x90   : > { %5925 = vmatprep.subr.mxu0 %v9194_v40 }
  0x91   : > { %559 = vrot.lane.b32.xlu1 %v7014_v42, %s6628_s12  ;;  %557 = vrot.lane.b32.xlu0 %v7017_v43, %s6628_s12 }
  0x95   : > { %571 = vrot.lane.b32.xlu1 %v7024_v44, %s6628_s12  ;;  %569 = vrot.lane.b32.xlu0 %v7027_v45, %s6628_s12 }
  0x99   : > { %575 = vrot.lane.b32.xlu1 %v7034_v46, %s6628_s12  ;;  %573 = vrot.lane.b32.xlu0 %v7037_v47, %s6628_s12 }
  0x9d   : > { %579 = vrot.lane.b32.xlu1 %v7044_v48, %s6628_s12  ;;  %577 = vrot.lane.b32.xlu0 %v7047_v49, %s6628_s12  ;;  %v7122_v49 = vld [vmem:[%s6797_s21 + $0xfc] sm:$0xf] }
  0x9e   : > { %9297 = vst [vmem:[#allocation42_spill] sm:$0xff] %v7122_v49 }
  0xa1   : > { %583 = vrot.lane.b32.xlu1 %v7054_v50, %s6628_s12  ;;  %581 = vrot.lane.b32.xlu0 %v7057_v51, %s6628_s12 }
  0xa5   : > { %595 = vrot.lane.b32.xlu1 %v7064_v52, %s6628_s12  ;;  %593 = vrot.lane.b32.xlu0 %v7067_v53, %s6628_s12 }
  0xa9   : > { %599 = vrot.lane.b32.xlu1 %v7074_v54, %s6628_s12  ;;  %597 = vrot.lane.b32.xlu0 %v7077_v55, %s6628_s12 }
  0xad   : > { %587 = vrot.lane.b32.xlu1 %v7084_v56, %s6628_s12  ;;  %585 = vrot.lane.b32.xlu0 %v7087_v57, %s6628_s12 }
  0xaf   : > { %v7099_v60 = vpop.permute.xlu1 %485  ;;  %v7101_v61 = vpop.permute.xlu0 %481 }
  0xb1   : > { %591 = vrot.lane.b32.xlu1 %v7094_v58, %s6628_s12  ;;  %589 = vrot.lane.b32.xlu0 %v7097_v59, %s6628_s12  ;;  %v7125_v58 = vld [vmem:[%s6797_s21 + $0xf8] sm:$0xf]  ;;  %s9220_s21 = smov 88  }
  0xb2   : > { %9298 = vst [vmem:[#allocation43_spill] sm:$0xff] %v7125_v58 }
  0xb3   : > { %v7113_v56 = vpop.permute.xlu1 %487  ;;  %v7115_v57 = vpop.permute.xlu0 %483 }
  0xb5   : > { %603 = vrot.lane.b32.xlu1 %v7108_v62, %s6628_s12  ;;  %601 = vrot.lane.b32.xlu0 %v7111_v63, %s6628_s12 }
  0xb7   : > { %v7127_v48 = vpop.permute.xlu1 %491  ;;  %v7129_v59 = vpop.permute.xlu0 %489 }
  0xb9   : > { %607 = vrot.lane.b32.xlu1 %v7122_v49, %s6628_s12  ;;  %605 = vrot.lane.b32.xlu0 %v7125_v58, %s6628_s12  ;;  %s9218_s12 = smov 92  }
  0xbb   : > { %v7145_v63 = vpop.permute.xlu1 %495  ;;  %v7147_v62 = vpop.permute.xlu0 %493 }
  0xbf   : > { %v7150_v53 = vpop.permute.xlu1 %499  ;;  %v7152_v52 = vpop.permute.xlu0 %497 }
  0xc3   : > { %v7154_v51 = vpop.permute.xlu1 %503  ;;  %v7156_v50 = vpop.permute.xlu0 %501 }
  0xc7   : > { %v7158_v49 = vpop.permute.xlu1 %507  ;;  %v7160_v58 = vpop.permute.xlu0 %505 }
  0xcb   : > { %v7162_v45 = vpop.permute.xlu1 %511  ;;  %v7164_v41 = vpop.permute.xlu0 %509 }
  0xcf   : > { %v7166_v44 = vpop.permute.xlu1 %515  ;;  %v7168_v43 = vpop.permute.xlu0 %513 }
  0xd3   : > { %v7170_v40 = vpop.permute.xlu1 %519  ;;  %v7172_v42 = vpop.permute.xlu0 %517 }
  0xd7   : > { %v7174_v55 = vpop.permute.xlu1 %531  ;;  %v7176_v54 = vpop.permute.xlu0 %529 }
  0xdb   : > { %v7178_v47 = vpop.permute.xlu1 %535  ;;  %v7180_v46 = vpop.permute.xlu0 %533 }
  0xdf   : > { %v7182_v33 = vpop.permute.xlu1 %523  ;;  %v7184_v32 = vpop.permute.xlu0 %521 }
  0xe0   : > { %9301 = vst [vmem:[#allocation45_spill] sm:$0xff] %v7182_v33  ;;  %9302 = vst [vmem:[#allocation46_spill] sm:$0xff] %v7184_v32 }
  0xe3   : > { %v7186_v37 = vpop.permute.xlu1 %527  ;;  %v7188_v25 = vpop.permute.xlu0 %525 }
  0xe4   : > { %9303 = vst [vmem:[#allocation47_spill] sm:$0xff] %v7186_v37  ;;  %9304 = vst [vmem:[#allocation48_spill] sm:$0xff] %v7188_v25 }
  0xe7   : > { %v7190_v36 = vpop.permute.xlu1 %539  ;;  %v7192_v24 = vpop.permute.xlu0 %537 }
  0xe8   : > { %9305 = vst [vmem:[#allocation49_spill] sm:$0xff] %v7190_v36  ;;  %9306 = vst [vmem:[#allocation50_spill] sm:$0xff] %v7192_v24 }
  0xeb   : > { %v7194_v35 = vpop.permute.xlu1 %543  ;;  %v7196_v34 = vpop.permute.xlu0 %541 }
  0xef   : > { %v7198_v29 = vpop.permute.xlu1 %547  ;;  %v7200_v28 = vpop.permute.xlu0 %545 }
  0xf0   : > { %9307 = vst [vmem:[#allocation51_spill] sm:$0xff] %v7198_v29  ;;  %9308 = vst [vmem:[#allocation52_spill] sm:$0xff] %v7200_v28 }
  0xf3   : > { %v7202_v27 = vpop.permute.xlu1 %551  ;;  %v7204_v33 = vpop.permute.xlu0 %549 }
  0xf4   : > { %9309 = vst [vmem:[#allocation53_spill] sm:$0xff] %v7202_v27  ;;  %9310 = vst [vmem:[#allocation54_spill] sm:$0xff] %v7204_v33 }
  0xf7   : > { %v7206_v32 = vpop.permute.xlu1 %563  ;;  %v7208_v26 = vpop.permute.xlu0 %561 }
  0xf8   : > { %9311 = vst [vmem:[#allocation55_spill] sm:$0xff] %v7206_v32  ;;  %9312 = vst [vmem:[#allocation56_spill] sm:$0xff] %v7208_v26  ;;  %v675_v26 = vmax.f32 %v6804_v0, %v7099_v60  ;;  %v683_v0 = vmax.f32 %v6857_v11, %v7156_v50  ;;  %v688_v11 = vmax.f32 %v6874_v14, %v7162_v45  ;;  %v9326_v60 = vld [vmem:[#allocation50_spill] sm:$0xff] }
  0xf9   : > { %v689_v50 = vmax.f32 %v6887_v17, %v7168_v43  ;;  %v9319_v43 = vld [vmem:[#allocation19_spill] sm:$0xff] }
  0xfb   : > { %v7210_v25 = vpop.permute.xlu1 %567  ;;  %v7212_v36 = vpop.permute.xlu0 %565 }
  0xff   : > { %v7214_v24 = vpop.permute.xlu1 %555  ;;  %v7216_v37 = vpop.permute.xlu0 %553 }
 0x100   : > { %9313 = vst [vmem:[#allocation57_spill] sm:$0xff] %v7214_v24  ;;  %9314 = vst [vmem:[#allocation58_spill] sm:$0xff] %v7216_v37  ;;  %v673_v24 = vmax.f32 %v6807_v1, %v7101_v61  ;;  %v676_v37 = vmax.f32 %v6814_v2, %v7113_v56  ;;  %v678_v1 = vmax.f32 %v6824_v4, %v7127_v48  ;;  %v9328_v61 = vld [vmem:[#allocation53_spill] sm:$0xff] }
 0x101   : > { %v677_v2 = vmax.f32 %v6827_v5, %v7129_v59  ;;  %v687_v4 = vmax.f32 %v6877_v15, %v7164_v41  ;;  %v739_v15 = vmax.f32 %v675_v26, %v683_v0  ;;  %v690_v41 = vmax.f32 %v6884_v16, %v7166_v44  ;;  %v9331_v0 = vld [vmem:[#allocation16_spill] sm:$0xff] }
 0x102   : > { %v715_v44 = vmax.f32 %v9319_v43, %v7212_v36  ;;  %v9329_v36 = vld [vmem:[#allocation15_spill] sm:$0xff] }
 0x103   : > { %v7218_v39 = vpop.permute.xlu1 %559  ;;  %v7220_v29 = vpop.permute.xlu0 %557 }
 0x104   : > { %9315 = vst [vmem:[#allocation59_spill] sm:$0xff] %v7218_v39  ;;  %9316 = vst [vmem:[#allocation60_spill] sm:$0xff] %v7220_v29  ;;  %v674_v29 = vmax.f32 %v6817_v3, %v7115_v57  ;;  %v684_v39 = vmax.f32 %v6854_v10, %v7154_v51  ;;  %v680_v3 = vmax.f32 %v6834_v6, %v7145_v63  ;;  %v9324_v57 = vld [vmem:[#allocation49_spill] sm:$0xff]  ;;  %v9330_v63 = vld [vmem:[#allocation54_spill] sm:$0xff] }
 0x105   : > { %v685_v10 = vmax.f32 %v6867_v13, %v7160_v58  ;;  %v698_v6 = vmax.f32 %v6904_v20, %v7174_v55  ;;  %v699_v13 = vmax.f32 %v6917_v23, %v7180_v46  ;;  %v692_v20 = vmax.f32 %v6894_v18, %v7170_v40  ;;  %v9325_v58 = vld [vmem:[#allocation11_spill] sm:$0xff] }
 0x106   : > { %v744_v51 = vmax.f32 %v680_v3, %v688_v11  ;;  %v704_v18 = vmax.f32 %v6954_v30, %v7194_v35  ;;  %v9320_v30 = vld [vmem:[#allocation47_spill] sm:$0xff]  ;;  %v9321_v35 = vld [vmem:[#allocation9_spill] sm:$0xff]  ;;  %v702_v59 = vmax.f32 %v9325_v58, %v9324_v57 }
 0x107   : > { %v7222_v28 = vpop.permute.xlu1 %571  ;;  %v7224_v27 = vpop.permute.xlu0 %569  ;;  %v746_v26 = vmax.f32 %v690_v41, %v698_v6  ;;  %v696_v55 = vmax.f32 %v9321_v35, %v9320_v30  ;;  %v9333_v3 = vld [vmem:[#allocation7_spill] sm:$0xff] }
 0x108   : > { %9317 = vst [vmem:[#allocation61_spill] sm:$0xff] %v7222_v28  ;;  %9318 = vst [vmem:[#allocation62_spill] sm:$0xff] %v7224_v27  ;;  %v682_v28 = vmax.f32 %v6844_v8, %v7150_v53  ;;  %v681_v27 = vmax.f32 %v6847_v9, %v7152_v52  ;;  %v679_v8 = vmax.f32 %v6837_v7, %v7147_v62  ;;  %v9334_v11 = vld [vmem:[#allocation55_spill] sm:$0xff] }
 0x109   : > { %v686_v9 = vmax.f32 %v6864_v12, %v7158_v49  ;;  %v697_v7 = vmax.f32 %v6907_v21, %v7176_v54  ;;  %v700_v12 = vmax.f32 %v6914_v22, %v7178_v47  ;;  %v740_v49 = vmax.f32 %v676_v37, %v684_v39  ;;  %v9345_v35 = vld [vmem:[#allocation27_spill] sm:$0xff] }
 0x10a   : > { %v738_v14 = vmax.f32 %v674_v29, %v682_v28  ;;  %v737_v45 = vmax.f32 %v673_v24, %v681_v27  ;;  %v691_v21 = vmax.f32 %v6897_v19, %v7172_v42  ;;  %v741_v47 = vmax.f32 %v677_v2, %v685_v10  ;;  %v9332_v2 = vld [vmem:[#allocation45_spill] sm:$0xff]  ;;  %v9347_v58 = vld [vmem:[#allocation35_spill] sm:$0xff] }
 0x10b   : > { %v7226_v33 = vpop.permute.xlu1 %575  ;;  %v7228_v32 = vpop.permute.xlu0 %573  ;;  %v742_v22 = vmax.f32 %v678_v1, %v686_v9  ;;  %v743_v23 = vmax.f32 %v679_v8, %v687_v4  ;;  %v745_v27 = vmax.f32 %v689_v50, %v697_v7  ;;  %v748_v16 = vmax.f32 %v692_v20, %v700_v12  ;;  %v9335_v4 = vld [vmem:[#allocation17_spill] sm:$0xff]  ;;  %v9336_v7 = vld [vmem:[#allocation46_spill] sm:$0xff]  ;;  %v9337_v12 = vld [vmem:[#allocation8_spill] sm:$0xff] }
 0x10c   : > { %v747_v29 = vmax.f32 %v691_v21, %v699_v13  ;;  %v7286_v37 = vmax.f32 %v737_v45, %v738_v14  ;;  %v7288_v17 = vmax.f32 %v739_v15, %v740_v49  ;;  %v703_v19 = vmax.f32 %v6957_v31, %v7196_v34  ;;  %v9322_v31 = vld [vmem:[#allocation48_spill] sm:$0xff]  ;;  %v9323_v34 = vld [vmem:[#allocation10_spill] sm:$0xff] }
 0x10d   : > { %v7294_v39 = vmax.f32 %v741_v47, %v742_v22  ;;  %v7296_v40 = vmax.f32 %v743_v23, %v744_v51  ;;  %v716_v42 = vmax.f32 %v6994_v38, %v7210_v25  ;;  %v7302_v53 = vmax.f32 %v745_v27, %v746_v26  ;;  %v9327_v25 = vld [vmem:[#allocation12_spill] sm:$0xff]  ;;  %v9339_v45 = vld [vmem:[#allocation18_spill] sm:$0xff]  ;;  %v9340_v47 = vld [vmem:[#allocation51_spill] sm:$0xff] }
 0x10e   : > { %v7304_v54 = vmax.f32 %v747_v29, %v748_v16  ;;  %v695_v56 = vmax.f32 %v9323_v34, %v9322_v31  ;;  %v701_v38 = vmax.f32 %v9327_v25, %v9326_v60  ;;  %v708_v62 = vmax.f32 %v9329_v36, %v9328_v61  ;;  %v9338_v14 = vld [vmem:[#allocation56_spill] sm:$0xff]  ;;  %v9341_v51 = vld [vmem:[#allocation13_spill] sm:$0xff]  ;;  %v9349_v61 = vld [vmem:[#allocation22_spill] sm:$0xff] }
 0x10f   : > { %v7262_v48 = vpop.permute.xlu1 %579  ;;  %v7264_v5 = vpop.permute.xlu0 %577  ;;  %v707_v1 = vmax.f32 %v9331_v0, %v9330_v63  ;;  %v694_v8 = vmax.f32 %v9333_v3, %v9332_v2  ;;  %v752_v9 = vmax.f32 %v696_v55, %v704_v18  ;;  %v714_v6 = vmax.f32 %v9335_v4, %v9334_v11  ;;  %v9342_v29 = vld [vmem:[#allocation52_spill] sm:$0xff]  ;;  %v9343_v18 = vld [vmem:[#allocation14_spill] sm:$0xff]  ;;  %v9351_v63 = vld [vmem:[#allocation23_spill] sm:$0xff] }
 0x110   : > { %v751_v10 = vmax.f32 %v695_v56, %v703_v19  ;;  %v693_v13 = vmax.f32 %v9337_v12, %v9336_v7  ;;  %v713_v49 = vmax.f32 %v9339_v45, %v9338_v14  ;;  %v756_v15 = vmax.f32 %v708_v62, %v716_v42  ;;  %v9346_v56 = vld [vmem:[#allocation34_spill] sm:$0xff]  ;;  %v9350_v62 = vld [vmem:[#allocation60_spill] sm:$0xff]  ;;  %v9357_v11 = vld [vmem:[#allocation31_spill] sm:$0xff] }
 0x111   : > { %v755_v41 = vmax.f32 %v707_v1, %v715_v44  ;;  %v901_v21 = vcombine.low %v7286_v37, %v7288_v17  ;;  %v902_v22 = vcombine.low %v7294_v39, %v7296_v40  ;;  %v706_v23 = vmax.f32 %v9341_v51, %v9340_v47  ;;  %v9344_v44 = vld [vmem:[#allocation26_spill] sm:$0xff]  ;;  %v9352_v1 = vld [vmem:[#allocation61_spill] sm:$0xff]  ;;  %v9361_v45 = vld [vmem:[#allocation20_spill] sm:$0xff] }
 0x112   : > { %v903_v26 = vcombine.low %v7302_v53, %v7304_v54  ;;  %v750_v27 = vmax.f32 %v694_v8, %v702_v59  ;;  %v749_v16 = vmax.f32 %v693_v13, %v701_v38  ;;  %v705_v19 = vmax.f32 %v9343_v18, %v9342_v29  ;;  %v9348_v38 = vld [vmem:[#allocation59_spill] sm:$0xff]  ;;  %v9354_v3 = vld [vmem:[#allocation62_spill] sm:$0xff]  ;;  %v9359_v12 = vld [vmem:[#allocation33_spill] sm:$0xff] }
 0x113   : > { %v7282_v28 = vpop.permute.xlu1 %583  ;;  %v7284_v24 = vpop.permute.xlu0 %581  ;;  %v7336_v42 = vmax.f32 %v751_v10, %v752_v9  ;;  %v754_v43 = vmax.f32 %v706_v23, %v714_v6  ;;  %v720_v30 = vmax.f32 %v9344_v44, %v7226_v33  ;;  %v719_v55 = vmax.f32 %v9345_v35, %v7228_v32  ;;  %v9353_v33 = vld [vmem:[#allocation24_spill] sm:$0xff]  ;;  %v9355_v32 = vld [vmem:[#allocation25_spill] sm:$0xff]  ;;  %v9356_v9 = vld [vmem:[#allocation30_spill] sm:$0xff] }
 0x114   : > { %v753_v31 = vmax.f32 %v705_v19, %v713_v49  ;;  %v7342_v34 = vmax.f32 %v755_v41, %v756_v15  ;;  %v712_v36 = vmax.f32 %v9349_v61, %v9348_v38  ;;  %v711_v0 = vmax.f32 %v9351_v63, %v9350_v62  ;;  %v9358_v6 = vld [vmem:[#allocation32_spill] sm:$0xff]  ;;  %v9360_v14 = vld [vmem:[#allocation57_spill] sm:$0xff]  ;;  %v9362_v15 = vld [vmem:[#allocation58_spill] sm:$0xff] }
 0x115   : > { %v718_v2 = vmax.f32 %v9353_v33, %v9352_v1  ;;  %v717_v8 = vmax.f32 %v9355_v32, %v9354_v3  ;;  %v724_v10 = vmax.f32 %v9356_v9, %v7282_v28  ;;  %v723_v4 = vmax.f32 %v9357_v11, %v7284_v24  ;;  %v9363_v41 = vld [vmem:[#allocation21_spill] sm:$0xff]  ;;  %v9364_v51 = vld [vmem:[#allocation28_spill] sm:$0xff] }
 0x116   : > { %v710_v49 = vmax.f32 %v9361_v45, %v9360_v14  ;;  %v759_v47 = vmax.f32 %v711_v0, %v719_v55  ;;  %v722_v23 = vmax.f32 %v9364_v51, %v7262_v48  ;;  %v9365_v28 = vld [vmem:[#allocation29_spill] sm:$0xff]  ;;  %v7369_v44 = vmax.f32 %v749_v16, %v750_v27  ;;  %v9366_v61 = vld [vmem:[#allocation40_spill] sm:$0xff]  ;;  %v9372_v45 = vld [vmem:[#allocation42_spill] sm:$0xff] }
 0x117   : > { %v596_v46 = vpop.permute.xlu1 %595  ;;  %v594_v52 = vpop.permute.xlu0 %593  ;;  %v721_v29 = vmax.f32 %v9365_v28, %v7264_v5  ;;  %v918_v38 = vsel %vm917_vm2, %v901_v21, 0.0  ;;  %v921_v48 = vsel %vm917_vm2, %v903_v26, 0.0  ;;  %v9367_v21 = vld [vmem:[#allocation41_spill] sm:$0xff]  ;;  %v9368_v33 = vld [vmem:[#allocation36_spill] sm:$0xff] }
 0x118   : > { %v730_v7 = vmax.f32 %v9358_v6, %v596_v46  ;;  %v729_v13 = vmax.f32 %v9359_v12, %v594_v52  ;;  %v919_v52 = vsel %vm917_vm2, %v902_v22, 0.0  ;;  %v758_v35 = vmax.f32 %v710_v49, %v718_v2  ;;  %v9369_v3 = vld [vmem:[#allocation37_spill] sm:$0xff] }
 0x119   : > { %v904_v5 = vcombine.low %v7369_v44, %v7336_v42 }
 0x11a   : > { %v761_v55 = vmax.f32 %v721_v29, %v729_v13 }
 0x11b   : > { %v600_v50 = vpop.permute.xlu1 %599  ;;  %v598_v20 = vpop.permute.xlu0 %597  ;;  %v923_v0 = vsel %vm917_vm2, %v904_v5, 0.0  ;;  %v9375_v5 = vmov 0.0  }
 0x11c   : > { %v732_v57 = vmax.f32 %v9346_v56, %v600_v50  ;;  %v731_v59 = vmax.f32 %v9347_v58, %v598_v20  ;;  %v709_v50 = vmax.f32 %v9363_v41, %v9362_v15  ;;  %v760_v20 = vmax.f32 %v712_v36, %v720_v30  ;;  %v9373_v15 = vld [vmem:[#allocation43_spill] sm:$0xff]  ;;  %786 = vst.msk [vmem:[#allocation2] sm:$0x3f] %vm785_vm3, %v9375_v5 }
 0x11d   : > { %v7371_v58 = vmax.f32 %v753_v31, %v754_v43  ;;  %v762_v30 = vmax.f32 %v722_v23, %v730_v7  ;;  %787 = vst.msk [vmem:[#allocation2 + $0x8] sm:$0x3f] %vm785_vm3, %v9375_v5  ;;  %788 = vst.msk [vmem:[#allocation2 + $0x10] sm:$0x3f] %vm785_vm3, %v9375_v5 }
 0x11e   : > { %v764_v18 = vmax.f32 %v724_v10, %v732_v57  ;;  %v763_v24 = vmax.f32 %v723_v4, %v731_v59  ;;  %v757_v56 = vmax.f32 %v709_v50, %v717_v8  ;;  %v7377_v57 = vmax.f32 %v759_v47, %v760_v20  ;;  %v9370_v10 = vld [vmem:[#allocation38_spill] sm:$0xff]  ;;  %v9371_v4 = vld [vmem:[#allocation39_spill] sm:$0xff]  ;;  %789 = vst.msk [vmem:[#allocation2 + $0x18] sm:$0x3f] %vm785_vm3, %v9375_v5 }
 0x11f   : > { %v588_v60 = vpop.permute.xlu1 %587  ;;  %v586_v25 = vpop.permute.xlu0 %585  ;;  %v920_v59 = vadd.f32 %v919_v52, %v918_v38  ;;  %v905_v22 = vcombine.low %v7371_v58, %v7342_v34  ;;  %v7387_v63 = vmax.f32 %v761_v55, %v762_v30  ;;  %790 = vst.msk [vmem:[#allocation2 + $0x20] sm:$0x3f] %vm785_vm3, %v9375_v5  ;;  %791 = vst.msk [vmem:[#allocation2 + $0x28] sm:$0x3f] %vm785_vm3, %v9375_v5 }
 0x120   : > { %v7381_v27 = vmax.f32 %v763_v24, %v764_v18  ;;  %v7383_v31 = vmax.f32 %v757_v56, %v758_v35  ;;  %v726_v2 = vmax.f32 %v9368_v33, %v588_v60  ;;  %v725_v32 = vmax.f32 %v9369_v3, %v586_v25  ;;  %793 = vst.msk [vmem:[#allocation2 + $0xf0] sm:$0x3f] %vm785_vm3, %v9375_v5 }
 0x121   : > { %v922_v26 = vadd.f32 %v921_v48, %v920_v59  ;;  %v925_v8 = vsel %vm917_vm2, %v905_v22, 0.0  ;;  %v9374_v48 = vld [vmem:[#allocation44_spill] sm:$0xff]  ;;  %794 = vst.msk [vmem:[#allocation2 + $0xf8] sm:$0x3f] %vm785_vm3, %v9375_v5  ;;  %795 = vst.msk [vmem:[#allocation2 + $0x100] sm:$0x3f] %vm785_vm3, %v9375_v5  ;;  %v1019_v59 = vlaneseq }
 0x122   : > { %v906_v1 = vcombine.low %v7383_v31, %v7377_v57  ;;  %v907_v9 = vcombine.low %v7387_v63, %v7381_v27  ;;  %796 = vst.msk [vmem:[#allocation2 + $0x108] sm:$0x3f] %vm785_vm3, %v9375_v5  ;;  %797 = vst.msk [vmem:[#allocation2 + $0x110] sm:$0x3f] %vm785_vm3, %v9375_v5 }
 0x123   : > { %v592_v19 = vpop.permute.xlu1 %591  ;;  %v590_v46 = vpop.permute.xlu0 %589  ;;  %v924_v60 = vadd.f32 %v923_v0, %v922_v26  ;;  %798 = vst.msk [vmem:[#allocation2 + $0x118] sm:$0x3f] %vm785_vm3, %v9375_v5  ;;  %800 = vst.msk [vmem:[#allocation2 + $0x30] sm:$0x3f] %vm785_vm3, %v9375_v5  ;;  %v1020_v22 = vshrl.u32 %v1019_v59, 7 }
 0x124   : > { %v728_v11 = vmax.f32 %v9370_v10, %v592_v19  ;;  %v727_v6 = vmax.f32 %v9371_v4, %v590_v46  ;;  %v927_v25 = vsel %vm917_vm2, %v906_v1, 0.0  ;;  %v929_v51 = vsel %vm917_vm2, %v907_v9, 0.0  ;;  %801 = vst.msk [vmem:[#allocation2 + $0x60] sm:$0x3f] %vm785_vm3, %v9375_v5  ;;  %802 = vst.msk [vmem:[#allocation2 + $0x90] sm:$0x3f] %vm785_vm3, %v9375_v5 }
 0x125   : > { %v926_v47 = vadd.f32 %v925_v8, %v924_v60  ;;  %803 = vst.msk [vmem:[#allocation2 + $0xc0] sm:$0x3f] %vm785_vm3, %v9375_v5  ;;  %807 = vst.msk [vmem:[#allocation2 + $0x58] sm:$0x3f] %vm785_vm3, %v9375_v5  ;;  %v6129_v0 = vld [vmem:[#allocation2 + $0x9] ss:$8 sps:$4 sm:$0xff]  }
 0x126   : > { %808 = vst.msk [vmem:[#allocation2 + $0x88] sm:$0x3f] %vm785_vm3, %v9375_v5  ;;  %809 = vst.msk [vmem:[#allocation2 + $0xb8] sm:$0x3f] %vm785_vm3, %v9375_v5  ;;  %v6131_v33 = vld [vmem:[#allocation2 + $0x19] ss:$8 sps:$4 sm:$0xff]  }
 0x127   : > { %v604_v16 = vpop.permute.xlu1 %603  ;;  %v602_v43 = vpop.permute.xlu0 %601  ;;  %v928_v29 = vadd.f32 %v927_v25, %v926_v47  ;;  %810 = vst.msk [vmem:[#allocation2 + $0xe8] sm:$0x3f] %vm785_vm3, %v9375_v5  ;;  %799 = vst.msk [vmem:[#allocation2] sm:$0x3f] %vm785_vm3, %v9375_v5 }
 0x128   : > { %v734_v36 = vmax.f32 %v9366_v61, %v604_v16  ;;  %v733_v62 = vmax.f32 %v9367_v21, %v602_v43  ;;  %820 = vst.msk [vmem:[#allocation2 + $0x38] sm:$0x1] %vm812_vm4, %v9375_v5  ;;  %821 = vst.msk [vmem:[#allocation2 + $0x40] sm:$0x1] %vm812_vm4, %v9375_v5  ;;  %v6124_v43 = vld [vmem:[#allocation2 + $0x11] ss:$8 sps:$4 sm:$0xff]  }
 0x129   : > { %v930_v24 = vadd.f32 %v929_v51, %v928_v29  ;;  %822 = vst.msk [vmem:[#allocation2 + $0x48] sm:$0x1] %vm812_vm4, %v9375_v5  ;;  %823 = vst.msk [vmem:[#allocation2 + $0x50] sm:$0x1] %vm812_vm4, %v9375_v5  ;;  %1354 = vrot.lane.b32.xlu1 %v6124_v43, %s6631_s26  ;;  %v7609_v21 = vsub.s32 0, %v1020_v22 }
 0x12a   : > { %v766_v13 = vmax.f32 %v726_v2, %v734_v36  ;;  %v765_v14 = vmax.f32 %v725_v32, %v733_v62  ;;  %826 = vst.msk [vmem:[#allocation2 + $0x68] sm:$0x1] %vm812_vm4, %v9375_v5  ;;  %827 = vst.msk [vmem:[#allocation2 + $0x70] sm:$0x1] %vm812_vm4, %v9375_v5  ;;  %v6134_v32 = vld [vmem:[#allocation2 + $0x11] ss:$8 sps:$4 sm:$0xff]  }
 0x12b   : > { %v608_v7 = vpop.permute.xlu1 %607  ;;  %v606_v12 = vpop.permute.xlu0 %605  ;;  %828 = vst.msk [vmem:[#allocation2 + $0x78] sm:$0x1] %vm812_vm4, %v9375_v5  ;;  %829 = vst.msk [vmem:[#allocation2 + $0x80] sm:$0x1] %vm812_vm4, %v9375_v5 }
 0x12c   : > { %v736_v49 = vmax.f32 %v9372_v45, %v608_v7  ;;  %v735_v41 = vmax.f32 %v9373_v15, %v606_v12  ;;  %v7403_v23 = vmax.f32 %v765_v14, %v766_v13  ;;  %832 = vst.msk [vmem:[#allocation2 + $0x98] sm:$0x1] %vm812_vm4, %v9375_v5  ;;  %833 = vst.msk [vmem:[#allocation2 + $0xa0] sm:$0x1] %vm812_vm4, %v9375_v5 }
 0x12d   : > { %834 = vst.msk [vmem:[#allocation2 + $0xa8] sm:$0x1] %vm812_vm4, %v9375_v5  ;;  %835 = vst.msk [vmem:[#allocation2 + $0xb0] sm:$0x1] %vm812_vm4, %v9375_v5 }
 0x12e   : > { %v768_v50 = vmax.f32 %v728_v11, %v736_v49  ;;  %v767_v20 = vmax.f32 %v727_v6, %v735_v41  ;;  %838 = vst.msk [vmem:[#allocation2 + $0xc8] sm:$0x1] %vm812_vm4, %v9375_v5  ;;  %839 = vst.msk [vmem:[#allocation2 + $0xd0] sm:$0x1] %vm812_vm4, %v9375_v5  ;;  %v6123_v16 = vld [vmem:[#allocation2 + $0x1] ss:$8 sps:$4 sm:$0xff]  }
 0x12f   : > { %840 = vst.msk [vmem:[#allocation2 + $0xd8] sm:$0x1] %vm812_vm4, %v9375_v5  ;;  %841 = vst.msk [vmem:[#allocation2 + $0xe0] sm:$0x1] %vm812_vm4, %v9375_v5  ;;  %1352 = vrot.lane.b32.xlu0 %v6123_v16, %s6631_s26 }
 0x130   : > { %v7405_v28 = vmax.f32 %v767_v20, %v768_v50  ;;  %856 = vst.msk [vmem:[#allocation2 + $0x3d] sm:$0x1] %vm812_vm4, %v9375_v5  ;;  %857 = vst.msk [vmem:[#allocation2 + $0x45] sm:$0x1] %vm812_vm4, %v9375_v5 }
 0x131   : > { %858 = vst.msk [vmem:[#allocation2 + $0x4d] sm:$0x1] %vm812_vm4, %v9375_v5  ;;  %859 = vst.msk [vmem:[#allocation2 + $0x55] sm:$0x1] %vm812_vm4, %v9375_v5 }
 0x132   : > { %v908_v18 = vcombine.low %v7403_v23, %v7405_v28  ;;  %862 = vst.msk [vmem:[#allocation2 + $0x6d] sm:$0x1] %vm812_vm4, %v9375_v5  ;;  %863 = vst.msk [vmem:[#allocation2 + $0x75] sm:$0x1] %vm812_vm4, %v9375_v5 }
 0x133   : > { %864 = vst.msk [vmem:[#allocation2 + $0x7d] sm:$0x1] %vm812_vm4, %v9375_v5  ;;  %865 = vst.msk [vmem:[#allocation2 + $0x85] sm:$0x1] %vm812_vm4, %v9375_v5 }
 0x134   : > { %v931_v19 = vsel %vm917_vm2, %v908_v18, 0.0  ;;  %868 = vst.msk [vmem:[#allocation2 + $0x9d] sm:$0x1] %vm812_vm4, %v9375_v5  ;;  %869 = vst.msk [vmem:[#allocation2 + $0xa5] sm:$0x1] %vm812_vm4, %v9375_v5 }
 0x135   : > { %v932_v46 = vadd.f32 %v931_v19, %v930_v24  ;;  %870 = vst.msk [vmem:[#allocation2 + $0xad] sm:$0x1] %vm812_vm4, %v9375_v5  ;;  %871 = vst.msk [vmem:[#allocation2 + $0xb5] sm:$0x1] %vm812_vm4, %v9375_v5 }
 0x136   : > { %874 = vst.msk [vmem:[#allocation2 + $0xcd] sm:$0x1] %vm812_vm4, %v9375_v5  ;;  %875 = vst.msk [vmem:[#allocation2 + $0xd5] sm:$0x1] %vm812_vm4, %v9375_v5 }
 0x137   : > { %v933_v52 = vrot.slane %v932_v46, 4  ;;  %876 = vst.msk [vmem:[#allocation2 + $0xdd] sm:$0x1] %vm812_vm4, %v9375_v5  ;;  %877 = vst.msk [vmem:[#allocation2 + $0xe5] sm:$0x1] %vm812_vm4, %v9375_v5 }
 0x138   : > { %804 = vst.msk [vmem:[#allocation2 + $0xf0] sm:$0x3f] %vm785_vm3, %v9375_v5  ;;  %806 = vst.msk [vmem:[#allocation2 + $0x28] sm:$0x3f] %vm785_vm3, %v9375_v5 }
 0x139   : > { %v934_v35 = vadd.f32 %v933_v52, %v932_v46  ;;  %811 = vst.msk [vmem:[#allocation2 + $0x118] sm:$0x3f] %vm785_vm3, %v9375_v5  ;;  %vm2182_vm3 = vcmask 425344  }
 0x13a   : > { %850 = vst.msk [vmem:[#allocation2 + $0xd] sm:$0x1] %vm812_vm4, %v9375_v5  ;;  %814 = vst.msk [vmem:[#allocation2 + $0x8] sm:$0x1] %vm812_vm4, %v9375_v5 }
 0x13b   : > { %v935_v56 = vrot.slane %v934_v35, 2  ;;  %815 = vst.msk [vmem:[#allocation2 + $0x10] sm:$0x1] %vm812_vm4, %v9375_v5  ;;  %816 = vst.msk [vmem:[#allocation2 + $0x18] sm:$0x1] %vm812_vm4, %v9375_v5 }
 0x13c   : > { %817 = vst.msk [vmem:[#allocation2 + $0x20] sm:$0x1] %vm812_vm4, %v9375_v5  ;;  %819 = vst.msk [vmem:[#allocation2 + $0x30] sm:$0x1] %vm812_vm4, %v9375_v5 }
 0x13d   : > { %v936_v30 = vadd.f32 %v935_v56, %v934_v35  ;;  %824 = vst.msk [vmem:[#allocation2 + $0x58] sm:$0x1] %vm812_vm4, %v9375_v5  ;;  %825 = vst.msk [vmem:[#allocation2 + $0x60] sm:$0x1] %vm812_vm4, %v9375_v5 }
 0x13e   : > { %830 = vst.msk [vmem:[#allocation2 + $0x88] sm:$0x1] %vm812_vm4, %v9375_v5  ;;  %831 = vst.msk [vmem:[#allocation2 + $0x90] sm:$0x1] %vm812_vm4, %v9375_v5 }
 0x13f   : > { %v937_v55 = vrot.slane %v936_v30, 1  ;;  %836 = vst.msk [vmem:[#allocation2 + $0xb8] sm:$0x1] %vm812_vm4, %v9375_v5  ;;  %837 = vst.msk [vmem:[#allocation2 + $0xc0] sm:$0x1] %vm812_vm4, %v9375_v5 }
 0x140   : > { %842 = vst.msk [vmem:[#allocation2 + $0xe8] sm:$0x1] %vm812_vm4, %v9375_v5  ;;  %844 = vst.msk [vmem:[#allocation2 + $0xf8] sm:$0x1] %vm812_vm4, %v9375_v5  ;;  %v6137_v10 = vld [vmem:[#allocation2 + $0x21] ss:$8 sps:$4 sm:$0xff]  }
 0x141   : > { %v938_v38 = vadd.f32 %v937_v55, %v936_v30  ;;  %845 = vst.msk [vmem:[#allocation2 + $0x100] sm:$0x1] %vm812_vm4, %v9375_v5  ;;  %846 = vst.msk [vmem:[#allocation2 + $0x108] sm:$0x1] %vm812_vm4, %v9375_v5 }
 0x142   : > { %847 = vst.msk [vmem:[#allocation2 + $0x110] sm:$0x1] %vm812_vm4, %v9375_v5  ;;  %851 = vst.msk [vmem:[#allocation2 + $0x15] sm:$0x1] %vm812_vm4, %v9375_v5  ;;  %v6127_v62 = vld [vmem:[#allocation2 + $0x8] ss:$8 sps:$4 sm:$0xff]  }
 0x143   : > { %5923 = vmatmul.mubr.msk.f32.vlgmr.msra.gmra.mrb[0].mxu0 %vm917_vm2, %v938_v38  ;;  %852 = vst.msk [vmem:[#allocation2 + $0x1d] sm:$0x1] %vm812_vm4, %v9375_v5  ;;  %853 = vst.msk [vmem:[#allocation2 + $0x25] sm:$0x1] %vm812_vm4, %v9375_v5  ;;  %v6128_v26 = vld [vmem:[#allocation2 + $0x18] ss:$8 sps:$4 sm:$0xff]  }
 0x144   : > { %5926 = vmatpush3.msk.msra.mxu0 %vm943_vm0, %v9374_v48  ;;  %5927 = vmatprep.mubr.msk.f32.mxu0 %vm9231_vm1, %v9375_v5  ;;  %855 = vst.msk [vmem:[#allocation2 + $0x35] sm:$0x1] %vm812_vm4, %v9375_v5  ;;  %860 = vst.msk [vmem:[#allocation2 + $0x5d] sm:$0x1] %vm812_vm4, %v9375_v5  ;;  %v6132_v2 = vld [vmem:[#allocation2 + $0x10] ss:$8 sps:$4 sm:$0xff]  }
 0x145   : > { %861 = vst.msk [vmem:[#allocation2 + $0x65] sm:$0x1] %vm812_vm4, %v9375_v5  ;;  %866 = vst.msk [vmem:[#allocation2 + $0x8d] sm:$0x1] %vm812_vm4, %v9375_v5  ;;  %vm2548_vm1 = vcmask 589344  }
 0x146   : > { %867 = vst.msk [vmem:[#allocation2 + $0x95] sm:$0x1] %vm812_vm4, %v9375_v5  ;;  %872 = vst.msk [vmem:[#allocation2 + $0xbd] sm:$0x1] %vm812_vm4, %v9375_v5 }
 0x147   : > { %873 = vst.msk [vmem:[#allocation2 + $0xc5] sm:$0x1] %vm812_vm4, %v9375_v5  ;;  %878 = vst.msk [vmem:[#allocation2 + $0xed] sm:$0x1] %vm812_vm4, %v9375_v5 }
 0x148   : > { %880 = vst.msk [vmem:[#allocation2 + $0xfd] sm:$0x1] %vm812_vm4, %v9375_v5  ;;  %881 = vst.msk [vmem:[#allocation2 + $0x105] sm:$0x1] %vm812_vm4, %v9375_v5 }
 0x149   : > { %882 = vst.msk [vmem:[#allocation2 + $0x10d] sm:$0x1] %vm812_vm4, %v9375_v5  ;;  %883 = vst.msk [vmem:[#allocation2 + $0x115] sm:$0x1] %vm812_vm4, %v9375_v5  ;;  %v6130_v1 = vld [vmem:[#allocation2 + $0xa] ss:$8 sps:$4 sm:$0xff]  }
 0x14a   : > { %849 = vst.msk [vmem:[#allocation2 + $0x5] sm:$0x1] %vm812_vm4, %v9375_v5  ;;  %813 = vst.msk [vmem:[#allocation2] sm:$0x1] %vm812_vm4, %v9375_v5  ;;  %v6126_v36 = vld [vmem:[#allocation2 + $0x12] ss:$8 sps:$4 sm:$0xff]  }
 0x14b   : > { %818 = vst.msk [vmem:[#allocation2 + $0x28] sm:$0x1] %vm812_vm4, %v9375_v5  ;;  %843 = vst.msk [vmem:[#allocation2 + $0xf0] sm:$0x1] %vm812_vm4, %v9375_v5  ;;  %1427 = vrot.lane.b32.xlu1 %v6126_v36, %s9226_s27  ;;  %v6133_v3 = vld [vmem:[#allocation2 + $0x1a] ss:$8 sps:$4 sm:$0xff]  }
 0x14c   : > { %848 = vst.msk [vmem:[#allocation2 + $0x118] sm:$0x1] %vm812_vm4, %v9375_v5  ;;  %854 = vst.msk [vmem:[#allocation2 + $0x2d] sm:$0x1] %vm812_vm4, %v9375_v5  ;;  %v6136_v9 = vld [vmem:[#allocation2 + $0x12] ss:$8 sps:$4 sm:$0xff]  }
 0x14d   : > { %879 = vst.msk [vmem:[#allocation2 + $0xf5] sm:$0x1] %vm812_vm4, %v9375_v5  ;;  %884 = vst.msk [vmem:[#allocation2 + $0x11d] sm:$0x1] %vm812_vm4, %v9375_v5  ;;  %vm2255_vm4 = vcmask 458144  }
 0x14f   : > { %1501 = vrot.lane.b32.xlu1 %v6128_v26, %s6633_s28 }
 0x151   : > { %v6125_v61 = vld [vmem:[#allocation2 + $0x2] ss:$8 sps:$4 sm:$0xff]  }
 0x152   : > { %1425 = vrot.lane.b32.xlu0 %v6125_v61, %s9226_s27  ;;  %v6135_v8 = vld [vmem:[#allocation2 + $0x20] ss:$8 sps:$4 sm:$0xff]  }
 0x153   : > { %1645 = vrot.lane.b32.xlu1 %v6130_v1, %s6635_s22 }
 0x156   : > { %1499 = vrot.lane.b32.xlu0 %v6127_v62, %s6633_s28 }
 0x157   : > { %1719 = vrot.lane.b32.xlu1 %v6132_v2, %s9237_s23 }
 0x15a   : > { %1572 = vrot.lane.b32.xlu0 %v6129_v0, %s9239_s19 }
 0x15b   : > { %1792 = vrot.lane.b32.xlu1 %v6134_v32, %s6637_s25 }
 0x15e   : > { %1574 = vrot.lane.b32.xlu0 %v6131_v33, %s9239_s19 }
 0x15f   : > { %1865 = vrot.lane.b32.xlu1 %v6136_v9, %s9235_s29 }
 0x162   : > { %1647 = vrot.lane.b32.xlu0 %v6133_v3, %s6635_s22 }
 0x166   : > { %1721 = vrot.lane.b32.xlu0 %v6135_v8, %s9237_s23 }
 0x16a   : > { %1794 = vrot.lane.b32.xlu0 %v6137_v10, %s6637_s25 }
 0x216   : > { %v1013_v11 = vpop.f32.mrb[0].mxu0 }
 0x217   : > { %v1018_v4 = vmul.f32 0.00390625, %v1013_v11  ;;  %v5924_v6 = vpop.f32.mrb[1].mxu0 }
 0x219   : > { %v1022_v7 = vrot.slane %v1018_v4, %v7609_v21 }
 0x21b   : > { %v1024_v12 = vcombine.high %v1022_v7, %v1022_v7  ;;  %v7626_v13 = vsub.f32 %v7286_v37, %v1022_v7  ;;  %v7629_v14 = vsub.f32 %v7294_v39, %v1022_v7  ;;  %v7632_v45 = vsub.f32 %v7302_v53, %v1022_v7 }
 0x21c   : > { %v7647_v37 = vsub.f32 %v7369_v44, %v1022_v7  ;;  %v7683_v24 = vsub.f32 %v7387_v63, %v1022_v7  ;;  %v7695_v56 = vsub.f32 %v7403_v23, %v1022_v7 }
 0x21d   : > { %v7635_v49 = vsub.f32 %v7288_v17, %v1024_v12  ;;  %v7638_v15 = vsub.f32 %v7296_v40, %v1024_v12  ;;  %v7641_v41 = vsub.f32 %v7304_v54, %v1024_v12  ;;  %v7644_v60 = vsub.f32 %v7336_v42, %v1024_v12 }
 0x21e   : > { %v7650_v39 = vsub.f32 %v7342_v34, %v1024_v12  ;;  %v7655_v17 = vsub.f32 %v7371_v58, %v1022_v7  ;;  %v7658_v40 = vsub.f32 %v7377_v57, %v1024_v12  ;;  %v1042_v44 = vmul.f32 %v7626_v13, %v7626_v13 }
 0x21f   : > { %v1043_v53 = vmul.f32 %v7635_v49, %v7635_v49  ;;  %v1045_v54 = vmul.f32 %v7638_v15, %v7638_v15  ;;  %v1047_v42 = vmul.f32 %v7641_v41, %v7641_v41  ;;  %v1044_v34 = vmul.f32 %v7629_v14, %v7629_v14 }
 0x220   : > { %v1046_v25 = vmul.f32 %v7632_v45, %v7632_v45  ;;  %v1049_v58 = vmul.f32 %v7644_v60, %v7644_v60  ;;  %v7673_v57 = vsub.f32 %v7383_v31, %v1022_v7  ;;  %v7676_v50 = vsub.f32 %v7381_v27, %v1024_v12 }
 0x221   : > { %v1048_v20 = vmul.f32 %v7647_v37, %v7647_v37  ;;  %v1051_v47 = vmul.f32 %v7650_v39, %v7650_v39  ;;  %v1074_v51 = vcombine.low %v1042_v44, %v1043_v53  ;;  %v1075_v29 = vcombine.low %v1044_v34, %v1045_v54  ;;  %v6139_v53 = vld [vmem:[#allocation2 + $0xf0] ss:$8 sps:$4 sm:$0xff]   ;;  %v6140_v54 = vld [vmem:[#allocation2 + $0x100] ss:$8 sps:$4 sm:$0xff]  }
 0x222   : > { %v1076_v18 = vcombine.low %v1046_v25, %v1047_v42  ;;  %v7686_v19 = vsub.f32 %v7405_v28, %v1024_v12  ;;  %v1050_v31 = vmul.f32 %v7655_v17, %v7655_v17  ;;  %v1053_v27 = vmul.f32 %v7658_v40, %v7658_v40  ;;  %v6138_v12 = vld [vmem:[#allocation2 + $0x22] ss:$8 sps:$4 sm:$0xff]   ;;  %2610 = vrot.lane.b32.xlu0 %v6139_v53, %s9246_s30  ;;  %v6141_v42 = vld [vmem:[#allocation2 + $0xf1] ss:$8 sps:$4 sm:$0xff]  }
 0x223   : > { %v1077_v46 = vcombine.low %v1048_v20, %v1049_v58  ;;  %v1090_v52 = vsel %vm917_vm2, %v1074_v51, 0.0  ;;  %v1091_v35 = vsel %vm917_vm2, %v1075_v29, 0.0  ;;  %v1052_v63 = vmul.f32 %v7673_v57, %v7673_v57  ;;  %1867 = vrot.lane.b32.xlu1 %v6138_v12, %s9235_s29  ;;  %v6142_v44 = vld [vmem:[#allocation2 + $0xf2] ss:$8 sps:$4 sm:$0xff]   ;;  %v6143_v34 = vld [vmem:[#allocation2 + $0x101] ss:$8 sps:$4 sm:$0xff]  }
 0x224   : > { %v1092_v30 = vadd.f32 %v1091_v35, %v1090_v52  ;;  %v1055_v28 = vmul.f32 %v7676_v50, %v7676_v50  ;;  %v1078_v55 = vcombine.low %v1050_v31, %v1051_v47  ;;  %v1093_v38 = vsel %vm917_vm2, %v1076_v18, 0.0  ;;  %v6144_v25 = vld [vmem:[#allocation2 + $0xf8] ss:$8 sps:$4 sm:$0xff]   ;;  %v6147_v47 = vld [vmem:[#allocation2 + $0x108] ss:$8 sps:$4 sm:$0xff]   ;;  %v1353_v35 = vpop.permute.xlu0 %1352 }
 0x225   : > { %v1054_v59 = vmul.f32 %v7683_v24, %v7683_v24  ;;  %v1057_v22 = vmul.f32 %v7686_v19, %v7686_v19  ;;  %v1079_v16 = vcombine.low %v1052_v63, %v1053_v27  ;;  %v1095_v23 = vsel %vm917_vm2, %v1077_v46, 0.0  ;;  %v6145_v58 = vld [vmem:[#allocation2 + $0x102] ss:$8 sps:$4 sm:$0xff]   ;;  %v6152_v27 = vld [vmem:[#allocation2 + $0x110] ss:$8 sps:$4 sm:$0xff]   ;;  %v1355_v63 = vpop.permute.xlu1 %1354 }
 0x226   : > { %v1094_v48 = vadd.f32 %v1093_v38, %v1092_v30  ;;  %v1056_v61 = vmul.f32 %v7695_v56, %v7695_v56  ;;  %v1097_v62 = vsel %vm917_vm2, %v1078_v55, 0.0  ;;  %2683 = vrot.lane.b32.xlu0 %v6141_v42, %s6640_s15  ;;  %v6146_v20 = vld [vmem:[#allocation2 + $0xf9] ss:$8 sps:$4 sm:$0xff]   ;;  %v6149_v29 = vld [vmem:[#allocation2 + $0x109] ss:$8 sps:$4 sm:$0xff]  }
 0x227   : > { %v1080_v36 = vcombine.low %v1054_v59, %v1055_v28  ;;  %v1099_v1 = vsel %vm917_vm2, %v1079_v16, 0.0  ;;  %2612 = vrot.lane.b32.xlu1 %v6140_v54, %s9246_s30  ;;  %v6148_v51 = vld [vmem:[#allocation2 + $0xfa] ss:$8 sps:$4 sm:$0xff]   ;;  %v6150_v18 = vld [vmem:[#allocation2 + $0x10a] ss:$8 sps:$4 sm:$0xff]  }
 0x228   : > { %v1096_v43 = vadd.f32 %v1095_v23, %v1094_v48  ;;  %v1081_v0 = vcombine.low %v1056_v61, %v1057_v22  ;;  %v6151_v31 = vld [vmem:[#allocation2 + $0x100] ss:$8 sps:$4 sm:$0xff]   ;;  %v6183_v30 = vld [vmem:[#allocation2 + $0x10] ss:$8 sps:$4 sm:$0xff]   ;;  %v1426_v28 = vpop.permute.xlu0 %1425 }
 0x229   : > { %v1101_v2 = vsel %vm917_vm2, %v1080_v36, 0.0  ;;  %v6153_v46 = vld [vmem:[#allocation2 + $0x101] ss:$8 sps:$4 sm:$0xff]   ;;  %1305 = vst.msk [vmem:[#allocation3 + $0x10] sm:$0xff] %vm917_vm2, %v6183_v30  ;;  %v1428_v55 = vpop.permute.xlu1 %1427 }
 0x22a   : > { %v1098_v26 = vadd.f32 %v1097_v62, %v1096_v43  ;;  %v1103_v32 = vsel %vm917_vm2, %v1081_v0, 0.0  ;;  %2685 = vrot.lane.b32.xlu0 %v6143_v34, %s6640_s15  ;;  %v6180_v52 = vld [vmem:[#allocation2] ss:$8 sps:$4 sm:$0xff]   ;;  %1378 = vst.msk [vmem:[#allocation3 + $0x10] sm:$0xff] %vm1376_vm5, %v1355_v63 }
 0x22b   : > { %2756 = vrot.lane.b32.xlu1 %v6142_v44, %s9224_s16  ;;  %1304 = vst.msk [vmem:[#allocation3] sm:$0xff] %vm917_vm2, %v6180_v52 }
 0x22c   : > { %v1100_v33 = vadd.f32 %v1099_v1, %v1098_v26  ;;  %1377 = vst.msk [vmem:[#allocation3] sm:$0xff] %vm1376_vm5, %v1353_v35  ;;  %v1500_v38 = vpop.permute.xlu0 %1499 }
 0x22d   : > { %1450 = vst.msk [vmem:[#allocation3] sm:$0xff] %vm1449_vm6, %v1426_v28  ;;  %1451 = vst.msk [vmem:[#allocation3 + $0x10] sm:$0xff] %vm1449_vm6, %v1428_v55  ;;  %v1502_v48 = vpop.permute.xlu1 %1501 }
 0x22e   : > { %v1102_v3 = vadd.f32 %v1101_v2, %v1100_v33  ;;  %2758 = vrot.lane.b32.xlu0 %v6145_v58, %s9224_s16  ;;  %1524 = vst.msk [vmem:[#allocation3] sm:$0xff] %vm1523_vm7, %v1500_v38  ;;  %1525 = vst.msk [vmem:[#allocation3 + $0x10] sm:$0xff] %vm1523_vm7, %v1502_v48 }
 0x22f   : > { %2830 = vrot.lane.b32.xlu1 %v6144_v25, %s9222_s20 }
 0x230   : > { %v1104_v8 = vadd.f32 %v1103_v32, %v1102_v3  ;;  %v1573_v59 = vpop.permute.xlu0 %1572  ;;  %v1185_v32 = vld [vmem:[%s9376_s2] sm:$0x1] }
 0x231   : > { %1597 = vst.msk [vmem:[#allocation3] sm:$0xff] %vm1596_vm8, %v1573_v59  ;;  %v1646_v22 = vpop.permute.xlu1 %1645 }
 0x232   : > { %v1105_v9 = vrot.slane %v1104_v8, 4  ;;  %2832 = vrot.lane.b32.xlu0 %v6147_v47, %s9222_s20  ;;  %1670 = vst.msk [vmem:[#allocation3] sm:$0xff] %vm1669_vm9, %v1646_v22  ;;  %s6651_s20 = smov 52  }
 0x233   : > { %2903 = vrot.lane.b32.xlu1 %v6146_v20, %s9220_s21 }
 0x234   : > { %v1106_v10 = vadd.f32 %v1105_v9, %v1104_v8  ;;  %v1575_v16 = vpop.permute.xlu0 %1574 }
 0x235   : > { %1598 = vst.msk [vmem:[#allocation3 + $0x10] sm:$0xff] %vm1596_vm8, %v1575_v16  ;;  %v1720_v23 = vpop.permute.xlu1 %1719 }
 0x236   : > { %v1107_v11 = vrot.slane %v1106_v10, 2  ;;  %2905 = vrot.lane.b32.xlu0 %v6149_v29, %s9220_s21  ;;  %1744 = vst.msk [vmem:[#allocation3] sm:$0xff] %vm1743_vm10, %v1720_v23  ;;  %s9228_s21 = smov 36  }
 0x237   : > { %2976 = vrot.lane.b32.xlu1 %v6148_v51, %s9218_s12 }
 0x238   : > { %v1108_v4 = vadd.f32 %v1107_v11, %v1106_v10  ;;  %v1648_v43 = vpop.permute.xlu0 %1647  ;;  %v5865_v10 = vld [vmem:[%s9377_s3] ss:$0 sm:$0xff]  ;;  %s9397_s3 = smov 112  }
 0x239   : > { %1671 = vst.msk [vmem:[#allocation3 + $0x10] sm:$0xff] %vm1669_vm9, %v1648_v43  ;;  %v1793_v61 = vpop.permute.xlu1 %1792 }
 0x23a   : > { %v1109_v6 = vrot.slane %v1108_v4, 1  ;;  %3050 = vrot.lane.b32.xlu0 %v6151_v31, %s9216_s18  ;;  %1817 = vst.msk [vmem:[#allocation3] sm:$0xff] %vm1816_vm11, %v1793_v61 }
 0x23b   : > { %2978 = vrot.lane.b32.xlu1 %v6150_v18, %s9218_s12  ;;  %s9229_s12 = smov 40  }
 0x23c   : > { %v1110_v7 = vadd.f32 %v1109_v6, %v1108_v4  ;;  %v1722_v36 = vpop.permute.xlu0 %1721  ;;  %v1220_v4 = vcombine.high %v5865_v10, %v5865_v10 }
 0x23d   : > { %1745 = vst.msk [vmem:[#allocation3 + $0x10] sm:$0xff] %vm1743_vm10, %v1722_v36  ;;  %v1866_v62 = vpop.permute.xlu1 %1865 }
 0x23e   : > { %5928 = vmatmul.mubr.msk.f32.vlgmr.msra.gmra.mrb[2].mxu0 %vm917_vm2, %v1110_v7  ;;  %3123 = vrot.lane.b32.xlu0 %v6153_v46, %s9214_s24  ;;  %1890 = vst.msk [vmem:[#allocation3] sm:$0xff] %vm1889_vm12, %v1866_v62  ;;  %s9233_s24 = smov 48  }
 0x23f   : > { %3052 = vrot.lane.b32.xlu1 %v6152_v27, %s9216_s18  ;;  %s6649_s18 = smov 44  }
 0x240   : > { %v1795_v26 = vpop.permute.xlu0 %1794 }
 0x241   : > { %1818 = vst.msk [vmem:[#allocation3 + $0x10] sm:$0xff] %vm1816_vm11, %v1795_v26 }
 0x295   : > { %v1868_v0 = vpop.permute.xlu1 %1867 }
 0x296   : > { %1891 = vst.msk [vmem:[#allocation3 + $0x10] sm:$0xff] %vm1889_vm12, %v1868_v0 }
 0x311   : > { %v1180_v1 = vpop.f32.mrb[2].mxu0 }
 0x312   : > { %v1184_v33 = vmul.f32 0.00390625, %v1180_v1  ;;  %v5929_v2 = vpop.f32.mrb[3].mxu0 }
 0x314   : > { %v1186_v3 = vadd.f32 1e-05, %v1184_v33 }
 0x316   : > { %6555 = vrsqrt.f32 %v1186_v3 }
 0x320   : > { %v6556_v8 = vpop.eup %6555 }
 0x321   : > { %v1188_v9 = vmul.f32 %v6556_v8, %v1185_v32 }
 0x323   : > { %v1193_v11 = vrot.slane %v1188_v9, %v7609_v21 }
 0x325   : > { %v1195_v6 = vcombine.high %v1193_v11, %v1193_v11  ;;  %v1201_v7 = vmul.f32 %v1193_v11, %v7632_v45  ;;  %v1197_v12 = vmul.f32 %v1193_v11, %v7626_v13  ;;  %v1205_v53 = vmul.f32 %v1193_v11, %v7655_v17 }
 0x326   : > { %v1209_v54 = vmul.f32 %v1193_v11, %v7683_v24  ;;  %v1199_v42 = vmul.f32 %v1193_v11, %v7629_v14  ;;  %v1203_v44 = vmul.f32 %v1193_v11, %v7647_v37  ;;  %v1207_v34 = vmul.f32 %v1193_v11, %v7673_v57 }
 0x327   : > { %v1226_v25 = vadd.f32 %v5865_v10, %v1201_v7  ;;  %v1222_v58 = vadd.f32 %v5865_v10, %v1197_v12  ;;  %v1230_v20 = vadd.f32 %v5865_v10, %v1205_v53  ;;  %v1198_v47 = vmul.f32 %v1195_v6, %v7635_v49 }
 0x328   : > { %v1234_v51 = vadd.f32 %v5865_v10, %v1209_v54  ;;  %v1224_v29 = vadd.f32 %v5865_v10, %v1199_v42  ;;  %v1200_v45 = vmul.f32 %v1195_v6, %v7638_v15  ;;  %v1202_v13 = vmul.f32 %v1195_v6, %v7641_v41 }
 0x329   : > { %1244 = vst.msk [vmem:[#allocation2 + $0x69] sm:$0xf] %vm1239_vm13, %v1226_v25  ;;  %1240 = vst.msk [vmem:[#allocation2 + $0x39] sm:$0xf] %vm1239_vm13, %v1222_v58  ;;  %v1223_v14 = vadd.f32 %v1220_v4, %v1198_v47  ;;  %v1204_v37 = vmul.f32 %v1195_v6, %v7644_v60  ;;  %v1228_v17 = vadd.f32 %v5865_v10, %v1203_v44 }
 0x32a   : > { %1248 = vst.msk [vmem:[#allocation2 + $0x99] sm:$0xf] %vm1239_vm13, %v1230_v20  ;;  %v1206_v57 = vmul.f32 %v1195_v6, %v7650_v39  ;;  %1252 = vst.msk [vmem:[#allocation2 + $0xc9] sm:$0xf] %vm1239_vm13, %v1234_v51  ;;  %v1225_v49 = vadd.f32 %v1220_v4, %v1200_v45  ;;  %v1227_v15 = vadd.f32 %v1220_v4, %v1202_v13  ;;  %v7825_v20 = vpop.permute.xlu0 %2610  ;;  %v7833_v13 = vpop.permute.xlu1 %2612 }
 0x32b   : > { %1242 = vst.msk [vmem:[#allocation2 + $0x49] sm:$0xf] %vm1239_vm13, %v1224_v29  ;;  %v1232_v24 = vadd.f32 %v5865_v10, %v1207_v34  ;;  %v1208_v41 = vmul.f32 %v1195_v6, %v7658_v40  ;;  %1241 = vst.msk [vmem:[#allocation2 + $0x41] sm:$0xf] %vm1239_vm13, %v1223_v14  ;;  %v1229_v18 = vadd.f32 %v1220_v4, %v1204_v37 }
 0x32c   : > { %1246 = vst.msk [vmem:[#allocation2 + $0x79] sm:$0xf] %vm1239_vm13, %v1228_v17  ;;  %v1231_v31 = vadd.f32 %v1220_v4, %v1206_v57  ;;  %v1210_v60 = vmul.f32 %v1195_v6, %v7676_v50  ;;  %1243 = vst.msk [vmem:[#allocation2 + $0x51] sm:$0xf] %vm1239_vm13, %v1225_v49  ;;  %v1211_v27 = vmul.f32 %v1193_v11, %v7695_v56 }
 0x32d   : > { %1245 = vst.msk [vmem:[#allocation2 + $0x71] sm:$0xf] %vm1239_vm13, %v1227_v15  ;;  %1250 = vst.msk [vmem:[#allocation2 + $0xa9] sm:$0xf] %vm1239_vm13, %v1232_v24  ;;  %v1233_v39 = vadd.f32 %v1220_v4, %v1208_v41  ;;  %v1212_v46 = vmul.f32 %v1195_v6, %v7686_v19 }
 0x32e   : > { %1247 = vst.msk [vmem:[#allocation2 + $0x81] sm:$0xf] %vm1239_vm13, %v1229_v18  ;;  %1249 = vst.msk [vmem:[#allocation2 + $0xa1] sm:$0xf] %vm1239_vm13, %v1231_v31  ;;  %v1235_v40 = vadd.f32 %v1220_v4, %v1210_v60  ;;  %v1236_v52 = vadd.f32 %v5865_v10, %v1211_v27  ;;  %v7830_v45 = vpop.permute.xlu0 %2683  ;;  %v7839_v15 = vpop.permute.xlu1 %2756 }
 0x32f   : > { %1251 = vst.msk [vmem:[#allocation2 + $0xb1] sm:$0xf] %vm1239_vm13, %v1233_v39  ;;  %v1237_v50 = vadd.f32 %v1220_v4, %v1212_v46 }
 0x330   : > { %1253 = vst.msk [vmem:[#allocation2 + $0xd1] sm:$0xf] %vm1239_vm13, %v1235_v40  ;;  %v6154_v35 = vld [vmem:[#allocation2 + $0x61] ss:$8 sps:$4 sm:$0xff]   ;;  %1254 = vst.msk [vmem:[#allocation2 + $0xd9] sm:$0xf] %vm1239_vm13, %v1236_v52 }
 0x331   : > { %1255 = vst.msk [vmem:[#allocation2 + $0xe1] sm:$0xf] %vm1239_vm13, %v1237_v50  ;;  %v6155_v30 = vld [vmem:[#allocation2 + $0x31] ss:$8 sps:$4 sm:$0xff]   ;;  %1360 = vrot.lane.b32.xlu0 %v6154_v35, %s6631_s26  ;;  %v6158_v63 = vld [vmem:[#allocation2 + $0x62] ss:$8 sps:$4 sm:$0xff]  }
 0x332   : > { %1356 = vrot.lane.b32.xlu1 %v6155_v30, %s6631_s26  ;;  %v6156_v19 = vld [vmem:[#allocation2 + $0x30] ss:$8 sps:$4 sm:$0xff]   ;;  %v6161_v38 = vld [vmem:[#allocation2 + $0x60] ss:$8 sps:$4 sm:$0xff]   ;;  %v7837_v57 = vpop.permute.xlu0 %2685  ;;  %v7847_v31 = vpop.permute.xlu1 %2830  ;;  %vm2475_vm13 = vcmask 556544  }
 0x333   : > { %v6157_v56 = vld [vmem:[#allocation2 + $0x32] ss:$8 sps:$4 sm:$0xff]   ;;  %v6164_v22 = vld [vmem:[#allocation2 + $0xc2] ss:$8 sps:$4 sm:$0xff]  }
 0x334   : > { %v6159_v28 = vld [vmem:[#allocation2 + $0x91] ss:$8 sps:$4 sm:$0xff]   ;;  %v6165_v16 = vld [vmem:[#allocation2 + $0x61] ss:$8 sps:$4 sm:$0xff]  }
 0x335   : > { %1939 = vrot.lane.b32.xlu0 %v6156_v19, %s9228_s21  ;;  %v6160_v55 = vld [vmem:[#allocation2 + $0x31] ss:$8 sps:$4 sm:$0xff]   ;;  %v6167_v23 = vld [vmem:[#allocation2 + $0x41] ss:$8 sps:$4 sm:$0xff]  }
 0x336   : > { %1429 = vrot.lane.b32.xlu1 %v6157_v56, %s9226_s27  ;;  %v6162_v48 = vld [vmem:[#allocation2 + $0x32] ss:$8 sps:$4 sm:$0xff]   ;;  %v6166_v43 = vld [vmem:[#allocation2 + $0x62] ss:$8 sps:$4 sm:$0xff]   ;;  %v7844_v18 = vpop.permute.xlu0 %2758  ;;  %v7854_v50 = vpop.permute.xlu1 %2903 }
 0x337   : > { %v6163_v59 = vld [vmem:[#allocation2 + $0x92] ss:$8 sps:$4 sm:$0xff]   ;;  %v6169_v61 = vld [vmem:[#allocation2 + $0x42] ss:$8 sps:$4 sm:$0xff]  }
 0x338   : > { %v6168_v36 = vld [vmem:[#allocation2 + $0x90] ss:$8 sps:$4 sm:$0xff]   ;;  %v6172_v1 = vld [vmem:[#allocation2 + $0x60] ss:$8 sps:$4 sm:$0xff]  }
 0x339   : > { %1433 = vrot.lane.b32.xlu0 %v6158_v63, %s9226_s27  ;;  %v6171_v62 = vld [vmem:[#allocation2 + $0x48] ss:$8 sps:$4 sm:$0xff]   ;;  %v6173_v0 = vld [vmem:[#allocation2 + $0x3a] ss:$8 sps:$4 sm:$0xff]  }
 0x33a   : > { %1364 = vrot.lane.b32.xlu1 %v6159_v28, %s6631_s26  ;;  %v6170_v26 = vld [vmem:[#allocation2 + $0x91] ss:$8 sps:$4 sm:$0xff]   ;;  %v6175_v33 = vld [vmem:[#allocation2 + $0x40] ss:$8 sps:$4 sm:$0xff]   ;;  %v7852_v40 = vpop.permute.xlu0 %2832  ;;  %v7862_v63 = vpop.permute.xlu1 %2976 }
 0x33b   : > { %v6174_v2 = vld [vmem:[#allocation2 + $0x92] ss:$8 sps:$4 sm:$0xff]   ;;  %v6176_v32 = vld [vmem:[#allocation2 + $0x61] ss:$8 sps:$4 sm:$0xff]  }
 0x33c   : > { %v6177_v3 = vld [vmem:[#allocation2 + $0x68] ss:$8 sps:$4 sm:$0xff]   ;;  %v6187_v42 = vld [vmem:[#allocation2 + $0x38] ss:$8 sps:$4 sm:$0xff]  }
 0x33d   : > { %2012 = vrot.lane.b32.xlu0 %v6160_v55, %s9229_s12  ;;  %v6179_v8 = vld [vmem:[#allocation2 + $0x41] ss:$8 sps:$4 sm:$0xff]   ;;  %v6214_v9 = vld [vmem:[#allocation2 + $0x30] ss:$8 sps:$4 sm:$0xff]  }
 0x33e   : > { %1943 = vrot.lane.b32.xlu1 %v6161_v38, %s9228_s21  ;;  %v6215_v10 = vld [vmem:[#allocation2 + $0x60] ss:$8 sps:$4 sm:$0xff]   ;;  %1306 = vst.msk [vmem:[#allocation3 + $0x20] sm:$0xff] %vm917_vm2, %v6214_v9  ;;  %v6220_v7 = vld [vmem:[#allocation2 + $0x90] ss:$8 sps:$4 sm:$0xff]   ;;  %v7859_v19 = vpop.permute.xlu0 %2905 }
 0x33f   : > { %v6178_v11 = vld [vmem:[#allocation2 + $0x62] ss:$8 sps:$4 sm:$0xff]   ;;  %1308 = vst.msk [vmem:[#allocation3 + $0x40] sm:$0xff] %vm917_vm2, %v6215_v10  ;;  %1310 = vst.msk [vmem:[#allocation3 + $0x60] sm:$0xff] %vm917_vm2, %v6220_v7  ;;  %v6186_v54 = vld [vmem:[#allocation2 + $0x90] ss:$8 sps:$4 sm:$0xff]  }
 0x340   : > { %v6182_v4 = vld [vmem:[#allocation2 + $0x69] ss:$8 sps:$4 sm:$0xff]   ;;  %v6189_v34 = vld [vmem:[#allocation2 + $0x79] ss:$8 sps:$4 sm:$0xff]  }
 0x341   : > { %2085 = vrot.lane.b32.xlu0 %v6162_v48, %s6649_s18  ;;  %v6181_v6 = vld [vmem:[#allocation2 + $0xc0] ss:$8 sps:$4 sm:$0xff]   ;;  %v6191_v58 = vld [vmem:[#allocation2 + $0x52] ss:$8 sps:$4 sm:$0xff]  }
 0x342   : > { %1437 = vrot.lane.b32.xlu1 %v6163_v59, %s9226_s27  ;;  %v6185_v12 = vld [vmem:[#allocation2 + $0x42] ss:$8 sps:$4 sm:$0xff]   ;;  %v6190_v47 = vld [vmem:[#allocation2 + $0x91] ss:$8 sps:$4 sm:$0xff]   ;;  %v7867_v48 = vpop.permute.xlu0 %3050 }
 0x343   : > { %v6184_v53 = vld [vmem:[#allocation2 + $0xc1] ss:$8 sps:$4 sm:$0xff]   ;;  %v6192_v29 = vld [vmem:[#allocation2 + $0x92] ss:$8 sps:$4 sm:$0xff]  }
 0x344   : > { %v6229_v44 = vld [vmem:[#allocation2 + $0x40] ss:$8 sps:$4 sm:$0xff]   ;;  %v6199_v24 = vld [vmem:[#allocation2 + $0x70] ss:$8 sps:$4 sm:$0xff]  }
 0x345   : > { %2752 = vrot.lane.b32.xlu0 %v6164_v22, %s9224_s16  ;;  %1307 = vst.msk [vmem:[#allocation3 + $0x30] sm:$0xff] %vm917_vm2, %v6229_v44  ;;  %v6188_v25 = vld [vmem:[#allocation2 + $0xc2] ss:$8 sps:$4 sm:$0xff]   ;;  %v6204_v30 = vld [vmem:[#allocation2 + $0x71] ss:$8 sps:$4 sm:$0xff]   ;;  %v7869_v22 = vpop.permute.xlu1 %2978 }
 0x346   : > { %2016 = vrot.lane.b32.xlu1 %v6165_v16, %s9229_s12  ;;  %v6193_v51 = vld [vmem:[#allocation2 + $0x48] ss:$8 sps:$4 sm:$0xff]   ;;  %v6197_v17 = vld [vmem:[#allocation2 + $0x7a] ss:$8 sps:$4 sm:$0xff]  }
 0x347   : > { %v6195_v14 = vld [vmem:[#allocation2 + $0xa1] ss:$8 sps:$4 sm:$0xff]   ;;  %v6267_v56 = vld [vmem:[#allocation2 + $0x70] ss:$8 sps:$4 sm:$0xff]  }
 0x348   : > { %v6194_v37 = vld [vmem:[#allocation2 + $0xc0] ss:$8 sps:$4 sm:$0xff]   ;;  %v6207_v28 = vld [vmem:[#allocation2 + $0x71] ss:$8 sps:$4 sm:$0xff]   ;;  %1309 = vst.msk [vmem:[#allocation3 + $0x50] sm:$0xff] %vm917_vm2, %v6267_v56 }
 0x349   : > { %1358 = vrot.lane.b32.xlu0 %v6167_v23, %s6631_s26  ;;  %v6196_v49 = vld [vmem:[#allocation2 + $0xc1] ss:$8 sps:$4 sm:$0xff]   ;;  %v6210_v23 = vld [vmem:[#allocation2 + $0x72] ss:$8 sps:$4 sm:$0xff]  }
 0x34a   : > { %2089 = vrot.lane.b32.xlu1 %v6166_v43, %s6649_s18  ;;  %v6198_v41 = vld [vmem:[#allocation2 + $0x38] ss:$8 sps:$4 sm:$0xff]   ;;  %v6201_v39 = vld [vmem:[#allocation2 + $0x49] ss:$8 sps:$4 sm:$0xff]   ;;  %v7874_v43 = vpop.permute.xlu0 %3123 }
 0x34b   : > { %v6256_v60 = vld [vmem:[#allocation2 + $0xa0] ss:$8 sps:$4 sm:$0xff]  }
 0x34c   : > { %v6200_v27 = vld [vmem:[#allocation2 + $0x39] ss:$8 sps:$4 sm:$0xff]   ;;  %1311 = vst.msk [vmem:[#allocation3 + $0x70] sm:$0xff] %vm917_vm2, %v6256_v60  ;;  %v6202_v52 = vld [vmem:[#allocation2 + $0x49] ss:$8 sps:$4 sm:$0xff]   ;;  %vm2109_vm2 = vcmask 392544  }
 0x34d   : > { %1431 = vrot.lane.b32.xlu0 %v6169_v61, %s9226_s27  ;;  %v6203_v46 = vld [vmem:[#allocation2 + $0xa2] ss:$8 sps:$4 sm:$0xff]   ;;  %v7877_v61 = vpop.permute.xlu1 %3052 }
 0x34e   : > { %1947 = vrot.lane.b32.xlu1 %v6168_v36, %s9228_s21  ;;  %v6205_v35 = vld [vmem:[#allocation2 + $0x80] ss:$8 sps:$4 sm:$0xff]  }
 0x34f   : > { %v6206_v55 = vld [vmem:[#allocation2 + $0x4a] ss:$8 sps:$4 sm:$0xff]   ;;  %v6232_v60 = vld [vmem:[#allocation2 + $0x3a] ss:$8 sps:$4 sm:$0xff]  }
 0x350   : > { %v6209_v38 = vld [vmem:[#allocation2 + $0x4a] ss:$8 sps:$4 sm:$0xff]  }
 0x351   : > { %1505 = vrot.lane.b32.xlu0 %v6171_v62, %s6633_s28  ;;  %v6208_v59 = vld [vmem:[#allocation2 + $0x40] ss:$8 sps:$4 sm:$0xff]   ;;  %v6212_v62 = vld [vmem:[#allocation2 + $0x50] ss:$8 sps:$4 sm:$0xff]  }
 0x352   : > { %2020 = vrot.lane.b32.xlu1 %v6170_v26, %s9229_s12  ;;  %v6211_v16 = vld [vmem:[#allocation2 + $0xa8] ss:$8 sps:$4 sm:$0xff]  }
 0x353   : > { %v6213_v36 = vld [vmem:[#allocation2 + $0x81] ss:$8 sps:$4 sm:$0xff]  }
 0x354   : > { %v6222_v10 = vld [vmem:[#allocation2 + $0xa9] ss:$8 sps:$4 sm:$0xff]  }
 0x355   : > { %1649 = vrot.lane.b32.xlu0 %v6173_v0, %s6635_s22  ;;  %v6217_v0 = vld [vmem:[#allocation2 + $0x72] ss:$8 sps:$4 sm:$0xff]   ;;  %v6224_v7 = vld [vmem:[#allocation2 + $0x82] ss:$8 sps:$4 sm:$0xff]  }
 0x356   : > { %2598 = vrot.lane.b32.xlu1 %v6172_v1, %s9246_s30 }
 0x359   : > { %1723 = vrot.lane.b32.xlu0 %v6175_v33, %s9237_s23  ;;  %v6216_v33 = vld [vmem:[#allocation2 + $0x41] ss:$8 sps:$4 sm:$0xff]  }
 0x35a   : > { %2093 = vrot.lane.b32.xlu1 %v6174_v2, %s6649_s18 }
 0x35d   : > { %1507 = vrot.lane.b32.xlu0 %v6177_v3, %s6633_s28  ;;  %v6219_v3 = vld [vmem:[#allocation2 + $0x50] ss:$8 sps:$4 sm:$0xff]  }
 0x35e   : > { %2671 = vrot.lane.b32.xlu1 %v6176_v32, %s6640_s15 }
 0x361   : > { %1796 = vrot.lane.b32.xlu0 %v6179_v8, %s6637_s25  ;;  %v6218_v8 = vld [vmem:[#allocation2 + $0x78] ss:$8 sps:$4 sm:$0xff]  }
 0x362   : > { %2744 = vrot.lane.b32.xlu1 %v6178_v11, %s9224_s16 }
 0x365   : > { %1580 = vrot.lane.b32.xlu0 %v6182_v4, %s9239_s19  ;;  %v6221_v4 = vld [vmem:[#allocation2 + $0x51] ss:$8 sps:$4 sm:$0xff]  }
 0x366   : > { %1951 = vrot.lane.b32.xlu1 %v6181_v6, %s9228_s21 }
 0x369   : > { %1869 = vrot.lane.b32.xlu0 %v6185_v12, %s9235_s29 }
 0x36a   : > { %2024 = vrot.lane.b32.xlu1 %v6184_v53, %s9229_s12  ;;  %v6223_v53 = vld [vmem:[#allocation2 + $0x42] ss:$8 sps:$4 sm:$0xff]  }
 0x36d   : > { %2158 = vrot.lane.b32.xlu0 %v6187_v42, %s9233_s24  ;;  %v6226_v42 = vld [vmem:[#allocation2 + $0x78] ss:$8 sps:$4 sm:$0xff]  }
 0x36e   : > { %2602 = vrot.lane.b32.xlu1 %v6186_v54, %s9246_s30 }
 0x371   : > { %1582 = vrot.lane.b32.xlu0 %v6189_v34, %s9239_s19  ;;  %v6225_v34 = vld [vmem:[#allocation2 + $0x6a] ss:$8 sps:$4 sm:$0xff]  }
 0x372   : > { %2097 = vrot.lane.b32.xlu1 %v6188_v25, %s6649_s18 }
 0x375   : > { %1871 = vrot.lane.b32.xlu0 %v6191_v58, %s9235_s29  ;;  %v6228_v58 = vld [vmem:[#allocation2 + $0x51] ss:$8 sps:$4 sm:$0xff]  }
 0x376   : > { %2675 = vrot.lane.b32.xlu1 %v6190_v47, %s6640_s15 }
 0x379   : > { %2160 = vrot.lane.b32.xlu0 %v6193_v51, %s9233_s24  ;;  %v6227_v51 = vld [vmem:[#allocation2 + $0x39] ss:$8 sps:$4 sm:$0xff]  }
 0x37a   : > { %2748 = vrot.lane.b32.xlu1 %v6192_v29, %s9224_s16  ;;  %s9248_s16 = smov 56  }
 0x37d   : > { %1366 = vrot.lane.b32.xlu0 %v6195_v14, %s6631_s26  ;;  %v6231_v14 = vld [vmem:[#allocation2 + $0xaa] ss:$8 sps:$4 sm:$0xff]  }
 0x37e   : > { %2606 = vrot.lane.b32.xlu1 %v6194_v37, %s9246_s30 }
 0x381   : > { %1655 = vrot.lane.b32.xlu0 %v6197_v17, %s6635_s22  ;;  %v6230_v17 = vld [vmem:[#allocation2 + $0x70] ss:$8 sps:$4 sm:$0xff]  }
 0x382   : > { %2679 = vrot.lane.b32.xlu1 %v6196_v49, %s6640_s15 }
 0x385   : > { %1945 = vrot.lane.b32.xlu0 %v6199_v24, %s9228_s21  ;;  %v6233_v24 = vld [vmem:[#allocation2 + $0xa0] ss:$8 sps:$4 sm:$0xff]  }
 0x386   : > { %1503 = vrot.lane.b32.xlu1 %v6198_v41, %s6633_s28 }
 0x389   : > { %2233 = vrot.lane.b32.xlu0 %v6201_v39, %s6651_s20 }
 0x38a   : > { %1576 = vrot.lane.b32.xlu1 %v6200_v27, %s9239_s19  ;;  %v6235_v27 = vld [vmem:[#allocation2 + $0x79] ss:$8 sps:$4 sm:$0xff]  }
 0x38d   : > { %1439 = vrot.lane.b32.xlu0 %v6203_v46, %s9226_s27 }
 0x38e   : > { %1578 = vrot.lane.b32.xlu1 %v6202_v52, %s9239_s19  ;;  %v6234_v52 = vld [vmem:[#allocation2 + $0x98] ss:$8 sps:$4 sm:$0xff]  }
 0x391   : > { %1729 = vrot.lane.b32.xlu0 %v6205_v35, %s9237_s23 }
 0x392   : > { %1362 = vrot.lane.b32.xlu1 %v6204_v30, %s6631_s26  ;;  %s6653_s26 = smov 60   ;;  %v6237_v30 = vld [vmem:[#allocation2 + $0x52] ss:$8 sps:$4 sm:$0xff]  }
 0x395   : > { %2018 = vrot.lane.b32.xlu0 %v6207_v28, %s9229_s12  ;;  %v6236_v28 = vld [vmem:[#allocation2 + $0x71] ss:$8 sps:$4 sm:$0xff]  }
 0x396   : > { %1651 = vrot.lane.b32.xlu1 %v6206_v55, %s6635_s22 }
 0x399   : > { %2306 = vrot.lane.b32.xlu0 %v6209_v38, %s9248_s16  ;;  %v6239_v38 = vld [vmem:[#allocation2 + $0xb0] ss:$8 sps:$4 sm:$0xff]  }
 0x39a   : > { %1941 = vrot.lane.b32.xlu1 %v6208_v59, %s9228_s21 }
 0x39d   : > { %1513 = vrot.lane.b32.xlu0 %v6211_v16, %s6633_s28  ;;  %v6238_v16 = vld [vmem:[#allocation2 + $0x40] ss:$8 sps:$4 sm:$0xff]  }
 0x39e   : > { %1435 = vrot.lane.b32.xlu1 %v6210_v23, %s9226_s27  ;;  %s9241_s27 = smov 64  }
 0x3a1   : > { %1802 = vrot.lane.b32.xlu0 %v6213_v36, %s6637_s25  ;;  %v6241_v36 = vld [vmem:[#allocation2 + $0xa1] ss:$8 sps:$4 sm:$0xff]  }
 0x3a2   : > { %1725 = vrot.lane.b32.xlu1 %v6212_v62, %s9237_s23 }
 0x3a3   : > { %v1361_v26 = vpop.permute.xlu0 %1360 }
 0x3a4   : > { %v1357_v1 = vpop.permute.xlu1 %1356  ;;  %1381 = vst.msk [vmem:[#allocation3 + $0x40] sm:$0xff] %vm1376_vm5, %v1361_v26  ;;  %v6240_v26 = vld [vmem:[#allocation2 + $0x99] ss:$8 sps:$4 sm:$0xff]  }
 0x3a5   : > { %1379 = vst.msk [vmem:[#allocation3 + $0x20] sm:$0xff] %vm1376_vm5, %v1357_v1  ;;  %2091 = vrot.lane.b32.xlu0 %v6217_v0, %s6649_s18  ;;  %v6243_v1 = vld [vmem:[#allocation2 + $0x7a] ss:$8 sps:$4 sm:$0xff]  }
 0x3a6   : > { %2014 = vrot.lane.b32.xlu1 %v6216_v33, %s9229_s12 }
 0x3a7   : > { %v1940_v2 = vpop.permute.xlu0 %1939 }
 0x3a8   : > { %v1430_v32 = vpop.permute.xlu1 %1429  ;;  %1964 = vst.msk [vmem:[#allocation3] sm:$0xff] %vm1963_vm14, %v1940_v2  ;;  %v6242_v2 = vld [vmem:[#allocation2 + $0x72] ss:$8 sps:$4 sm:$0xff]  }
 0x3a9   : > { %1452 = vst.msk [vmem:[#allocation3 + $0x20] sm:$0xff] %vm1449_vm6, %v1430_v32  ;;  %2380 = vrot.lane.b32.xlu0 %v6219_v3, %s6653_s26  ;;  %v6245_v32 = vld [vmem:[#allocation2 + $0x70] ss:$8 sps:$4 sm:$0xff]  }
 0x3aa   : > { %1509 = vrot.lane.b32.xlu1 %v6218_v8, %s6633_s28 }
 0x3ab   : > { %v1434_v9 = vpop.permute.xlu0 %1433 }
 0x3ac   : > { %v1365_v11 = vpop.permute.xlu1 %1364  ;;  %1454 = vst.msk [vmem:[#allocation3 + $0x40] sm:$0xff] %vm1449_vm6, %v1434_v9  ;;  %v6244_v9 = vld [vmem:[#allocation2 + $0x68] ss:$8 sps:$4 sm:$0xff]  }
 0x3ad   : > { %1383 = vst.msk [vmem:[#allocation3 + $0x60] sm:$0xff] %vm1376_vm5, %v1365_v11  ;;  %1586 = vrot.lane.b32.xlu0 %v6222_v10, %s9239_s19  ;;  %v6247_v11 = vld [vmem:[#allocation2 + $0xb1] ss:$8 sps:$4 sm:$0xff]  }
 0x3ae   : > { %1798 = vrot.lane.b32.xlu1 %v6221_v4, %s6637_s25 }
 0x3af   : > { %v2013_v6 = vpop.permute.xlu0 %2012 }
 0x3b0   : > { %v7893_v12 = vpop.permute.xlu1 %1943  ;;  %2037 = vst.msk [vmem:[#allocation3] sm:$0xff] %vm9243_vm15, %v2013_v6  ;;  %v6246_v6 = vld [vmem:[#allocation2 + $0x41] ss:$8 sps:$4 sm:$0xff]  }
 0x3b1   : > { %1875 = vrot.lane.b32.xlu0 %v6224_v7, %s9235_s29 }
 0x3b2   : > { %2087 = vrot.lane.b32.xlu1 %v6223_v53, %s6649_s18  ;;  %v6249_v53 = vld [vmem:[#allocation2 + $0xa2] ss:$8 sps:$4 sm:$0xff]  }
 0x3b3   : > { %v2086_v54 = vpop.permute.xlu0 %2085 }
 0x3b4   : > { %v1438_v44 = vpop.permute.xlu1 %1437  ;;  %2110 = vst.msk [vmem:[#allocation3] sm:$0xff] %vm2109_vm2, %v2086_v54 }
 0x3b5   : > { %1456 = vst.msk [vmem:[#allocation3 + $0x60] sm:$0xff] %vm1449_vm6, %v1438_v44  ;;  %2164 = vrot.lane.b32.xlu0 %v6226_v42, %s9233_s24  ;;  %v6248_v42 = vld [vmem:[#allocation2 + $0x9a] ss:$8 sps:$4 sm:$0xff]  }
 0x3b6   : > { %1653 = vrot.lane.b32.xlu1 %v6225_v34, %s6635_s22  ;;  %v6251_v34 = vld [vmem:[#allocation2 + $0x80] ss:$8 sps:$4 sm:$0xff]  }
 0x3b7   : > { %v7902_v25 = vpop.permute.xlu0 %2752 }
 0x3b8   : > { %v7904_v47 = vpop.permute.xlu1 %2016 }
 0x3b9   : > { %2453 = vrot.lane.b32.xlu0 %v6228_v58, %s9241_s27 }
 0x3ba   : > { %2231 = vrot.lane.b32.xlu1 %v6227_v51, %s6651_s20  ;;  %v6250_v51 = vld [vmem:[#allocation2 + $0x69] ss:$8 sps:$4 sm:$0xff]  }
 0x3bb   : > { %v1359_v29 = vpop.permute.xlu0 %1358 }
 0x3bc   : > { %v7908_v37 = vpop.permute.xlu1 %2089  ;;  %1380 = vst.msk [vmem:[#allocation3 + $0x30] sm:$0xff] %vm1376_vm5, %v1359_v29 }
 0x3bd   : > { %1659 = vrot.lane.b32.xlu0 %v6231_v14, %s6635_s22  ;;  %v6253_v14 = vld [vmem:[#allocation2 + $0x71] ss:$8 sps:$4 sm:$0xff]  }
 0x3be   : > { %1727 = vrot.lane.b32.xlu1 %v6230_v17, %s9237_s23 }
 0x3bf   : > { %v1432_v49 = vpop.permute.xlu0 %1431 }
 0x3c0   : > { %v7913_v41 = vpop.permute.xlu1 %1947  ;;  %1453 = vst.msk [vmem:[#allocation3 + $0x30] sm:$0xff] %vm1449_vm6, %v1432_v49  ;;  %v6252_v49 = vld [vmem:[#allocation2 + $0x42] ss:$8 sps:$4 sm:$0xff]  }
 0x3c1   : > { %1949 = vrot.lane.b32.xlu0 %v6233_v24, %s9228_s21  ;;  %s6655_s21 = smov 68  }
 0x3c2   : > { %2304 = vrot.lane.b32.xlu1 %v6232_v60, %s9248_s16  ;;  %v6255_v60 = vld [vmem:[#allocation2 + $0xb2] ss:$8 sps:$4 sm:$0xff]  }
 0x3c3   : > { %v1506_v39 = vpop.permute.xlu0 %1505 }
 0x3c4   : > { %v7918_v46 = vpop.permute.xlu1 %2020  ;;  %1527 = vst.msk [vmem:[#allocation3 + $0x30] sm:$0xff] %vm1523_vm7, %v1506_v39 }
 0x3c5   : > { %2237 = vrot.lane.b32.xlu0 %v6235_v27, %s6651_s20  ;;  %v6254_v27 = vld [vmem:[#allocation2 + $0xa0] ss:$8 sps:$4 sm:$0xff]  }
 0x3c6   : > { %1511 = vrot.lane.b32.xlu1 %v6234_v52, %s6633_s28  ;;  %s9378_s28 = smov 80  }
 0x3c7   : > { %v7923_v35 = vpop.permute.xlu0 %1649 }
 0x3c8   : > { %v7925_v56 = vpop.permute.xlu1 %2598 }
 0x3c9   : > { %2526 = vrot.lane.b32.xlu0 %v6237_v30, %s6655_s21  ;;  %v6258_v30 = vld [vmem:[#allocation2 + $0xa8] ss:$8 sps:$4 sm:$0xff]  }
 0x3ca   : > { %1800 = vrot.lane.b32.xlu1 %v6236_v28, %s6637_s25 }
 0x3cb   : > { %v7929_v55 = vpop.permute.xlu0 %1723 }
 0x3cc   : > { %v7931_v59 = vpop.permute.xlu1 %2093 }
 0x3cd   : > { %1733 = vrot.lane.b32.xlu0 %v6239_v38, %s9237_s23  ;;  %v6257_v38 = vld [vmem:[#allocation2 + $0x6a] ss:$8 sps:$4 sm:$0xff]  }
 0x3ce   : > { %2378 = vrot.lane.b32.xlu1 %v6238_v16, %s6653_s26 }
 0x3cf   : > { %v1508_v23 = vpop.permute.xlu0 %1507 }
 0x3d0   : > { %v7935_v62 = vpop.permute.xlu1 %2671  ;;  %1528 = vst.msk [vmem:[#allocation3 + $0x40] sm:$0xff] %vm1523_vm7, %v1508_v23  ;;  %v6260_v23 = vld [vmem:[#allocation2 + $0x81] ss:$8 sps:$4 sm:$0xff]  }
 0x3d1   : > { %2022 = vrot.lane.b32.xlu0 %v6241_v36, %s9229_s12 }
 0x3d2   : > { %1584 = vrot.lane.b32.xlu1 %v6240_v26, %s9239_s19  ;;  %v6259_v26 = vld [vmem:[#allocation2 + $0xa1] ss:$8 sps:$4 sm:$0xff]   ;;  %s9392_s19 = smov 32  }
 0x3d3   : > { %v7940_v0 = vpop.permute.xlu0 %1796 }
 0x3d4   : > { %v7942_v33 = vpop.permute.xlu1 %2744 }
 0x3d5   : > { %2310 = vrot.lane.b32.xlu0 %v6243_v1, %s9248_s16 }
 0x3d6   : > { %1873 = vrot.lane.b32.xlu1 %v6242_v2, %s9235_s29  ;;  %v6262_v2 = vld [vmem:[#allocation2 + $0x72] ss:$8 sps:$4 sm:$0xff]  }
 0x3d7   : > { %v1581_v3 = vpop.permute.xlu0 %1580 }
 0x3d8   : > { %v7946_v8 = vpop.permute.xlu1 %1951  ;;  %1601 = vst.msk [vmem:[#allocation3 + $0x40] sm:$0xff] %vm1596_vm8, %v1581_v3 }
 0x3d9   : > { %2600 = vrot.lane.b32.xlu0 %v6245_v32, %s9246_s30  ;;  %v6261_v32 = vld [vmem:[#allocation2 + $0x70] ss:$8 sps:$4 sm:$0xff]  }
 0x3da   : > { %2162 = vrot.lane.b32.xlu1 %v6244_v9, %s9233_s24 }
 0x3db   : > { %v7951_v10 = vpop.permute.xlu0 %1869 }
 0x3dc   : > { %v7953_v4 = vpop.permute.xlu1 %2024 }
 0x3dd   : > { %1806 = vrot.lane.b32.xlu0 %v6247_v11, %s6637_s25  ;;  %v6264_v11 = vld [vmem:[#allocation2 + $0xd0] ss:$8 sps:$4 sm:$0xff]  }
 0x3de   : > { %2451 = vrot.lane.b32.xlu1 %v6246_v6, %s9241_s27 }
 0x3df   : > { %v2159_v7 = vpop.permute.xlu0 %2158 }
 0x3e0   : > { %v7957_v54 = vpop.permute.xlu1 %2602  ;;  %2183 = vst.msk [vmem:[#allocation3] sm:$0xff] %vm2182_vm3, %v2159_v7  ;;  %v6263_v7 = vld [vmem:[#allocation2 + $0xa2] ss:$8 sps:$4 sm:$0xff]  }
 0x3e1   : > { %2095 = vrot.lane.b32.xlu0 %v6249_v53, %s6649_s18 }
 0x3e2   : > { %1657 = vrot.lane.b32.xlu1 %v6248_v42, %s6635_s22  ;;  %s9379_s22 = smov 36   ;;  %v6266_v42 = vld [vmem:[#allocation2 + $0xa9] ss:$8 sps:$4 sm:$0xff]  }
 0x3e3   : > { %v7962_v44 = vpop.permute.xlu0 %1582 }
 0x3e4   : > { %v7964_v58 = vpop.permute.xlu1 %2097 }
 0x3e5   : > { %2384 = vrot.lane.b32.xlu0 %v6251_v34, %s6653_s26 }
 0x3e6   : > { %2235 = vrot.lane.b32.xlu1 %v6250_v51, %s6651_s20  ;;  %v6265_v51 = vld [vmem:[#allocation2 + $0x98] ss:$8 sps:$4 sm:$0xff]  }
 0x3e7   : > { %v7968_v29 = vpop.permute.xlu0 %1871 }
 0x3e8   : > { %v7970_v17 = vpop.permute.xlu1 %2675 }
 0x3e9   : > { %2673 = vrot.lane.b32.xlu0 %v6253_v14, %s6640_s15  ;;  %v6268_v14 = vld [vmem:[#allocation2 + $0x71] ss:$8 sps:$4 sm:$0xff]  }
 0x3ea   : > { %2524 = vrot.lane.b32.xlu1 %v6252_v49, %s6655_s21 }
 0x3eb   : > { %v7974_v24 = vpop.permute.xlu0 %2160 }
 0x3ec   : > { %v7976_v39 = vpop.permute.xlu1 %2748 }
 0x3ed   : > { %1879 = vrot.lane.b32.xlu0 %v6255_v60, %s9235_s29  ;;  %v6270_v60 = vld [vmem:[#allocation2 + $0x99] ss:$8 sps:$4 sm:$0xff]  }
 0x3ee   : > { %1731 = vrot.lane.b32.xlu1 %v6254_v27, %s9237_s23  ;;  %s9393_s23 = smov 40  }
 0x3ef   : > { %v1367_v52 = vpop.permute.xlu0 %1366 }
 0x3f0   : > { %v7980_v28 = vpop.permute.xlu1 %2606  ;;  %1384 = vst.msk [vmem:[#allocation3 + $0x70] sm:$0xff] %vm1376_vm5, %v1367_v52  ;;  %v6272_v52 = vld [vmem:[#allocation2 + $0x72] ss:$8 sps:$4 sm:$0xff]  }
 0x3f1   : > { %2168 = vrot.lane.b32.xlu0 %v6258_v30, %s9233_s24 }
 0x3f2   : > { %2308 = vrot.lane.b32.xlu1 %v6257_v38, %s9248_s16  ;;  %v6275_v38 = vld [vmem:[#allocation2 + $0xaa] ss:$8 sps:$4 sm:$0xff]  }
 0x3f3   : > { %v7985_v16 = vpop.permute.xlu0 %1655 }
 0x3f4   : > { %v7987_v36 = vpop.permute.xlu1 %2679 }
 0x3f5   : > { %2457 = vrot.lane.b32.xlu0 %v6260_v23, %s9241_s27 }
 0x3f6   : > { %1804 = vrot.lane.b32.xlu1 %v6259_v26, %s6637_s25  ;;  %s9380_s25 = smov 84   ;;  %v6274_v26 = vld [vmem:[#allocation2 + $0x68] ss:$8 sps:$4 sm:$0xff]  }
 0x3f7   : > { %v7991_v1 = vpop.permute.xlu0 %1945 }
 0x3f8   : > { %v1504_v3 = vpop.permute.xlu1 %1503 }
 0x3f9   : > { %1526 = vst.msk [vmem:[#allocation3 + $0x20] sm:$0xff] %vm1523_vm7, %v1504_v3  ;;  %2746 = vrot.lane.b32.xlu0 %v6262_v2, %s9378_s28  ;;  %v6277_v3 = vld [vmem:[#allocation2 + $0xa0] ss:$8 sps:$4 sm:$0xff]  }
 0x3fa   : > { %2382 = vrot.lane.b32.xlu1 %v6261_v32, %s6653_s26 }
 0x3fb   : > { %v7996_v9 = vpop.permute.xlu0 %2233 }
 0x3fc   : > { %v1577_v6 = vpop.permute.xlu1 %1576 }
 0x3fd   : > { %1599 = vst.msk [vmem:[#allocation3 + $0x20] sm:$0xff] %vm1596_vm8, %v1577_v6  ;;  %1953 = vrot.lane.b32.xlu0 %v6264_v11, %s9379_s22  ;;  %v6276_v11 = vld [vmem:[#allocation2 + $0x9a] ss:$8 sps:$4 sm:$0xff]   ;;  %s9381_s22 = smov 88  }
 0x3fe   : > { %1672 = vst.msk [vmem:[#allocation3 + $0x20] sm:$0xff] %vm1669_vm9, %v7923_v35  ;;  %1877 = vrot.lane.b32.xlu1 %v6263_v7, %s9235_s29  ;;  %v6279_v7 = vld [vmem:[#allocation2 + $0x79] ss:$8 sps:$4 sm:$0xff]   ;;  %s9250_s29 = smov 112  }
 0x3ff   : > { %1746 = vst.msk [vmem:[#allocation3 + $0x20] sm:$0xff] %vm1743_vm10, %v7929_v55  ;;  %v1440_v53 = vpop.permute.xlu0 %1439  ;;  %v6269_v55 = vld [vmem:[#allocation2 + $0x82] ss:$8 sps:$4 sm:$0xff]  }
 0x400   : > { %1819 = vst.msk [vmem:[#allocation3 + $0x20] sm:$0xff] %vm1816_vm11, %v7940_v0  ;;  %v1579_v34 = vpop.permute.xlu1 %1578 }
 0x401   : > { %1457 = vst.msk [vmem:[#allocation3 + $0x70] sm:$0xff] %vm1449_vm6, %v1440_v53  ;;  %2241 = vrot.lane.b32.xlu0 %v6266_v42, %s6651_s20  ;;  %v6278_v42 = vld [vmem:[#allocation2 + $0x69] ss:$8 sps:$4 sm:$0xff]  }
 0x402   : > { %1892 = vst.msk [vmem:[#allocation3 + $0x20] sm:$0xff] %vm1889_vm12, %v7951_v10  ;;  %2166 = vrot.lane.b32.xlu1 %v6265_v51, %s9233_s24  ;;  %v6281_v51 = vld [vmem:[#allocation2 + $0xd2] ss:$8 sps:$4 sm:$0xff]  }
 0x403   : > { %1600 = vst.msk [vmem:[#allocation3 + $0x30] sm:$0xff] %vm1596_vm8, %v1579_v34  ;;  %v1730_v35 = vpop.permute.xlu0 %1729 }
 0x404   : > { %1966 = vst.msk [vmem:[#allocation3 + $0x20] sm:$0xff] %vm1963_vm14, %v7893_v12  ;;  %v1363_v0 = vpop.permute.xlu1 %1362  ;;  %v6271_v12 = vld [vmem:[#allocation2 + $0x78] ss:$8 sps:$4 sm:$0xff]  }
 0x405   : > { %2039 = vst.msk [vmem:[#allocation3 + $0x20] sm:$0xff] %vm9243_vm15, %v7904_v47  ;;  %2530 = vrot.lane.b32.xlu0 %v6269_v55, %s6655_s21 }
 0x406   : > { %2112 = vst.msk [vmem:[#allocation3 + $0x20] sm:$0xff] %vm2109_vm2, %v7908_v37  ;;  %2455 = vrot.lane.b32.xlu1 %v6268_v14, %s9241_s27  ;;  %v6273_v37 = vld [vmem:[#allocation2 + $0xd1] ss:$8 sps:$4 sm:$0xff]  }
 0x407   : > { %1382 = vst.msk [vmem:[#allocation3 + $0x50] sm:$0xff] %vm1376_vm5, %v1363_v0  ;;  %v2019_v10 = vpop.permute.xlu0 %2018  ;;  %v6280_v0 = vld [vmem:[#allocation2 + $0xa0] ss:$8 sps:$4 sm:$0xff]   ;;  %vm2328_vm5 = vcmask 490944  }
 0x408   : > { %v1652_v49 = vpop.permute.xlu1 %1651 }
 0x409   : > { %1673 = vst.msk [vmem:[#allocation3 + $0x30] sm:$0xff] %vm1669_vm9, %v1652_v49  ;;  %2820 = vrot.lane.b32.xlu0 %v6271_v12, %s9380_s25  ;;  %v6283_v12 = vld [vmem:[#allocation2 + $0xb0] ss:$8 sps:$4 sm:$0xff]  }
 0x40a   : > { %2239 = vrot.lane.b32.xlu1 %v6270_v60, %s6651_s20  ;;  %v6282_v60 = vld [vmem:[#allocation2 + $0x6a] ss:$8 sps:$4 sm:$0xff]  }
 0x40b   : > { %v8025_v47 = vpop.permute.xlu0 %2306 }
 0x40c   : > { %v1942_v27 = vpop.permute.xlu1 %1941 }
 0x40d   : > { %1965 = vst.msk [vmem:[#allocation3 + $0x10] sm:$0xff] %vm1963_vm14, %v1942_v27  ;;  %2026 = vrot.lane.b32.xlu0 %v6273_v37, %s9229_s12  ;;  %v6284_v37 = vld [vmem:[#allocation2 + $0xc8] ss:$8 sps:$4 sm:$0xff]   ;;  %s9383_s12 = smov 96  }
 0x40e   : > { %2528 = vrot.lane.b32.xlu1 %v6272_v52, %s6655_s21  ;;  %v6286_v27 = vld [vmem:[#allocation2 + $0xa1] ss:$8 sps:$4 sm:$0xff]  }
 0x40f   : > { %v1514_v30 = vpop.permute.xlu0 %1513 }
 0x410   : > { %v1436_v23 = vpop.permute.xlu1 %1435  ;;  %1531 = vst.msk [vmem:[#allocation3 + $0x70] sm:$0xff] %vm1523_vm7, %v1514_v30  ;;  %v6288_v30 = vld [vmem:[#allocation2 + $0x70] ss:$8 sps:$4 sm:$0xff]  }
 0x411   : > { %1455 = vst.msk [vmem:[#allocation3 + $0x50] sm:$0xff] %vm1449_vm6, %v1436_v23  ;;  %2314 = vrot.lane.b32.xlu0 %v6275_v38, %s9248_s16  ;;  %vm2402_vm6 = vcmask 523744   ;;  %v6291_v38 = vld [vmem:[#allocation2 + $0xb1] ss:$8 sps:$4 sm:$0xff]  }
 0x412   : > { %2818 = vrot.lane.b32.xlu1 %v6274_v26, %s9380_s25  ;;  %v6290_v26 = vld [vmem:[#allocation2 + $0xc9] ss:$8 sps:$4 sm:$0xff]  }
 0x413   : > { %v1803_v2 = vpop.permute.xlu0 %1802 }
 0x414   : > { %v1726_v32 = vpop.permute.xlu1 %1725 }
 0x415   : > { %1747 = vst.msk [vmem:[#allocation3 + $0x30] sm:$0xff] %vm1743_vm10, %v1726_v32  ;;  %2604 = vrot.lane.b32.xlu0 %v6277_v3, %s9246_s30  ;;  %v6293_v3 = vld [vmem:[#allocation2 + $0xa2] ss:$8 sps:$4 sm:$0xff]  }
 0x416   : > { %2312 = vrot.lane.b32.xlu1 %v6276_v11, %s9248_s16  ;;  %v6292_v11 = vld [vmem:[#allocation2 + $0xa2] ss:$8 sps:$4 sm:$0xff]  }
 0x417   : > { %v2092_v6 = vpop.permute.xlu0 %2091 }
 0x418   : > { %v2015_v53 = vpop.permute.xlu1 %2014 }
 0x419   : > { %2038 = vst.msk [vmem:[#allocation3 + $0x10] sm:$0xff] %vm9243_vm15, %v2015_v53  ;;  %2893 = vrot.lane.b32.xlu0 %v6279_v7, %s9381_s22  ;;  %v6295_v7 = vld [vmem:[#allocation2 + $0x80] ss:$8 sps:$4 sm:$0xff]  }
 0x41a   : > { %2891 = vrot.lane.b32.xlu1 %v6278_v42, %s9381_s22  ;;  %v6294_v42 = vld [vmem:[#allocation2 + $0x98] ss:$8 sps:$4 sm:$0xff]  }
 0x41b   : > { %v2381_v34 = vpop.permute.xlu0 %2380 }
 0x41c   : > { %v1510_v55 = vpop.permute.xlu1 %1509 }
 0x41d   : > { %1529 = vst.msk [vmem:[#allocation3 + $0x50] sm:$0xff] %vm1523_vm7, %v1510_v55  ;;  %2099 = vrot.lane.b32.xlu0 %v6281_v51, %s6649_s18  ;;  %s9382_s18 = smov 92   ;;  %v3226_v51 = vld [vmem:[%s9168_s4 + $0x8] sm:$0xff] }
 0x41e   : > { %1602 = vst.msk [vmem:[#allocation3 + $0x50] sm:$0xff] %vm1596_vm8, %v7962_v44  ;;  %2386 = vrot.lane.b32.xlu1 %v6280_v0, %s6653_s26 }
 0x41f   : > { %1675 = vst.msk [vmem:[#allocation3 + $0x50] sm:$0xff] %vm1669_vm9, %v7985_v16  ;;  %v1587_v14 = vpop.permute.xlu0 %1586  ;;  %v6285_v16 = vld [vmem:[#allocation2 + $0xa1] ss:$8 sps:$4 sm:$0xff]  }
 0x420   : > { %1749 = vst.msk [vmem:[#allocation3 + $0x50] sm:$0xff] %vm1743_vm10, %v1730_v35  ;;  %v1799_v49 = vpop.permute.xlu1 %1798 }
 0x421   : > { %1604 = vst.msk [vmem:[#allocation3 + $0x70] sm:$0xff] %vm1596_vm8, %v1587_v14  ;;  %2388 = vrot.lane.b32.xlu0 %v6283_v12, %s6653_s26  ;;  %v6297_v14 = vld [vmem:[#allocation2 + $0xd9] ss:$8 sps:$4 sm:$0xff]  }
 0x422   : > { %1822 = vst.msk [vmem:[#allocation3 + $0x50] sm:$0xff] %vm1816_vm11, %v1803_v2  ;;  %1820 = vst.msk [vmem:[#allocation3 + $0x30] sm:$0xff] %vm1816_vm11, %v1799_v49  ;;  %2964 = vrot.lane.b32.xlu1 %v6282_v60, %s9382_s18  ;;  %v6296_v49 = vld [vmem:[#allocation2 + $0x71] ss:$8 sps:$4 sm:$0xff]  }
 0x423   : > { %1893 = vst.msk [vmem:[#allocation3 + $0x30] sm:$0xff] %vm1889_vm12, %v7968_v29  ;;  %v1876_v44 = vpop.permute.xlu0 %1875  ;;  %v3227_v60 = vld [vmem:[%s9168_s4 + $0x10] sm:$0xff] }
 0x424   : > { %1967 = vst.msk [vmem:[#allocation3 + $0x30] sm:$0xff] %vm1963_vm14, %v7991_v1  ;;  %v2088_v35 = vpop.permute.xlu1 %2087  ;;  %v6287_v1 = vld [vmem:[#allocation2 + $0x7a] ss:$8 sps:$4 sm:$0xff]  }
 0x425   : > { %2040 = vst.msk [vmem:[#allocation3 + $0x30] sm:$0xff] %vm9243_vm15, %v2019_v10  ;;  %2677 = vrot.lane.b32.xlu0 %v6285_v16, %s6640_s15 }
 0x426   : > { %1895 = vst.msk [vmem:[#allocation3 + $0x50] sm:$0xff] %vm1889_vm12, %v1876_v44  ;;  %2170 = vrot.lane.b32.xlu1 %v6284_v37, %s9233_s24  ;;  %v3228_v44 = vld [vmem:[%s9168_s4 + $0x18] sm:$0xff] }
 0x427   : > { %2113 = vst.msk [vmem:[#allocation3 + $0x30] sm:$0xff] %vm2109_vm2, %v2092_v6  ;;  %2111 = vst.msk [vmem:[#allocation3 + $0x10] sm:$0xff] %vm2109_vm2, %v2088_v35  ;;  %v2165_v29 = vpop.permute.xlu0 %2164  ;;  %v5984_v16 = vpack.c.bf16 %v3228_v44, %v3227_v60  ;;  %v6299_v37 = vld [vmem:[#allocation2 + $0xb2] ss:$8 sps:$4 sm:$0xff]   ;;  %v3237_v60 = vld [vmem:[%s9168_s4 + $0x60] sm:$0xff] }
 0x428   : > { %2184 = vst.msk [vmem:[#allocation3 + $0x10] sm:$0xff] %vm2182_vm3, %v7974_v24  ;;  %v1654_v10 = vpop.permute.xlu1 %1653  ;;  %2186 = vst.msk [vmem:[#allocation3 + $0x30] sm:$0xff] %vm2182_vm3, %v2165_v29  ;;  %v3238_v44 = vld [vmem:[%s9168_s4 + $0x68] sm:$0xf] }
 0x429   : > { %2257 = vst.msk [vmem:[#allocation3 + $0x10] sm:$0xff] %vm2255_vm4, %v7996_v9  ;;  %2966 = vrot.lane.b32.xlu0 %v6287_v1, %s9382_s18  ;;  %v6289_v9 = vld [vmem:[#allocation2 + $0xd8] ss:$8 sps:$4 sm:$0xff]   ;;  %v6298_v1 = vld [vmem:[#allocation2 + $0xca] ss:$8 sps:$4 sm:$0xff]  }
 0x42a   : > { %2330 = vst.msk [vmem:[#allocation3 + $0x10] sm:$0xff] %vm2328_vm5, %v8025_v47  ;;  %2459 = vrot.lane.b32.xlu1 %v6286_v27, %s9241_s27  ;;  %v3230_v27 = vld [vmem:[%s9168_s4 + $0x28] sm:$0xff] }
 0x42b   : > { %1674 = vst.msk [vmem:[#allocation3 + $0x40] sm:$0xff] %vm1669_vm9, %v1654_v10  ;;  %v2454_v24 = vpop.permute.xlu0 %2453  ;;  %v3229_v10 = vld [vmem:[%s9168_s4 + $0x20] sm:$0xff] }
 0x42c   : > { %2404 = vst.msk [vmem:[#allocation3 + $0x10] sm:$0xff] %vm2402_vm6, %v2381_v34  ;;  %v2232_v52 = vpop.permute.xlu1 %2231  ;;  %v3225_v34 = vld [vmem:[%s9168_s4] sm:$0xff] }
 0x42d   : > { %2477 = vst.msk [vmem:[#allocation3 + $0x10] sm:$0xff] %vm2475_vm13, %v2454_v24  ;;  %2172 = vrot.lane.b32.xlu0 %v6289_v9, %s9233_s24  ;;  %v5980_v55 = vpack.c.bf16 %v3226_v51, %v3225_v34  ;;  %v5988_v24 = vpack.c.bf16 %v3230_v27, %v3229_v10  ;;  %s9244_s24 = smov 104   ;;  %v6305_v34 = vld [vmem:[#allocation2 + $0xda] ss:$8 sps:$4 sm:$0xff]  }
 0x42e   : > { %2256 = vst.msk [vmem:[#allocation3] sm:$0xff] %vm2255_vm4, %v2232_v52  ;;  %3038 = vrot.lane.b32.xlu1 %v6288_v30, %s9383_s12  ;;  %v6301_v52 = vld [vmem:[#allocation2 + $0xa8] ss:$8 sps:$4 sm:$0xff]  }
 0x42f   : > { %v1660_v47 = vpop.permute.xlu0 %1659  ;;  %5981 = vmatprep.subr.bf16.mxu0 %v5980_v55  ;;  %v6311_v27 = vld [vmem:[#allocation2 + $0x82] ss:$8 sps:$4 sm:$0xff]  }
 0x430   : > { %v1728_v23 = vpop.permute.xlu1 %1727  ;;  %1677 = vst.msk [vmem:[#allocation3 + $0x70] sm:$0xff] %vm1669_vm9, %v1660_v47  ;;  %5983 = vmatpush3.bf16.msra.mxu0 %v5980_v55  ;;  %v6300_v47 = vld [vmem:[#allocation2 + $0x99] ss:$8 sps:$4 sm:$0xff]  }
 0x431   : > { %1748 = vst.msk [vmem:[#allocation3 + $0x40] sm:$0xff] %vm1743_vm10, %v1728_v23  ;;  %2461 = vrot.lane.b32.xlu0 %v6291_v38, %s9241_s27  ;;  %s9384_s27 = smov 100   ;;  %5985 = vmatprep.subr.bf16.mxu0 %v5984_v16  ;;  %v3231_v38 = vld [vmem:[%s9168_s4 + $0x30] sm:$0xff]  ;;  %v3232_v23 = vld [vmem:[%s9168_s4 + $0x38] sm:$0xff] }
 0x432   : > { %2243 = vrot.lane.b32.xlu1 %v6290_v26, %s6651_s20  ;;  %v5992_v26 = vpack.c.bf16 %v3232_v23, %v3231_v38  ;;  %v6304_v55 = vld [vmem:[#allocation2 + $0xd0] ss:$8 sps:$4 sm:$0xff]  }
 0x433   : > { %v1950_v2 = vpop.permute.xlu0 %1949  ;;  %v6312_v38 = vld [vmem:[#allocation2 + $0xaa] ss:$8 sps:$4 sm:$0xff]  }
 0x434   : > { %v2305_v32 = vpop.permute.xlu1 %2304  ;;  %1969 = vst.msk [vmem:[#allocation3 + $0x50] sm:$0xff] %vm1963_vm14, %v1950_v2  ;;  %5987 = vmatpush3.bf16.msra.mxu0 %v5984_v16  ;;  %v6004_v16 = vpack.c.bf16 %v3238_v44, %v3237_v60  ;;  %v6324_v60 = vld [vmem:[#allocation2 + $0xb1] ss:$8 sps:$4 sm:$0xff]  }
 0x435   : > { %2329 = vst.msk [vmem:[#allocation3] sm:$0xff] %vm2328_vm5, %v2305_v32  ;;  %2750 = vrot.lane.b32.xlu0 %v6293_v3, %s9378_s28  ;;  %5989 = vmatprep.subr.bf16.mxu0 %v5988_v24  ;;  %v6303_v3 = vld [vmem:[#allocation2 + $0x81] ss:$8 sps:$4 sm:$0xff]  }
 0x436   : > { %2532 = vrot.lane.b32.xlu1 %v6292_v11, %s6655_s21  ;;  %v6302_v11 = vld [vmem:[#allocation2 + $0x72] ss:$8 sps:$4 sm:$0xff]  }
 0x437   : > { %v2238_v6 = vpop.permute.xlu0 %2237  ;;  %v6327_v44 = vld [vmem:[#allocation2 + $0xca] ss:$8 sps:$4 sm:$0xff]  }
 0x438   : > { %v1512_v53 = vpop.permute.xlu1 %1511  ;;  %2259 = vst.msk [vmem:[#allocation3 + $0x30] sm:$0xff] %vm2255_vm4, %v2238_v6  ;;  %5991 = vmatpush3.bf16.msra.mxu0 %v5988_v24  ;;  %v3233_v6 = vld [vmem:[%s9168_s4 + $0x40] sm:$0xff] }
 0x439   : > { %1530 = vst.msk [vmem:[#allocation3 + $0x60] sm:$0xff] %vm1523_vm7, %v1512_v53  ;;  %3040 = vrot.lane.b32.xlu0 %v6295_v7, %s9383_s12  ;;  %5993 = vmatprep.subr.bf16.mxu0 %v5992_v26  ;;  %vm2622_vm7 = vcmask 622144   ;;  %v3234_v7 = vld [vmem:[%s9168_s4 + $0x48] sm:$0xff] }
 0x43a   : > { %2822 = vrot.lane.b32.xlu1 %v6294_v42, %s9380_s25  ;;  %v5996_v53 = vpack.c.bf16 %v3234_v7, %v3233_v6 }
 0x43b   : > { %v2527_v0 = vpop.permute.xlu0 %2526 }
 0x43c   : > { %v1801_v12 = vpop.permute.xlu1 %1800  ;;  %2550 = vst.msk [vmem:[#allocation3 + $0x10] sm:$0xff] %vm2548_vm1, %v2527_v0  ;;  %5995 = vmatpush3.bf16.msra.mxu0 %v5992_v26  ;;  %v6315_v26 = vld [vmem:[#allocation2 + $0xa0] ss:$8 sps:$4 sm:$0xff]  }
 0x43d   : > { %1821 = vst.msk [vmem:[#allocation3 + $0x40] sm:$0xff] %vm1816_vm11, %v1801_v12  ;;  %2245 = vrot.lane.b32.xlu0 %v6297_v14, %s6651_s20  ;;  %5997 = vmatprep.subr.bf16.mxu0 %v5996_v53  ;;  %v6307_v14 = vld [vmem:[#allocation2 + $0xd0] ss:$8 sps:$4 sm:$0xff]   ;;  %s9394_s20 = smov 48  }
 0x43e   : > { %3111 = vrot.lane.b32.xlu1 %v6296_v49, %s9384_s27  ;;  %v6306_v49 = vld [vmem:[#allocation2 + $0x9a] ss:$8 sps:$4 sm:$0xff]  }
 0x43f   : > { %v1734_v35 = vpop.permute.xlu0 %1733 }
 0x440   : > { %v2379_v29 = vpop.permute.xlu1 %2378  ;;  %1751 = vst.msk [vmem:[#allocation3 + $0x70] sm:$0xff] %vm1743_vm10, %v1734_v35  ;;  %5999 = vmatpush3.bf16.msra.mxu0 %v5996_v53  ;;  %v6318_v53 = vld [vmem:[#allocation2 + $0xb0] ss:$8 sps:$4 sm:$0xff]  }
 0x441   : > { %2403 = vst.msk [vmem:[#allocation3] sm:$0xff] %vm2402_vm6, %v2379_v29  ;;  %2534 = vrot.lane.b32.xlu0 %v6299_v37, %s6655_s21  ;;  %v6309_v37 = vld [vmem:[#allocation2 + $0xa9] ss:$8 sps:$4 sm:$0xff]  }
 0x442   : > { %2316 = vrot.lane.b32.xlu1 %v6298_v1, %s9248_s16  ;;  %v6308_v1 = vld [vmem:[#allocation2 + $0xe0] ss:$8 sps:$4 sm:$0xff]  }
 0x443   : > { %v2023_v9 = vpop.permute.xlu0 %2022 }
 0x444   : > { %v1585_v30 = vpop.permute.xlu1 %1584  ;;  %2042 = vst.msk [vmem:[#allocation3 + $0x50] sm:$0xff] %vm9243_vm15, %v2023_v9  ;;  %v6310_v9 = vld [vmem:[#allocation2 + $0xd1] ss:$8 sps:$4 sm:$0xff]  }
 0x445   : > { %1603 = vst.msk [vmem:[#allocation3 + $0x60] sm:$0xff] %vm1596_vm8, %v1585_v30  ;;  %2824 = vrot.lane.b32.xlu0 %v6301_v52, %s9380_s25  ;;  %vm6657_vm8 = vmmov 1   ;;  %v6313_v30 = vld [vmem:[#allocation2 + $0xd1] ss:$8 sps:$4 sm:$0xff]  }
 0x446   : > { %2895 = vrot.lane.b32.xlu1 %v6300_v47, %s9381_s22 }
 0x447   : > { %v2311_v2 = vpop.permute.xlu0 %2310 }
 0x448   : > { %v1874_v32 = vpop.permute.xlu1 %1873  ;;  %2332 = vst.msk [vmem:[#allocation3 + $0x30] sm:$0xff] %vm2328_vm5, %v2311_v2 }
 0x449   : > { %1894 = vst.msk [vmem:[#allocation3 + $0x40] sm:$0xff] %vm1889_vm12, %v1874_v32  ;;  %3113 = vrot.lane.b32.xlu0 %v6303_v3, %s9384_s27  ;;  %v6314_v3 = vld [vmem:[#allocation2 + $0xe1] ss:$8 sps:$4 sm:$0xff]   ;;  %v6317_v32 = vld [vmem:[#allocation2 + $0xd2] ss:$8 sps:$4 sm:$0xff]  }
 0x44a   : > { %1968 = vst.msk [vmem:[#allocation3 + $0x40] sm:$0xff] %vm1963_vm14, %v7913_v41  ;;  %3184 = vrot.lane.b32.xlu1 %v6302_v11, %s9244_s24  ;;  %v3235_v41 = vld [vmem:[%s9168_s4 + $0x50] sm:$0xff] }
 0x44b   : > { %2041 = vst.msk [vmem:[#allocation3 + $0x40] sm:$0xff] %vm9243_vm15, %v7918_v46  ;;  %v2601_v42 = vpop.permute.xlu0 %2600  ;;  %v3236_v46 = vld [vmem:[%s9168_s4 + $0x58] sm:$0xff]  ;;  %vm6005_vm15 = vmpackc.low %vm943_vm0, %vm6657_vm8  ;;  %vm2695_vm0 = vcmask 654944   ;;  %vm3208_vm8 = vcmask 884544  }
 0x44c   : > { %2114 = vst.msk [vmem:[#allocation3 + $0x40] sm:$0xff] %vm2109_vm2, %v7931_v59  ;;  %v2163_v51 = vpop.permute.xlu1 %2162  ;;  %v6000_v59 = vpack.c.bf16 %v3236_v46, %v3235_v41  ;;  %v6323_v46 = vld [vmem:[#allocation2 + $0xc9] ss:$8 sps:$4 sm:$0xff]  }
 0x44d   : > { %2624 = vst.msk [vmem:[#allocation3 + $0x10] sm:$0xff] %vm2622_vm7, %v2601_v42  ;;  %2318 = vrot.lane.b32.xlu0 %v6305_v34, %s9248_s16  ;;  %v6321_v34 = vld [vmem:[#allocation2 + $0xa1] ss:$8 sps:$4 sm:$0xff]  }
 0x44e   : > { %2185 = vst.msk [vmem:[#allocation3 + $0x20] sm:$0xff] %vm2182_vm3, %v2163_v51  ;;  %2390 = vrot.lane.b32.xlu1 %v6304_v55, %s6653_s26  ;;  %6001 = vmatprep.subr.bf16.mxu0 %v6000_v59  ;;  %v6320_v55 = vld [vmem:[#allocation2 + $0xe2] ss:$8 sps:$4 sm:$0xff]  }
 0x44f   : > { %v1807_v0 = vpop.permute.xlu0 %1806  ;;  %6003 = vmatpush3.bf16.msra.mxu0 %v6000_v59 }
 0x450   : > { %v2452_v12 = vpop.permute.xlu1 %2451  ;;  %1824 = vst.msk [vmem:[#allocation3 + $0x70] sm:$0xff] %vm1816_vm11, %v1807_v0  ;;  %6006 = vmatprep.subr.msk.bf16.mxu0 %vm6005_vm15, %v6004_v16  ;;  %v6322_v0 = vld [vmem:[#allocation2 + $0xd8] ss:$8 sps:$4 sm:$0xff]  }
 0x451   : > { %2476 = vst.msk [vmem:[#allocation3] sm:$0xff] %vm2475_vm13, %v2452_v12  ;;  %2608 = vrot.lane.b32.xlu0 %v6307_v14, %s9246_s30  ;;  %v6325_v12 = vld [vmem:[#allocation2 + $0xa2] ss:$8 sps:$4 sm:$0xff]  }
 0x452   : > { %2968 = vrot.lane.b32.xlu1 %v6306_v49, %s9382_s18 }
 0x453   : > { %v2096_v35 = vpop.permute.xlu0 %2095  ;;  %6009 = vmatpush3.bf16.msk.msra.mxu0 %vm6005_vm15, %v6004_v16  ;;  %vm2988_vm15 = vcmask 786144  }
 0x454   : > { %v1658_v29 = vpop.permute.xlu1 %1657  ;;  %2115 = vst.msk [vmem:[#allocation3 + $0x50] sm:$0xff] %vm2109_vm2, %v2096_v35  ;;  %5970 = vmatprep.subr.mxu0 %v9375_v5  ;;  %v6329_v35 = vld [vmem:[#allocation2 + $0xda] ss:$8 sps:$4 sm:$0xff]  }
 0x455   : > { %1676 = vst.msk [vmem:[#allocation3 + $0x60] sm:$0xff] %vm1669_vm9, %v1658_v29  ;;  %2897 = vrot.lane.b32.xlu0 %v6309_v37, %s9381_s22  ;;  %vm2768_vm9 = vcmask 687744   ;;  %v6328_v29 = vld [vmem:[#allocation2 + $0xb2] ss:$8 sps:$4 sm:$0xff]  }
 0x456   : > { %2392 = vrot.lane.b32.xlu1 %v6308_v1, %s6653_s26  ;;  %s9385_s26 = smov 64  }
 0x457   : > { %v2385_v10 = vpop.permute.xlu0 %2384 }
 0x458   : > { %v2236_v24 = vpop.permute.xlu1 %2235  ;;  %2406 = vst.msk [vmem:[#allocation3 + $0x30] sm:$0xff] %vm2402_vm6, %v2385_v10  ;;  %v6331_v10 = vld [vmem:[#allocation2 + $0xe0] ss:$8 sps:$4 sm:$0xff]  }
 0x459   : > { %2258 = vst.msk [vmem:[#allocation3 + $0x20] sm:$0xff] %vm2255_vm4, %v2236_v24  ;;  %3186 = vrot.lane.b32.xlu0 %v6311_v27, %s9244_s24  ;;  %v6330_v24 = vld [vmem:[#allocation2 + $0xd0] ss:$8 sps:$4 sm:$0xff]  }
 0x45a   : > { %2681 = vrot.lane.b32.xlu1 %v6310_v9, %s6640_s15  ;;  %s9399_s15 = smov 120  }
 0x45b   : > { %v2674_v52 = vpop.permute.xlu0 %2673 }
 0x45c   : > { %v2525_v47 = vpop.permute.xlu1 %2524  ;;  %2697 = vst.msk [vmem:[#allocation3 + $0x10] sm:$0xff] %vm2695_vm0, %v2674_v52  ;;  %v6333_v52 = vld [vmem:[#allocation2 + $0xe1] ss:$8 sps:$4 sm:$0xff]  }
 0x45d   : > { %2549 = vst.msk [vmem:[#allocation3] sm:$0xff] %vm2548_vm1, %v2525_v47  ;;  %2463 = vrot.lane.b32.xlu0 %v6313_v30, %s9385_s26  ;;  %v6332_v47 = vld [vmem:[#allocation2 + $0xd1] ss:$8 sps:$4 sm:$0xff]  }
 0x45e   : > { %2623 = vst.msk [vmem:[#allocation3] sm:$0xff] %vm2622_vm7, %v7925_v56  ;;  %2970 = vrot.lane.b32.xlu1 %v6312_v38, %s9382_s18  ;;  %v6335_v38 = vld [vmem:[#allocation2 + $0xe2] ss:$8 sps:$4 sm:$0xff]  }
 0x45f   : > { %2696 = vst.msk [vmem:[#allocation3] sm:$0xff] %vm2695_vm0, %v7935_v62  ;;  %v1880_v23 = vpop.permute.xlu0 %1879  ;;  %v6316_v62 = vld [vmem:[#allocation2 + $0xd2] ss:$8 sps:$4 sm:$0xff]  }
 0x460   : > { %v1732_v2 = vpop.permute.xlu1 %1731  ;;  %1897 = vst.msk [vmem:[#allocation3 + $0x70] sm:$0xff] %vm1889_vm12, %v1880_v23 }
 0x461   : > { %2769 = vst.msk [vmem:[#allocation3] sm:$0xff] %vm2768_vm9, %v7942_v33  ;;  %3042 = vrot.lane.b32.xlu0 %v6315_v26, %s9383_s12  ;;  %v6319_v33 = vld [vmem:[#allocation2 + $0xc8] ss:$8 sps:$4 sm:$0xff]  }
 0x462   : > { %1750 = vst.msk [vmem:[#allocation3 + $0x60] sm:$0xff] %vm1743_vm10, %v1732_v2  ;;  %2465 = vrot.lane.b32.xlu1 %v6314_v3, %s9385_s26  ;;  %vm9386_vm10 = vcmask 359744   ;;  %v6336_v26 = vld [vmem:[#allocation2 + $0x111] ss:$8 sps:$4 sm:$0xff]  }
 0x463   : > { %v2169_v56 = vpop.permute.xlu0 %2168 }
 0x464   : > { %v2309_v11 = vpop.permute.xlu1 %2308  ;;  %2188 = vst.msk [vmem:[#allocation3 + $0x50] sm:$0xff] %vm2182_vm3, %v2169_v56  ;;  %v6338_v56 = vld [vmem:[#allocation2 + $0x112] ss:$8 sps:$4 sm:$0xff]  }
 0x465   : > { %2331 = vst.msk [vmem:[#allocation3 + $0x20] sm:$0xff] %vm2328_vm5, %v2309_v11  ;;  %2536 = vrot.lane.b32.xlu0 %v6317_v32, %s6655_s21 }
 0x466   : > { %2754 = vrot.lane.b32.xlu1 %v6316_v62, %s9378_s28 }
 0x467   : > { %v2458_v6 = vpop.permute.xlu0 %2457 }
 0x468   : > { %v1805_v7 = vpop.permute.xlu1 %1804  ;;  %2479 = vst.msk [vmem:[#allocation3 + $0x30] sm:$0xff] %vm2475_vm13, %v2458_v6 }
 0x469   : > { %1823 = vst.msk [vmem:[#allocation3 + $0x60] sm:$0xff] %vm1816_vm11, %v1805_v7  ;;  %2826 = vrot.lane.b32.xlu0 %v6319_v33, %s9380_s25  ;;  %vm2842_vm11 = vcmask 720544  }
 0x46a   : > { %3044 = vrot.lane.b32.xlu1 %v6318_v53, %s9383_s12 }
 0x46b   : > { %v2747_v42 = vpop.permute.xlu0 %2746 }
 0x46c   : > { %v2383_v51 = vpop.permute.xlu1 %2382  ;;  %2770 = vst.msk [vmem:[#allocation3 + $0x10] sm:$0xff] %vm2768_vm9, %v2747_v42 }
 0x46d   : > { %2405 = vst.msk [vmem:[#allocation3 + $0x20] sm:$0xff] %vm2402_vm6, %v2383_v51  ;;  %3115 = vrot.lane.b32.xlu0 %v6321_v34, %s9384_s27 }
 0x46e   : > { %2538 = vrot.lane.b32.xlu1 %v6320_v55, %s6655_s21  ;;  %s9389_s21 = smov 8  }
 0x46f   : > { %v1954_v41 = vpop.permute.xlu0 %1953 }
 0x470   : > { %v1878_v59 = vpop.permute.xlu1 %1877  ;;  %1971 = vst.msk [vmem:[#allocation3 + $0x70] sm:$0xff] %vm1963_vm14, %v1954_v41 }
 0x471   : > { %1896 = vst.msk [vmem:[#allocation3 + $0x60] sm:$0xff] %vm1889_vm12, %v1878_v59  ;;  %2899 = vrot.lane.b32.xlu0 %v6323_v46, %s9381_s22  ;;  %vm9387_vm12 = vmmov %vm9386_vm10 }
 0x472   : > { %1970 = vst.msk [vmem:[#allocation3 + $0x60] sm:$0xff] %vm1963_vm14, %v7946_v8  ;;  %2828 = vrot.lane.b32.xlu1 %v6322_v0, %s9380_s25  ;;  %vm2915_vm14 = vcmask 753344   ;;  %s9390_s25 = smov 16  }
 0x473   : > { %2043 = vst.msk [vmem:[#allocation3 + $0x60] sm:$0xff] %vm9386_vm10, %v7953_v4  ;;  %v2242_v14 = vpop.permute.xlu0 %2241  ;;  %v6326_v4 = vld [vmem:[#allocation2 + $0xd9] ss:$8 sps:$4 sm:$0xff]   ;;  %vm4152_vm10 = vcmask 458112  }
 0x474   : > { %2116 = vst.msk [vmem:[#allocation3 + $0x60] sm:$0xff] %vm2109_vm2, %v7964_v58  ;;  %v2167_v49 = vpop.permute.xlu1 %2166 }
 0x475   : > { %2261 = vst.msk [vmem:[#allocation3 + $0x50] sm:$0xff] %vm2255_vm4, %v2242_v14  ;;  %3188 = vrot.lane.b32.xlu0 %v6325_v12, %s9244_s24 }
 0x476   : > { %2187 = vst.msk [vmem:[#allocation3 + $0x40] sm:$0xff] %vm2182_vm3, %v2167_v49  ;;  %3117 = vrot.lane.b32.xlu1 %v6324_v60, %s9384_s27 }
 0x477   : > { %v2531_v8 = vpop.permute.xlu0 %2530 }
 0x478   : > { %v2456_v16 = vpop.permute.xlu1 %2455  ;;  %2552 = vst.msk [vmem:[#allocation3 + $0x30] sm:$0xff] %vm2548_vm1, %v2531_v8 }
 0x479   : > { %2478 = vst.msk [vmem:[#allocation3 + $0x20] sm:$0xff] %vm2475_vm13, %v2456_v16  ;;  %2972 = vrot.lane.b32.xlu0 %v6327_v44, %s9382_s18 }
 0x47a   : > { %2901 = vrot.lane.b32.xlu1 %v6326_v4, %s9381_s22 }
 0x47b   : > { %v2821_v58 = vpop.permute.xlu0 %2820 }
 0x47c   : > { %v2240_v37 = vpop.permute.xlu1 %2239  ;;  %2844 = vst.msk [vmem:[#allocation3 + $0x10] sm:$0xff] %vm2842_vm11, %v2821_v58 }
 0x47d   : > { %2260 = vst.msk [vmem:[#allocation3 + $0x40] sm:$0xff] %vm2255_vm4, %v2240_v37  ;;  %2974 = vrot.lane.b32.xlu0 %v6329_v35, %s9382_s18  ;;  %s9391_s18 = smov 24  }
 0x47e   : > { %3190 = vrot.lane.b32.xlu1 %v6328_v29, %s9244_s24 }
 0x47f   : > { %v2027_v1 = vpop.permute.xlu0 %2026 }
 0x480   : > { %v2529_v27 = vpop.permute.xlu1 %2528  ;;  %2044 = vst.msk [vmem:[#allocation3 + $0x70] sm:$0xff] %vm9387_vm12, %v2027_v1  ;;  %vm4298_vm12 = vcmask 589312  }
 0x481   : > { %2551 = vst.msk [vmem:[#allocation3 + $0x20] sm:$0xff] %vm2548_vm1, %v2529_v27  ;;  %3048 = vrot.lane.b32.xlu0 %v6331_v10, %s9383_s12 }
 0x482   : > { %2625 = vst.msk [vmem:[#allocation3 + $0x20] sm:$0xff] %vm2622_vm7, %v7957_v54  ;;  %3046 = vrot.lane.b32.xlu1 %v6330_v24, %s9383_s12 }
 0x483   : > { %2698 = vst.msk [vmem:[#allocation3 + $0x20] sm:$0xff] %vm2695_vm0, %v7970_v17  ;;  %v2315_v9 = vpop.permute.xlu0 %2314  ;;  %v6334_v17 = vld [vmem:[#allocation2 + $0xd2] ss:$8 sps:$4 sm:$0xff]  }
 0x484   : > { %2771 = vst.msk [vmem:[#allocation3 + $0x20] sm:$0xff] %vm2768_vm9, %v7976_v39  ;;  %v2819_v30 = vpop.permute.xlu1 %2818  ;;  %v6337_v39 = vld [vmem:[#allocation2 + $0x102] ss:$8 sps:$4 sm:$0xff]  }
 0x485   : > { %2334 = vst.msk [vmem:[#allocation3 + $0x50] sm:$0xff] %vm2328_vm5, %v2315_v9  ;;  %3121 = vrot.lane.b32.xlu0 %v6333_v52, %s9384_s27 }
 0x486   : > { %2843 = vst.msk [vmem:[#allocation3] sm:$0xff] %vm2842_vm11, %v2819_v30  ;;  %3119 = vrot.lane.b32.xlu1 %v6332_v47, %s9384_s27 }
 0x487   : > { %v2605_v54 = vpop.permute.xlu0 %2604 }
 0x488   : > { %v2313_v23 = vpop.permute.xlu1 %2312  ;;  %2626 = vst.msk [vmem:[#allocation3 + $0x30] sm:$0xff] %vm2622_vm7, %v2605_v54 }
 0x489   : > { %2333 = vst.msk [vmem:[#allocation3 + $0x40] sm:$0xff] %vm2328_vm5, %v2313_v23  ;;  %3194 = vrot.lane.b32.xlu0 %v6335_v38, %s9244_s24 }
 0x48a   : > { %3192 = vrot.lane.b32.xlu1 %v6334_v17, %s9244_s24 }
 0x48b   : > { %v2894_v2 = vpop.permute.xlu0 %2893 }
 0x48c   : > { %v2892_v3 = vpop.permute.xlu1 %2891  ;;  %2917 = vst.msk [vmem:[#allocation3 + $0x10] sm:$0xff] %vm2915_vm14, %v2894_v2 }
 0x48d   : > { %2916 = vst.msk [vmem:[#allocation3] sm:$0xff] %vm2915_vm14, %v2892_v3  ;;  %3196 = vrot.lane.b32.xlu0 %v6337_v39, %s9244_s24 }
 0x48e   : > { %3125 = vrot.lane.b32.xlu1 %v6336_v26, %s9384_s27 }
 0x48f   : > { %v2100_v32 = vpop.permute.xlu0 %2099 }
 0x490   : > { %v2387_v11 = vpop.permute.xlu1 %2386  ;;  %2117 = vst.msk [vmem:[#allocation3 + $0x70] sm:$0xff] %vm2109_vm2, %v2100_v32  ;;  %vm3062_vm2 = vcmask 818944  }
 0x491   : > { %2407 = vst.msk [vmem:[#allocation3 + $0x40] sm:$0xff] %vm2402_vm6, %v2387_v11 }
 0x492   : > { %3198 = vrot.lane.b32.xlu1 %v6338_v56, %s9244_s24  ;;  %s9395_s24 = smov 104  }
 0x493   : > { %v2389_v62 = vpop.permute.xlu0 %2388 }
 0x494   : > { %v2965_v6 = vpop.permute.xlu1 %2964  ;;  %2408 = vst.msk [vmem:[#allocation3 + $0x50] sm:$0xff] %vm2402_vm6, %v2389_v62 }
 0x495   : > { %2989 = vst.msk [vmem:[#allocation3] sm:$0xff] %vm2988_vm15, %v2965_v6 }
 0x497   : > { %v2678_v33 = vpop.permute.xlu0 %2677 }
 0x498   : > { %v2171_v7 = vpop.permute.xlu1 %2170  ;;  %2699 = vst.msk [vmem:[#allocation3 + $0x30] sm:$0xff] %vm2695_vm0, %v2678_v33 }
 0x499   : > { %2189 = vst.msk [vmem:[#allocation3 + $0x60] sm:$0xff] %vm2182_vm3, %v2171_v7  ;;  %v3402_v7 = vld [vmem:[%s9169_s5] sm:$0xff] }
 0x49b   : > { %v2967_v53 = vpop.permute.xlu0 %2966 }
 0x49c   : > { %v2460_v42 = vpop.permute.xlu1 %2459  ;;  %2990 = vst.msk [vmem:[#allocation3 + $0x10] sm:$0xff] %vm2988_vm15, %v2967_v53 }
 0x49d   : > { %2480 = vst.msk [vmem:[#allocation3 + $0x40] sm:$0xff] %vm2475_vm13, %v2460_v42 }
 0x49f   : > { %v2173_v34 = vpop.permute.xlu0 %2172 }
 0x4a0   : > { %v3039_v51 = vpop.permute.xlu1 %3038  ;;  %2190 = vst.msk [vmem:[#allocation3 + $0x70] sm:$0xff] %vm2182_vm3, %v2173_v34  ;;  %vm3135_vm3 = vcmask 851744  }
 0x4a1   : > { %3063 = vst.msk [vmem:[#allocation3] sm:$0xff] %vm3062_vm2, %v3039_v51 }
 0x4a3   : > { %v2462_v55 = vpop.permute.xlu0 %2461 }
 0x4a4   : > { %v2244_v41 = vpop.permute.xlu1 %2243  ;;  %2481 = vst.msk [vmem:[#allocation3 + $0x50] sm:$0xff] %vm2475_vm13, %v2462_v55 }
 0x4a5   : > { %2262 = vst.msk [vmem:[#allocation3 + $0x60] sm:$0xff] %vm2255_vm4, %v2244_v41 }
 0x4a7   : > { %v2751_v46 = vpop.permute.xlu0 %2750 }
 0x4a8   : > { %v2533_v59 = vpop.permute.xlu1 %2532  ;;  %2772 = vst.msk [vmem:[#allocation3 + $0x30] sm:$0xff] %vm2768_vm9, %v2751_v46 }
 0x4a9   : > { %2553 = vst.msk [vmem:[#allocation3 + $0x40] sm:$0xff] %vm2548_vm1, %v2533_v59 }
 0x4aa   : > { %2627 = vst.msk [vmem:[#allocation3 + $0x40] sm:$0xff] %vm2622_vm7, %v7980_v28 }
 0x4ab   : > { %2700 = vst.msk [vmem:[#allocation3 + $0x40] sm:$0xff] %vm2695_vm0, %v7987_v36  ;;  %v3041_v0 = vpop.permute.xlu0 %3040 }
 0x4ac   : > { %2773 = vst.msk [vmem:[#allocation3 + $0x40] sm:$0xff] %vm2768_vm9, %v7902_v25  ;;  %v2823_v14 = vpop.permute.xlu1 %2822 }
 0x4ad   : > { %3064 = vst.msk [vmem:[#allocation3 + $0x10] sm:$0xff] %vm3062_vm2, %v3041_v0 }
 0x4ae   : > { %2845 = vst.msk [vmem:[#allocation3 + $0x20] sm:$0xff] %vm2842_vm11, %v2823_v14 }
 0x4af   : > { %v2246_v12 = vpop.permute.xlu0 %2245 }
 0x4b0   : > { %v3112_v49 = vpop.permute.xlu1 %3111  ;;  %2263 = vst.msk [vmem:[#allocation3 + $0x70] sm:$0xff] %vm2255_vm4, %v2246_v12  ;;  %vm3239_vm4 = vcmask 883712  }
 0x4b1   : > { %3136 = vst.msk [vmem:[#allocation3] sm:$0xff] %vm3135_vm3, %v3112_v49 }
 0x4b3   : > { %v2535_v28 = vpop.permute.xlu0 %2534 }
 0x4b4   : > { %v2317_v60 = vpop.permute.xlu1 %2316  ;;  %2554 = vst.msk [vmem:[#allocation3 + $0x50] sm:$0xff] %vm2548_vm1, %v2535_v28 }
 0x4b5   : > { %2335 = vst.msk [vmem:[#allocation3 + $0x60] sm:$0xff] %vm2328_vm5, %v2317_v60 }
 0x4b7   : > { %v2825_v36 = vpop.permute.xlu0 %2824 }
 0x4b8   : > { %v2896_v25 = vpop.permute.xlu1 %2895  ;;  %2846 = vst.msk [vmem:[#allocation3 + $0x30] sm:$0xff] %vm2842_vm11, %v2825_v36 }
 0x4b9   : > { %2918 = vst.msk [vmem:[#allocation3 + $0x20] sm:$0xff] %vm2915_vm14, %v2896_v25 }
 0x4bb   : > { %v3114_v8 = vpop.permute.xlu0 %3113 }
 0x4bc   : > { %v3185_v44 = vpop.permute.xlu1 %3184  ;;  %3137 = vst.msk [vmem:[#allocation3 + $0x10] sm:$0xff] %vm3135_vm3, %v3114_v8 }
 0x4bd   : > { %3209 = vst.msk [vmem:[#allocation3] sm:$0xff] %vm3208_vm8, %v3185_v44 }
 0x4bf   : > { %v2319_v16 = vpop.permute.xlu0 %2318 }
 0x4c0   : > { %v2391_v4 = vpop.permute.xlu1 %2390  ;;  %2336 = vst.msk [vmem:[#allocation3 + $0x70] sm:$0xff] %vm2328_vm5, %v2319_v16  ;;  %vm3380_vm5 = vcmask 64512  }
 0x4c1   : > { %2409 = vst.msk [vmem:[#allocation3 + $0x60] sm:$0xff] %vm2402_vm6, %v2391_v4 }
 0x4c3   : > { %v2609_v58 = vpop.permute.xlu0 %2608 }
 0x4c4   : > { %v2969_v35 = vpop.permute.xlu1 %2968  ;;  %2628 = vst.msk [vmem:[#allocation3 + $0x50] sm:$0xff] %vm2622_vm7, %v2609_v58  ;;  %v3217_v37 = vld [vmem:[#allocation3] sm:$0xff] }
 0x4c5   : > { %2991 = vst.msk [vmem:[#allocation3 + $0x20] sm:$0xff] %vm2988_vm15, %v2969_v35  ;;  %5958 = vmatprep.mubr.msk.f32.mxu0 %vm3239_vm4, %v3217_v37 }
 0x4c7   : > { %v2898_v29 = vpop.permute.xlu0 %2897 }
 0x4c8   : > { %v2393_v1 = vpop.permute.xlu1 %2392  ;;  %2919 = vst.msk [vmem:[#allocation3 + $0x30] sm:$0xff] %vm2915_vm14, %v2898_v29 }
 0x4c9   : > { %2410 = vst.msk [vmem:[#allocation3 + $0x70] sm:$0xff] %vm2402_vm6, %v2393_v1  ;;  %vm3787_vm6 = vcmask 130112  }
 0x4cb   : > { %v3187_v10 = vpop.permute.xlu0 %3186 }
 0x4cc   : > { %v2682_v27 = vpop.permute.xlu1 %2681  ;;  %3210 = vst.msk [vmem:[#allocation3 + $0x10] sm:$0xff] %vm3208_vm8, %v3187_v10 }
 0x4cd   : > { %2701 = vst.msk [vmem:[#allocation3 + $0x50] sm:$0xff] %vm2695_vm0, %v2682_v27 }
 0x4cf   : > { %v2464_v24 = vpop.permute.xlu0 %2463 }
 0x4d0   : > { %v2971_v9 = vpop.permute.xlu1 %2970  ;;  %2482 = vst.msk [vmem:[#allocation3 + $0x60] sm:$0xff] %vm2475_vm13, %v2464_v24 }
 0x4d1   : > { %2992 = vst.msk [vmem:[#allocation3 + $0x30] sm:$0xff] %vm2988_vm15, %v2971_v9 }
 0x4d3   : > { %v3043_v52 = vpop.permute.xlu0 %3042  ;;  %v3218_v30 = vld [vmem:[#allocation3 + $0x10] sm:$0xff] }
 0x4d4   : > { %v2466_v47 = vpop.permute.xlu1 %2465  ;;  %3065 = vst.msk [vmem:[#allocation3 + $0x20] sm:$0xff] %vm3062_vm2, %v3043_v52  ;;  %5959 = vmatmul.mubr.msk.f32.vlgmr.msra.gmra.mrb[4].mxu0 %vm3239_vm4, %v3218_v30 }
 0x4d5   : > { %2483 = vst.msk [vmem:[#allocation3 + $0x70] sm:$0xff] %vm2475_vm13, %v2466_v47  ;;  %5971 = vmatpush3.msra.mxu0 %v3402_v7  ;;  %vm3860_vm13 = vcmask 195712  }
 0x4d6   : > { %5975 = vmatprep.subr.mxu0 %v9375_v5 }
 0x4d7   : > { %v2537_v54 = vpop.permute.xlu0 %2536 }
 0x4d8   : > { %v2755_v38 = vpop.permute.xlu1 %2754  ;;  %2555 = vst.msk [vmem:[#allocation3 + $0x60] sm:$0xff] %vm2548_vm1, %v2537_v54 }
 0x4d9   : > { %2774 = vst.msk [vmem:[#allocation3 + $0x50] sm:$0xff] %vm2768_vm9, %v2755_v38 }
 0x4da   : > { %2629 = vst.msk [vmem:[#allocation3 + $0x60] sm:$0xff] %vm2622_vm7, %v7825_v20 }
 0x4db   : > { %2702 = vst.msk [vmem:[#allocation3 + $0x60] sm:$0xff] %vm2695_vm0, %v7830_v45  ;;  %v2827_v23 = vpop.permute.xlu0 %2826 }
 0x4dc   : > { %2775 = vst.msk [vmem:[#allocation3 + $0x60] sm:$0xff] %vm2768_vm9, %v7839_v15  ;;  %v3045_v17 = vpop.permute.xlu1 %3044 }
 0x4dd   : > { %2849 = vst.msk [vmem:[#allocation3 + $0x60] sm:$0xff] %vm2842_vm11, %v7847_v31  ;;  %2847 = vst.msk [vmem:[#allocation3 + $0x40] sm:$0xff] %vm2842_vm11, %v2827_v23 }
 0x4de   : > { %2922 = vst.msk [vmem:[#allocation3 + $0x60] sm:$0xff] %vm2915_vm14, %v7854_v50 }
 0x4df   : > { %3066 = vst.msk [vmem:[#allocation3 + $0x30] sm:$0xff] %vm3062_vm2, %v3045_v17  ;;  %v3116_v20 = vpop.permute.xlu0 %3115 }
 0x4e0   : > { %2995 = vst.msk [vmem:[#allocation3 + $0x60] sm:$0xff] %vm2988_vm15, %v7862_v63  ;;  %v2539_v45 = vpop.permute.xlu1 %2538 }
 0x4e1   : > { %3069 = vst.msk [vmem:[#allocation3 + $0x60] sm:$0xff] %vm3062_vm2, %v7867_v48 }
 0x4e2   : > { %3142 = vst.msk [vmem:[#allocation3 + $0x60] sm:$0xff] %vm3135_vm3, %v7874_v43  ;;  %3138 = vst.msk [vmem:[#allocation3 + $0x20] sm:$0xff] %vm3135_vm3, %v3116_v20 }
 0x4e3   : > { %2556 = vst.msk [vmem:[#allocation3 + $0x70] sm:$0xff] %vm2548_vm1, %v2539_v45  ;;  %v2900_v15 = vpop.permute.xlu0 %2899  ;;  %vm9388_vm1 = vmmov 0   ;;  %v6339_v45 = vld [vmem:[#allocation2 + $0x1] ss:$8 sps:$4 sm:$0xff]  }
 0x4e4   : > { %2630 = vst.msk [vmem:[#allocation3 + $0x70] sm:$0xff] %vm2622_vm7, %v7833_v13  ;;  %v2829_v31 = vpop.permute.xlu1 %2828  ;;  %3763 = vrot.lane.b32.xlu0 %v6339_v45, %s9389_s21  ;;  %v6360_v45 = vld [vmem:[#allocation2 + $0xf8] ss:$8 sps:$4 sm:$0xff]   ;;  %vm3933_vm7 = vcmask 261312  }
 0x4e5   : > { %2703 = vst.msk [vmem:[#allocation3 + $0x70] sm:$0xff] %vm2695_vm0, %v7837_v57  ;;  %vm4006_vm0 = vcmask 326912  }
 0x4e6   : > { %2776 = vst.msk [vmem:[#allocation3 + $0x70] sm:$0xff] %vm2768_vm9, %v7844_v18  ;;  %vm4079_vm9 = vcmask 392512  }
 0x4e7   : > { %2920 = vst.msk [vmem:[#allocation3 + $0x40] sm:$0xff] %vm2915_vm14, %v2900_v15  ;;  %v3189_v13 = vpop.permute.xlu0 %3188  ;;  %v6340_v15 = vld [vmem:[#allocation2 + $0x2] ss:$8 sps:$4 sm:$0xff]  }
 0x4e8   : > { %2850 = vst.msk [vmem:[#allocation3 + $0x70] sm:$0xff] %vm2842_vm11, %v7852_v40  ;;  %2848 = vst.msk [vmem:[#allocation3 + $0x50] sm:$0xff] %vm2842_vm11, %v2829_v31  ;;  %v3118_v57 = vpop.permute.xlu1 %3117  ;;  %v6346_v31 = vld [vmem:[#allocation2 + $0x11] ss:$8 sps:$4 sm:$0xff]   ;;  %3836 = vrot.lane.b32.xlu0 %v6340_v15, %s9390_s25  ;;  %v6361_v15 = vld [vmem:[#allocation2 + $0x102] ss:$8 sps:$4 sm:$0xff]  }
 0x4e9   : > { %2923 = vst.msk [vmem:[#allocation3 + $0x70] sm:$0xff] %vm2915_vm14, %v7859_v19  ;;  %3765 = vrot.lane.b32.xlu1 %v6346_v31, %s9389_s21  ;;  %v6362_v31 = vld [vmem:[#allocation2 + $0xf9] ss:$8 sps:$4 sm:$0xff]   ;;  %vm4225_vm11 = vcmask 523712  }
 0x4ea   : > { %2996 = vst.msk [vmem:[#allocation3 + $0x70] sm:$0xff] %vm2988_vm15, %v7869_v22 }
 0x4eb   : > { %3070 = vst.msk [vmem:[#allocation3 + $0x70] sm:$0xff] %vm3062_vm2, %v7877_v61  ;;  %v2973_v18 = vpop.permute.xlu0 %2972 }
 0x4ec   : > { %3211 = vst.msk [vmem:[#allocation3 + $0x20] sm:$0xff] %vm3208_vm8, %v3189_v13  ;;  %v2902_v50 = vpop.permute.xlu1 %2901  ;;  %v6348_v13 = vld [vmem:[#allocation2 + $0x12] ss:$8 sps:$4 sm:$0xff]  }
 0x4ed   : > { %3139 = vst.msk [vmem:[#allocation3 + $0x30] sm:$0xff] %vm3135_vm3, %v3118_v57  ;;  %v6341_v57 = vld [vmem:[#allocation2 + $0x8] ss:$8 sps:$4 sm:$0xff]   ;;  %3838 = vrot.lane.b32.xlu1 %v6348_v13, %s9390_s25 }
 0x4ee   : > { %2993 = vst.msk [vmem:[#allocation3 + $0x40] sm:$0xff] %vm2988_vm15, %v2973_v18  ;;  %v6350_v18 = vld [vmem:[#allocation2 + $0x18] ss:$8 sps:$4 sm:$0xff]   ;;  %3909 = vrot.lane.b32.xlu0 %v6341_v57, %s9391_s18  ;;  %v6363_v13 = vld [vmem:[#allocation2 + $0x108] ss:$8 sps:$4 sm:$0xff]  }
 0x4ef   : > { %2921 = vst.msk [vmem:[#allocation3 + $0x50] sm:$0xff] %vm2915_vm14, %v2902_v50  ;;  %v2975_v40 = vpop.permute.xlu0 %2974  ;;  %v6342_v50 = vld [vmem:[#allocation2 + $0x9] ss:$8 sps:$4 sm:$0xff]   ;;  %v6364_v57 = vld [vmem:[#allocation2 + $0xfa] ss:$8 sps:$4 sm:$0xff]   ;;  %vm3650_vm14 = vcmask 60416  }
 0x4f0   : > { %v3191_v63 = vpop.permute.xlu1 %3190  ;;  %2994 = vst.msk [vmem:[#allocation3 + $0x50] sm:$0xff] %vm2988_vm15, %v2975_v40  ;;  %v6352_v40 = vld [vmem:[#allocation2 + $0x19] ss:$8 sps:$4 sm:$0xff]   ;;  %vm4371_vm15 = vcmask 654912  }
 0x4f1   : > { %3212 = vst.msk [vmem:[#allocation3 + $0x30] sm:$0xff] %vm3208_vm8, %v3191_v63  ;;  %3911 = vrot.lane.b32.xlu1 %v6350_v18, %s9391_s18  ;;  %v6354_v63 = vld [vmem:[#allocation2 + $0x1a] ss:$8 sps:$4 sm:$0xff]   ;;  %v6365_v18 = vld [vmem:[#allocation2 + $0x109] ss:$8 sps:$4 sm:$0xff]  }
 0x4f2   : > { %3982 = vrot.lane.b32.xlu0 %v6342_v50, %s9392_s19  ;;  %v6366_v50 = vld [vmem:[#allocation2 + $0x100] ss:$8 sps:$4 sm:$0xff]  }
 0x4f3   : > { %v3219_v19 = vld [vmem:[#allocation3 + $0x20] sm:$0xff]  ;;  %v3049_v48 = vpop.permute.xlu0 %3048 }
 0x4f4   : > { %5961 = vmatprep.mubr.msk.f32.mxu0 %vm3239_vm4, %v3219_v19  ;;  %v3047_v22 = vpop.permute.xlu1 %3046  ;;  %3068 = vst.msk [vmem:[#allocation3 + $0x50] sm:$0xff] %vm3062_vm2, %v3049_v48  ;;  %v6343_v19 = vld [vmem:[#allocation2 + $0xa] ss:$8 sps:$4 sm:$0xff]  }
 0x4f5   : > { %3067 = vst.msk [vmem:[#allocation3 + $0x40] sm:$0xff] %vm3062_vm2, %v3047_v22  ;;  %3984 = vrot.lane.b32.xlu1 %v6352_v40, %s9392_s19  ;;  %v6344_v48 = vld [vmem:[#allocation2 + $0x10] ss:$8 sps:$4 sm:$0xff]   ;;  %v6345_v22 = vld [vmem:[#allocation2 + $0x20] ss:$8 sps:$4 sm:$0xff]   ;;  %vm4444_vm2 = vcmask 720512  }
 0x4f6   : > { %4055 = vrot.lane.b32.xlu0 %v6343_v19, %s9393_s23  ;;  %v6367_v40 = vld [vmem:[#allocation2 + $0x10a] ss:$8 sps:$4 sm:$0xff]  }
 0x4f7   : > { %v3122_v43 = vpop.permute.xlu0 %3121  ;;  %v6368_v19 = vld [vmem:[#allocation2 + $0x101] ss:$8 sps:$4 sm:$0xff]  }
 0x4f8   : > { %v3120_v61 = vpop.permute.xlu1 %3119  ;;  %3141 = vst.msk [vmem:[#allocation3 + $0x50] sm:$0xff] %vm3135_vm3, %v3122_v43  ;;  %v3220_v39 = vld [vmem:[#allocation3 + $0x30] sm:$0xff]  ;;  %v6347_v43 = vld [vmem:[#allocation2 + $0x21] ss:$8 sps:$4 sm:$0xff]  }
 0x4f9   : > { %3140 = vst.msk [vmem:[#allocation3 + $0x40] sm:$0xff] %vm3135_vm3, %v3120_v61  ;;  %5962 = vmatmul.mubr.msk.f32.gmra.mrb[6].mxu0 %vm3239_vm4, %v3220_v39  ;;  %4057 = vrot.lane.b32.xlu1 %v6354_v63, %s9393_s23  ;;  %v6349_v61 = vld [vmem:[#allocation2 + $0x22] ss:$8 sps:$4 sm:$0xff]   ;;  %v6351_v39 = vld [vmem:[#allocation2 + $0xf0] ss:$8 sps:$4 sm:$0xff]  }
 0x4fa   : > { %4128 = vrot.lane.b32.xlu0 %v6344_v48, %s9394_s20  ;;  %v6369_v63 = vld [vmem:[#allocation2 + $0x110] ss:$8 sps:$4 sm:$0xff]   ;;  %v6370_v48 = vld [vmem:[#allocation2 + $0x102] ss:$8 sps:$4 sm:$0xff]  }
 0x4fb   : > { %v3195_v26 = vpop.permute.xlu0 %3194 }
 0x4fc   : > { %v3193_v2 = vpop.permute.xlu1 %3192  ;;  %3214 = vst.msk [vmem:[#allocation3 + $0x50] sm:$0xff] %vm3208_vm8, %v3195_v26  ;;  %v6353_v26 = vld [vmem:[#allocation2 + $0xf1] ss:$8 sps:$4 sm:$0xff]  }
 0x4fd   : > { %3213 = vst.msk [vmem:[#allocation3 + $0x40] sm:$0xff] %vm3208_vm8, %v3193_v2  ;;  %v6355_v2 = vld [vmem:[#allocation2 + $0xf2] ss:$8 sps:$4 sm:$0xff]  }
 0x4fe   : > { %4130 = vrot.lane.b32.xlu0 %v6345_v22, %s9394_s20  ;;  %v6371_v22 = vld [vmem:[#allocation2 + $0x111] ss:$8 sps:$4 sm:$0xff]  }
 0x4ff   : > { %v3197_v3 = vpop.permute.xlu0 %3196 }
 0x500   : > { %v3126_v56 = vpop.permute.xlu1 %3125  ;;  %3215 = vst.msk [vmem:[#allocation3 + $0x60] sm:$0xff] %vm3208_vm8, %v3197_v3 }
 0x501   : > { %3143 = vst.msk [vmem:[#allocation3 + $0x70] sm:$0xff] %vm3135_vm3, %v3126_v56  ;;  %vm4517_vm3 = vcmask 786112  }
 0x502   : > { %4203 = vrot.lane.b32.xlu0 %v6347_v43, %s9248_s16  ;;  %v6390_v43 = vld [vmem:[#allocation2] ss:$8 sps:$4 sm:$0xff]  }
 0x503   : > { %v3222_v32 = vld [vmem:[#allocation3 + $0x50] sm:$0xff]  ;;  %3715 = vst.msk [vmem:[#allocation3] sm:$0xff] %vm3380_vm5, %v6390_v43 }
 0x504   : > { %v3199_v11 = vpop.permute.xlu1 %3198  ;;  %v3221_v62 = vld [vmem:[#allocation3 + $0x40] sm:$0xff] }
 0x505   : > { %3216 = vst.msk [vmem:[#allocation3 + $0x70] sm:$0xff] %vm3208_vm8, %v3199_v11  ;;  %5964 = vmatprep.mubr.msk.f32.mxu0 %vm3239_vm4, %v3221_v62  ;;  %vm4590_vm8 = vcmask 851712  }
 0x506   : > { %5965 = vmatmul.mubr.msk.f32.gmra.mrb[8].mxu0 %vm3239_vm4, %v3222_v32  ;;  %4276 = vrot.lane.b32.xlu0 %v6349_v61, %s9385_s26 }
 0x507   : > { %v3223_v6 = vld [vmem:[#allocation3 + $0x60] sm:$0xff] }
 0x508   : > { %5967 = vmatprep.mubr.msk.f32.mxu0 %vm3239_vm4, %v3223_v6 }
 0x50a   : > { %4998 = vrot.lane.b32.xlu0 %v6351_v39, %s9390_s25 }
 0x50c   : > { %v3224_v33 = vld [vmem:[#allocation3 + $0x70] sm:$0xff] }
 0x50d   : > { %5968 = vmatmul.mubr.msk.f32.gmra.mrb[10].mxu0 %vm3239_vm4, %v3224_v33  ;;  %vm4663_vm4 = vcmask 917312  }
 0x50e   : > { %5972 = vmatprep.mubr.msk.f32.mxu0 %vm9388_vm1, %v9375_v5  ;;  %5070 = vrot.lane.b32.xlu0 %v6353_v26, %s9391_s18 }
 0x512   : > { %5142 = vrot.lane.b32.xlu0 %v6355_v2, %s9392_s19 }
 0x556   : > { %v3764_v61 = vpop.permute.xlu0 %3763 }
 0x557   : > { %3788 = vst.msk [vmem:[#allocation3] sm:$0xff] %vm3787_vm6, %v3764_v61 }
 0x55a   : > { %v3837_v39 = vpop.permute.xlu0 %3836 }
 0x55b   : > { %3861 = vst.msk [vmem:[#allocation3] sm:$0xff] %vm3860_vm13, %v3837_v39 }
 0x560   : > { %v3910_v26 = vpop.permute.xlu0 %3909 }
 0x561   : > { %3934 = vst.msk [vmem:[#allocation3] sm:$0xff] %vm3933_vm7, %v3910_v26 }
 0x564   : > { %v3983_v2 = vpop.permute.xlu0 %3982 }
 0x565   : > { %4007 = vst.msk [vmem:[#allocation3] sm:$0xff] %vm4006_vm0, %v3983_v2 }
 0x5a7   : > { %v8352_v53 = vpop.f32.mrb[4].mxu0 }
 0x5a8   : > { %v8354_v42 = vpop.f32.mrb[5].mxu0  ;;  %v3373_v55 = vmax.f32 %v8352_v53, 0.0 }
 0x5a9   : > { %v3372_v41 = vmax.f32 %v8354_v42, 0.0 }
 0x5aa   : > { %v3382_v59 = vsel %vm3380_vm5, %v3373_v55, 0.0 }
 0x5ab   : > { %v3381_v0 = vsel %vm3380_vm5, %v3372_v41, 0.0 }
 0x5ac   : > { %v3383_v12 = vadd.f32 %v3382_v59, %v3381_v0 }
 0x5cc   : > { %v8356_v34 = vpop.f32.mrb[6].mxu0 }
 0x5cd   : > { %v8358_v51 = vpop.f32.mrb[7].mxu0  ;;  %v3375_v49 = vmax.f32 %v8356_v34, 0.0 }
 0x5ce   : > { %v3374_v46 = vmax.f32 %v8358_v51, 0.0 }
 0x5cf   : > { %v3386_v8 = vsel %vm3380_vm5, %v3375_v49, 0.0 }
 0x5d0   : > { %v3384_v14 = vsel %vm3380_vm5, %v3374_v46, 0.0 }
 0x5d1   : > { %v3385_v28 = vadd.f32 %v3384_v14, %v3383_v12 }
 0x5d3   : > { %v3387_v44 = vadd.f32 %v3386_v8, %v3385_v28 }
 0x5d9   : > { %v8373_v60 = vpop.f32.mrb[8].mxu0 }
 0x5da   : > { %v8375_v36 = vpop.f32.mrb[9].mxu0  ;;  %v3377_v4 = vmax.f32 %v8373_v60, 0.0 }
 0x5db   : > { %v3376_v25 = vmax.f32 %v8375_v36, 0.0 }
 0x5dc   : > { %v3390_v29 = vsel %vm3380_vm5, %v3377_v4, 0.0 }
 0x5dd   : > { %v3388_v16 = vsel %vm3380_vm5, %v3376_v25, 0.0 }
 0x5de   : > { %v3389_v58 = vadd.f32 %v3388_v16, %v3387_v44 }
 0x5e0   : > { %v8385_v35 = vpop.f32.mrb[10].mxu0  ;;  %v3391_v27 = vadd.f32 %v3390_v29, %v3389_v58 }
 0x5e1   : > { %v8387_v37 = vpop.f32.mrb[11].mxu0  ;;  %v3379_v1 = vmax.f32 %v8385_v35, 0.0 }
 0x5e2   : > { %v3378_v10 = vmax.f32 %v8387_v37, 0.0 }
 0x5e3   : > { %v3394_v52 = vsel %vm3380_vm5, %v3379_v1, 0.0 }
 0x5e4   : > { %v3392_v24 = vsel %vm3380_vm5, %v3378_v10, 0.0 }
 0x5e5   : > { %v3393_v9 = vadd.f32 %v3392_v24, %v3391_v27 }
 0x5e7   : > { %v3395_v30 = vadd.f32 %v3394_v52, %v3393_v9 }
 0x5e9   : > { %v3396_v47 = vrot.slane %v3395_v30, 4 }
 0x5eb   : > { %v3397_v54 = vadd.f32 %v3396_v47, %v3395_v30 }
 0x5ed   : > { %v3398_v38 = vrot.slane %v3397_v54, 2 }
 0x5ef   : > { %v3399_v23 = vadd.f32 %v3398_v38, %v3397_v54  ;;  %v6356_v38 = vld [vmem:[#allocation2 + $0x11] ss:$8 sps:$4 sm:$0xff]  }
 0x5f0   : > { %4201 = vrot.lane.b32.xlu1 %v6356_v38, %s9248_s16 }
 0x5f1   : > { %v3400_v17 = vrot.slane %v3399_v23, 1 }
 0x5f3   : > { %v3401_v20 = vadd.f32 %v3400_v17, %v3399_v23  ;;  %v6357_v23 = vld [vmem:[#allocation2 + $0x100] ss:$8 sps:$4 sm:$0xff]   ;;  %v6358_v17 = vld [vmem:[#allocation2 + $0x12] ss:$8 sps:$4 sm:$0xff]  }
 0x5f4   : > { %5000 = vrot.lane.b32.xlu0 %v6357_v23, %s9390_s25  ;;  %4274 = vrot.lane.b32.xlu1 %v6358_v17, %s9385_s26 }
 0x5f5   : > { %5973 = vmatmul.mubr.msk.f32.vlgmr.msra.gmra.mrb[12].mxu0 %vm3380_vm5, %v3401_v20  ;;  %v6359_v20 = vld [vmem:[#allocation2 + $0x101] ss:$8 sps:$4 sm:$0xff]  }
 0x5f6   : > { %5976 = vmatpush3.msra.mxu0 %v3402_v7  ;;  %5977 = vmatprep.mubr.msk.f32.mxu0 %vm9388_vm1, %v9375_v5  ;;  %vm4736_vm1 = vcmask 982912  }
 0x5f8   : > { %5072 = vrot.lane.b32.xlu0 %v6359_v20, %s9391_s18  ;;  %5214 = vrot.lane.b32.xlu1 %v6360_v45, %s9393_s23 }
 0x5fc   : > { %5144 = vrot.lane.b32.xlu0 %v6361_v15, %s9392_s19  ;;  %5286 = vrot.lane.b32.xlu1 %v6362_v31, %s9394_s20 }
 0x600   : > { %5216 = vrot.lane.b32.xlu0 %v6363_v13, %s9393_s23  ;;  %5358 = vrot.lane.b32.xlu1 %v6364_v57, %s9248_s16 }
 0x604   : > { %5288 = vrot.lane.b32.xlu0 %v6365_v18, %s9394_s20  ;;  %5430 = vrot.lane.b32.xlu1 %v6366_v50, %s9385_s26 }
 0x608   : > { %5360 = vrot.lane.b32.xlu0 %v6367_v40, %s9248_s16  ;;  %5502 = vrot.lane.b32.xlu1 %v6368_v19, %s9246_s30 }
 0x60c   : > { %5432 = vrot.lane.b32.xlu0 %v6369_v63, %s9385_s26  ;;  %5574 = vrot.lane.b32.xlu1 %v6370_v48, %s9378_s28 }
 0x610   : > { %5504 = vrot.lane.b32.xlu0 %v6371_v22, %s9246_s30 }
 0x6c8   : > { %v3472_v3 = vpop.f32.mrb[12].mxu0 }
 0x6c9   : > { %v3477_v56 = vmul.f32 0.015625, %v3472_v3  ;;  %v5974_v32 = vpop.f32.mrb[13].mxu0  ;;  %v4056_v3 = vpop.permute.xlu0 %4055 }
 0x6ca   : > { %4080 = vst.msk [vmem:[#allocation3] sm:$0xff] %vm4079_vm9, %v4056_v3  ;;  %v6405_v32 = vld [vmem:[#allocation2 + $0x10] ss:$8 sps:$4 sm:$0xff]  }
 0x6cb   : > { %v3481_v11 = vrot.slane %v3477_v56, %v7609_v21  ;;  %3716 = vst.msk [vmem:[#allocation3 + $0x10] sm:$0xff] %vm3380_vm5, %v6405_v32 }
 0x6cd   : > { %v8423_v62 = vsub.f32 %v3372_v41, %v3481_v11  ;;  %v8427_v6 = vsub.f32 %v3373_v55, %v3481_v11  ;;  %v8431_v33 = vsub.f32 %v3374_v46, %v3481_v11  ;;  %v8435_v7 = vsub.f32 %v3375_v49, %v3481_v11  ;;  %v4129_v56 = vpop.permute.xlu0 %4128 }
 0x6ce   : > { %v8439_v59 = vsub.f32 %v3376_v25, %v3481_v11  ;;  %v8449_v51 = vsub.f32 %v3377_v4, %v3481_v11  ;;  %v8457_v14 = vsub.f32 %v3378_v10, %v3481_v11  ;;  %v8464_v60 = vsub.f32 %v3379_v1, %v3481_v11  ;;  %4153 = vst.msk [vmem:[#allocation3] sm:$0xff] %vm4152_vm10, %v4129_v56  ;;  %v3766_v11 = vpop.permute.xlu1 %3765 }
 0x6cf   : > { %v3490_v42 = vmul.f32 %v8423_v62, %v8423_v62  ;;  %v3491_v53 = vmul.f32 %v8427_v6, %v8427_v6  ;;  %v3492_v55 = vmul.f32 %v8431_v33, %v8431_v33  ;;  %v3493_v34 = vmul.f32 %v8435_v7, %v8435_v7  ;;  %3789 = vst.msk [vmem:[#allocation3 + $0x10] sm:$0xff] %vm3787_vm6, %v3766_v11 }
 0x6d0   : > { %v3494_v12 = vmul.f32 %v8439_v59, %v8439_v59  ;;  %v3495_v36 = vmul.f32 %v8449_v51, %v8449_v51  ;;  %v3496_v44 = vmul.f32 %v8457_v14, %v8457_v14  ;;  %v3497_v58 = vmul.f32 %v8464_v60, %v8464_v60 }
 0x6d1   : > { %v3498_v41 = vsel %vm3380_vm5, %v3490_v42, 0.0  ;;  %v3499_v46 = vsel %vm3380_vm5, %v3491_v53, 0.0  ;;  %v3501_v49 = vsel %vm3380_vm5, %v3492_v55, 0.0  ;;  %v3503_v25 = vsel %vm3380_vm5, %v3493_v34, 0.0  ;;  %v4131_v55 = vpop.permute.xlu0 %4130 }
 0x6d2   : > { %v3500_v0 = vadd.f32 %v3499_v46, %v3498_v41  ;;  %v3505_v16 = vsel %vm3380_vm5, %v3494_v12, 0.0  ;;  %v3507_v37 = vsel %vm3380_vm5, %v3495_v36, 0.0  ;;  %v3509_v29 = vsel %vm3380_vm5, %v3496_v44, 0.0  ;;  %v3839_v42 = vpop.permute.xlu1 %3838 }
 0x6d3   : > { %v3511_v10 = vsel %vm3380_vm5, %v3497_v58, 0.0  ;;  %3862 = vst.msk [vmem:[#allocation3 + $0x10] sm:$0xff] %vm3860_vm13, %v3839_v42 }
 0x6d4   : > { %v3502_v28 = vadd.f32 %v3501_v49, %v3500_v0 }
 0x6d5   : > { %v4204_v46 = vpop.permute.xlu0 %4203 }
 0x6d6   : > { %v3504_v8 = vadd.f32 %v3503_v25, %v3502_v28  ;;  %v3912_v53 = vpop.permute.xlu1 %3911  ;;  %v3593_v25 = vld [vmem:[%s9170_s6] sm:$0x1] }
 0x6d7   : > { %3935 = vst.msk [vmem:[#allocation3 + $0x10] sm:$0xff] %vm3933_vm7, %v3912_v53 }
 0x6d8   : > { %v3506_v4 = vadd.f32 %v3505_v16, %v3504_v8 }
 0x6d9   : > { %v4277_v0 = vpop.permute.xlu0 %4276 }
 0x6da   : > { %v3508_v35 = vadd.f32 %v3507_v37, %v3506_v4  ;;  %v3985_v34 = vpop.permute.xlu1 %3984  ;;  %v5877_v37 = vld [vmem:[%s9171_s7] ss:$0 sm:$0xff] }
 0x6db   : > { %4008 = vst.msk [vmem:[#allocation3 + $0x10] sm:$0xff] %vm4006_vm0, %v3985_v34 }
 0x6dc   : > { %v3510_v1 = vadd.f32 %v3509_v29, %v3508_v35 }
 0x6de   : > { %v3512_v27 = vadd.f32 %v3511_v10, %v3510_v1  ;;  %v4058_v41 = vpop.permute.xlu1 %4057 }
 0x6df   : > { %4081 = vst.msk [vmem:[#allocation3 + $0x10] sm:$0xff] %vm4079_vm9, %v4058_v41 }
 0x6e0   : > { %v3513_v24 = vrot.slane %v3512_v27, 4  ;;  %4154 = vst.msk [vmem:[#allocation3 + $0x10] sm:$0xff] %vm4152_vm10, %v4131_v55 }
 0x6e1   : > { %4227 = vst.msk [vmem:[#allocation3 + $0x10] sm:$0xff] %vm4225_vm11, %v4204_v46 }
 0x6e2   : > { %v3514_v9 = vadd.f32 %v3513_v24, %v3512_v27  ;;  %4300 = vst.msk [vmem:[#allocation3 + $0x10] sm:$0xff] %vm4298_vm12, %v4277_v0  ;;  %v4202_v8 = vpop.permute.xlu1 %4201 }
 0x6e3   : > { %4226 = vst.msk [vmem:[#allocation3] sm:$0xff] %vm4225_vm11, %v4202_v8 }
 0x6e4   : > { %v3515_v52 = vrot.slane %v3514_v9, 2 }
 0x6e6   : > { %v3516_v30 = vadd.f32 %v3515_v52, %v3514_v9  ;;  %v4275_v4 = vpop.permute.xlu1 %4274 }
 0x6e7   : > { %4299 = vst.msk [vmem:[#allocation3] sm:$0xff] %vm4298_vm12, %v4275_v4 }
 0x6e8   : > { %v3517_v47 = vrot.slane %v3516_v30, 1 }
 0x6ea   : > { %v3518_v54 = vadd.f32 %v3517_v47, %v3516_v30 }
 0x6ec   : > { %5978 = vmatmul.mubr.msk.f32.vlgmr.msra.gmra.mrb[14].mxu0 %vm3380_vm5, %v3518_v54 }
 0x7bf   : > { %v3588_v12 = vpop.f32.mrb[14].mxu0 }
 0x7c0   : > { %v3592_v49 = vmul.f32 0.015625, %v3588_v12  ;;  %v5979_v28 = vpop.f32.mrb[15].mxu0  ;;  %v8569_v12 = vpop.permute.xlu0 %4998 }
 0x7c2   : > { %v3594_v36 = vadd.f32 1e-05, %v3592_v49 }
 0x7c4   : > { %6557 = vrsqrt.f32 %v3594_v36 }
 0x7ce   : > { %v6558_v44 = vpop.eup %6557 }
 0x7cf   : > { %v3596_v16 = vmul.f32 %v6558_v44, %v3593_v25  ;;  %v8576_v44 = vpop.permute.xlu0 %5070 }
 0x7d1   : > { %v3601_v58 = vrot.slane %v3596_v16, %v7609_v21 }
 0x7d3   : > { %v3603_v35 = vmul.f32 %v3601_v58, %v8423_v62  ;;  %v3604_v29 = vmul.f32 %v3601_v58, %v8427_v6  ;;  %v3605_v1 = vmul.f32 %v3601_v58, %v8431_v33  ;;  %v3606_v10 = vmul.f32 %v3601_v58, %v8435_v7 }
 0x7d4   : > { %v3607_v27 = vmul.f32 %v3601_v58, %v8439_v59  ;;  %v3608_v24 = vmul.f32 %v3601_v58, %v8449_v51  ;;  %v3609_v21 = vmul.f32 %v3601_v58, %v8457_v14  ;;  %v3610_v9 = vmul.f32 %v3601_v58, %v8464_v60 }
 0x7d5   : > { %v3618_v52 = vadd.f32 %v5877_v37, %v3603_v35  ;;  %v3619_v30 = vadd.f32 %v5877_v37, %v3604_v29  ;;  %v3620_v47 = vadd.f32 %v5877_v37, %v3605_v1  ;;  %v3621_v54 = vadd.f32 %v5877_v37, %v3606_v10  ;;  %v8584_v35 = vpop.permute.xlu0 %5142 }
 0x7d6   : > { %v3622_v38 = vadd.f32 %v5877_v37, %v3607_v27  ;;  %v3623_v62 = vadd.f32 %v5877_v37, %v3608_v24  ;;  %v3624_v23 = vadd.f32 %v5877_v37, %v3609_v21  ;;  %v3625_v6 = vadd.f32 %v5877_v37, %v3610_v9 }
 0x7d7   : > { %v3634_v17 = vcombine.high %v3618_v52, %v3618_v52  ;;  %v3635_v33 = vcombine.high %v3619_v30, %v3619_v30  ;;  %v3636_v20 = vcombine.high %v3620_v47, %v3620_v47  ;;  %v3637_v7 = vcombine.high %v3621_v54, %v3621_v54  ;;  %3651 = vst.msk [vmem:[#allocation2 + $0x39] sm:$0xf] %vm3650_vm14, %v3618_v52 }
 0x7d8   : > { %3653 = vst.msk [vmem:[#allocation2 + $0x49] sm:$0xf] %vm3650_vm14, %v3619_v30  ;;  %3655 = vst.msk [vmem:[#allocation2 + $0x69] sm:$0xf] %vm3650_vm14, %v3620_v47  ;;  %v3638_v59 = vcombine.high %v3622_v38, %v3622_v38  ;;  %v3639_v51 = vcombine.high %v3623_v62, %v3623_v62  ;;  %v3640_v14 = vcombine.high %v3624_v23, %v3624_v23 }
 0x7d9   : > { %3657 = vst.msk [vmem:[#allocation2 + $0x79] sm:$0xf] %vm3650_vm14, %v3621_v54  ;;  %v3641_v60 = vcombine.high %v3625_v6, %v3625_v6  ;;  %3659 = vst.msk [vmem:[#allocation2 + $0x99] sm:$0xf] %vm3650_vm14, %v3622_v38  ;;  %v8589_v21 = vpop.permute.xlu0 %5000 }
 0x7da   : > { %3661 = vst.msk [vmem:[#allocation2 + $0xa9] sm:$0xf] %vm3650_vm14, %v3623_v62  ;;  %3663 = vst.msk [vmem:[#allocation2 + $0xc9] sm:$0xf] %vm3650_vm14, %v3624_v23  ;;  %v8599_v62 = vpop.permute.xlu1 %5214 }
 0x7db   : > { %3665 = vst.msk [vmem:[#allocation2 + $0xd9] sm:$0xf] %vm3650_vm14, %v3625_v6  ;;  %3652 = vst.msk [vmem:[#allocation2 + $0x41] sm:$0xf] %vm3650_vm14, %v3634_v17 }
 0x7dc   : > { %3654 = vst.msk [vmem:[#allocation2 + $0x51] sm:$0xf] %vm3650_vm14, %v3635_v33  ;;  %3656 = vst.msk [vmem:[#allocation2 + $0x71] sm:$0xf] %vm3650_vm14, %v3636_v20 }
 0x7dd   : > { %3658 = vst.msk [vmem:[#allocation2 + $0x81] sm:$0xf] %vm3650_vm14, %v3637_v7  ;;  %3660 = vst.msk [vmem:[#allocation2 + $0xa1] sm:$0xf] %vm3650_vm14, %v3638_v59  ;;  %v8595_v30 = vpop.permute.xlu0 %5072 }
 0x7de   : > { %3662 = vst.msk [vmem:[#allocation2 + $0xb1] sm:$0xf] %vm3650_vm14, %v3639_v51  ;;  %3664 = vst.msk [vmem:[#allocation2 + $0xd1] sm:$0xf] %vm3650_vm14, %v3640_v14  ;;  %v6372_v45 = vld [vmem:[#allocation2 + $0x30] ss:$8 sps:$4 sm:$0xff]   ;;  %v8606_v20 = vpop.permute.xlu1 %5286 }
 0x7df   : > { %3666 = vst.msk [vmem:[#allocation2 + $0xe1] sm:$0xf] %vm3650_vm14, %v3641_v60  ;;  %v6373_v15 = vld [vmem:[#allocation2 + $0x31] ss:$8 sps:$4 sm:$0xff]   ;;  %4347 = vrot.lane.b32.xlu1 %v6372_v45, %s9246_s30  ;;  %v6375_v13 = vld [vmem:[#allocation2 + $0x61] ss:$8 sps:$4 sm:$0xff]  }
 0x7e0   : > { %3767 = vrot.lane.b32.xlu0 %v6373_v15, %s9389_s21  ;;  %v6374_v31 = vld [vmem:[#allocation2 + $0x31] ss:$8 sps:$4 sm:$0xff]   ;;  %v6380_v63 = vld [vmem:[#allocation2 + $0x62] ss:$8 sps:$4 sm:$0xff]   ;;  %vm5637_vm14 = vcmask 719872  }
 0x7e1   : > { %v6376_v57 = vld [vmem:[#allocation2 + $0x32] ss:$8 sps:$4 sm:$0xff]   ;;  %v6384_v61 = vld [vmem:[#allocation2 + $0x60] ss:$8 sps:$4 sm:$0xff]   ;;  %v8601_v6 = vpop.permute.xlu0 %5144 }
 0x7e2   : > { %v6377_v18 = vld [vmem:[#allocation2 + $0x91] ss:$8 sps:$4 sm:$0xff]   ;;  %v6379_v50 = vld [vmem:[#allocation2 + $0x41] ss:$8 sps:$4 sm:$0xff]   ;;  %v8614_v45 = vpop.permute.xlu1 %5358 }
 0x7e3   : > { %4420 = vrot.lane.b32.xlu1 %v6374_v31, %s9378_s28  ;;  %v6378_v40 = vld [vmem:[#allocation2 + $0x32] ss:$8 sps:$4 sm:$0xff]   ;;  %v6385_v43 = vld [vmem:[#allocation2 + $0x42] ss:$8 sps:$4 sm:$0xff]  }
 0x7e4   : > { %3771 = vrot.lane.b32.xlu0 %v6375_v13, %s9389_s21  ;;  %v6381_v19 = vld [vmem:[#allocation2 + $0x71] ss:$8 sps:$4 sm:$0xff]   ;;  %v6383_v48 = vld [vmem:[#allocation2 + $0xa1] ss:$8 sps:$4 sm:$0xff]  }
 0x7e5   : > { %v6382_v22 = vld [vmem:[#allocation2 + $0x92] ss:$8 sps:$4 sm:$0xff]   ;;  %v6386_v26 = vld [vmem:[#allocation2 + $0x61] ss:$8 sps:$4 sm:$0xff]   ;;  %v8609_v59 = vpop.permute.xlu0 %5216 }
 0x7e6   : > { %v6387_v39 = vld [vmem:[#allocation2 + $0x72] ss:$8 sps:$4 sm:$0xff]   ;;  %v6389_v2 = vld [vmem:[#allocation2 + $0xa2] ss:$8 sps:$4 sm:$0xff]  }
 0x7e7   : > { %4493 = vrot.lane.b32.xlu1 %v6376_v57, %s9381_s22  ;;  %v6388_v3 = vld [vmem:[#allocation2 + $0x62] ss:$8 sps:$4 sm:$0xff]   ;;  %v6391_v32 = vld [vmem:[#allocation2 + $0x90] ss:$8 sps:$4 sm:$0xff]  }
 0x7e8   : > { %3775 = vrot.lane.b32.xlu0 %v6377_v18, %s9389_s21  ;;  %v6392_v56 = vld [vmem:[#allocation2 + $0x48] ss:$8 sps:$4 sm:$0xff]   ;;  %v6394_v11 = vld [vmem:[#allocation2 + $0x78] ss:$8 sps:$4 sm:$0xff]   ;;  %v8621_v18 = vpop.permute.xlu1 %5430 }
 0x7e9   : > { %v6393_v42 = vld [vmem:[#allocation2 + $0x91] ss:$8 sps:$4 sm:$0xff]   ;;  %v6397_v34 = vld [vmem:[#allocation2 + $0x60] ss:$8 sps:$4 sm:$0xff]   ;;  %v8616_v31 = vpop.permute.xlu0 %5288 }
 0x7ea   : > { %v6396_v53 = vld [vmem:[#allocation2 + $0xa8] ss:$8 sps:$4 sm:$0xff]   ;;  %v6400_v0 = vld [vmem:[#allocation2 + $0x79] ss:$8 sps:$4 sm:$0xff]  }
 0x7eb   : > { %3769 = vrot.lane.b32.xlu1 %v6379_v50, %s9389_s21  ;;  %v6395_v55 = vld [vmem:[#allocation2 + $0x92] ss:$8 sps:$4 sm:$0xff]   ;;  %v6435_v49 = vld [vmem:[#allocation2 + $0x60] ss:$8 sps:$4 sm:$0xff]  }
 0x7ec   : > { %3840 = vrot.lane.b32.xlu0 %v6378_v40, %s9390_s25  ;;  %v6398_v41 = vld [vmem:[#allocation2 + $0x49] ss:$8 sps:$4 sm:$0xff]   ;;  %3719 = vst.msk [vmem:[#allocation3 + $0x40] sm:$0xff] %vm3380_vm5, %v6435_v49  ;;  %v6407_v1 = vld [vmem:[#allocation2 + $0x7a] ss:$8 sps:$4 sm:$0xff]  }
 0x7ed   : > { %v6432_v46 = vld [vmem:[#allocation2 + $0x30] ss:$8 sps:$4 sm:$0xff]   ;;  %v6399_v28 = vld [vmem:[#allocation2 + $0x61] ss:$8 sps:$4 sm:$0xff]   ;;  %v8624_v50 = vpop.permute.xlu0 %5360 }
 0x7ee   : > { %3717 = vst.msk [vmem:[#allocation3 + $0x20] sm:$0xff] %vm3380_vm5, %v6432_v46  ;;  %v6438_v36 = vld [vmem:[#allocation2 + $0x90] ss:$8 sps:$4 sm:$0xff]   ;;  %v6401_v25 = vld [vmem:[#allocation2 + $0x62] ss:$8 sps:$4 sm:$0xff]  }
 0x7ef   : > { %3773 = vrot.lane.b32.xlu1 %v6381_v19, %s9389_s21  ;;  %v6402_v8 = vld [vmem:[#allocation2 + $0xa9] ss:$8 sps:$4 sm:$0xff]   ;;  %3721 = vst.msk [vmem:[#allocation3 + $0x60] sm:$0xff] %vm3380_vm5, %v6438_v36  ;;  %v6419_v7 = vld [vmem:[#allocation2 + $0x38] ss:$8 sps:$4 sm:$0xff]  }
 0x7f0   : > { %3844 = vrot.lane.b32.xlu0 %v6380_v63, %s9390_s25  ;;  %v6441_v16 = vld [vmem:[#allocation2 + $0x40] ss:$8 sps:$4 sm:$0xff]   ;;  %v6444_v58 = vld [vmem:[#allocation2 + $0x70] ss:$8 sps:$4 sm:$0xff]  }
 0x7f1   : > { %v6404_v4 = vld [vmem:[#allocation2 + $0x4a] ss:$8 sps:$4 sm:$0xff]   ;;  %3718 = vst.msk [vmem:[#allocation3 + $0x30] sm:$0xff] %vm3380_vm5, %v6441_v16  ;;  %3720 = vst.msk [vmem:[#allocation3 + $0x50] sm:$0xff] %vm3380_vm5, %v6444_v58  ;;  %v6423_v13 = vld [vmem:[#allocation2 + $0x39] ss:$8 sps:$4 sm:$0xff]  }
 0x7f2   : > { %v6403_v37 = vld [vmem:[#allocation2 + $0xc0] ss:$8 sps:$4 sm:$0xff]   ;;  %v6410_v52 = vld [vmem:[#allocation2 + $0x90] ss:$8 sps:$4 sm:$0xff]  }
 0x7f3   : > { %3777 = vrot.lane.b32.xlu1 %v6383_v48, %s9389_s21  ;;  %v6447_v29 = vld [vmem:[#allocation2 + $0xa0] ss:$8 sps:$4 sm:$0xff]   ;;  %v6412_v54 = vld [vmem:[#allocation2 + $0x91] ss:$8 sps:$4 sm:$0xff]   ;;  %v8628_v48 = vpop.permute.xlu1 %5502 }
 0x7f4   : > { %3848 = vrot.lane.b32.xlu0 %v6382_v22, %s9390_s25  ;;  %v6406_v10 = vld [vmem:[#allocation2 + $0xc1] ss:$8 sps:$4 sm:$0xff]   ;;  %3722 = vst.msk [vmem:[#allocation3 + $0x70] sm:$0xff] %vm3380_vm5, %v6447_v29  ;;  %v6414_v23 = vld [vmem:[#allocation2 + $0x92] ss:$8 sps:$4 sm:$0xff]  }
 0x7f5   : > { %v6409_v27 = vld [vmem:[#allocation2 + $0xaa] ss:$8 sps:$4 sm:$0xff]   ;;  %v6422_v57 = vld [vmem:[#allocation2 + $0x38] ss:$8 sps:$4 sm:$0xff]  }
 0x7f6   : > { %v6408_v24 = vld [vmem:[#allocation2 + $0xc2] ss:$8 sps:$4 sm:$0xff]   ;;  %v6421_v60 = vld [vmem:[#allocation2 + $0x70] ss:$8 sps:$4 sm:$0xff]  }
 0x7f7   : > { %3842 = vrot.lane.b32.xlu1 %v6385_v43, %s9390_s25  ;;  %v6411_v9 = vld [vmem:[#allocation2 + $0x42] ss:$8 sps:$4 sm:$0xff]   ;;  %v8630_v43 = vpop.permute.xlu0 %5432  ;;  %v6505_v16 = vld [vmem:[#allocation2 + $0x51] ss:$8 sps:$4 sm:$0xff]  }
 0x7f8   : > { %4986 = vrot.lane.b32.xlu0 %v6384_v61, %s9390_s25  ;;  %v6413_v47 = vld [vmem:[#allocation2 + $0x68] ss:$8 sps:$4 sm:$0xff]   ;;  %v6425_v40 = vld [vmem:[#allocation2 + $0x78] ss:$8 sps:$4 sm:$0xff]   ;;  %4867 = vst.msk [vmem:[#allocation3 + $0x18] sm:$0xff] %vm3380_vm5, %v6505_v16 }
 0x7f9   : > { %v6415_v38 = vld [vmem:[#allocation2 + $0x69] ss:$8 sps:$4 sm:$0xff]   ;;  %v6426_v22 = vld [vmem:[#allocation2 + $0x98] ss:$8 sps:$4 sm:$0xff]  }
 0x7fa   : > { %v6417_v17 = vld [vmem:[#allocation2 + $0x6a] ss:$8 sps:$4 sm:$0xff]   ;;  %v6429_v61 = vld [vmem:[#allocation2 + $0x3a] ss:$8 sps:$4 sm:$0xff]  }
 0x7fb   : > { %3846 = vrot.lane.b32.xlu1 %v6387_v39, %s9390_s25  ;;  %v6416_v33 = vld [vmem:[#allocation2 + $0xc0] ss:$8 sps:$4 sm:$0xff]  }
 0x7fc   : > { %5058 = vrot.lane.b32.xlu0 %v6386_v26, %s9391_s18  ;;  %v6474_v51 = vld [vmem:[#allocation2 + $0x41] ss:$8 sps:$4 sm:$0xff]   ;;  %v8635_v26 = vpop.permute.xlu1 %5574 }
 0x7fd   : > { %v6418_v14 = vld [vmem:[#allocation2 + $0xc1] ss:$8 sps:$4 sm:$0xff]   ;;  %4866 = vst.msk [vmem:[#allocation3 + $0x8] sm:$0xff] %vm3380_vm5, %v6474_v51 }
 0x7fe   : > { %v6420_v15 = vld [vmem:[#allocation2 + $0xc2] ss:$8 sps:$4 sm:$0xff]  }
 0x7ff   : > { %3850 = vrot.lane.b32.xlu1 %v6389_v2, %s9390_s25  ;;  %v6424_v19 = vld [vmem:[#allocation2 + $0x68] ss:$8 sps:$4 sm:$0xff]   ;;  %v6428_v39 = vld [vmem:[#allocation2 + $0x39] ss:$8 sps:$4 sm:$0xff]   ;;  %v8638_v2 = vpop.permute.xlu0 %5504 }
 0x800   : > { %5130 = vrot.lane.b32.xlu0 %v6388_v3, %s9392_s19  ;;  %v6427_v63 = vld [vmem:[#allocation2 + $0x40] ss:$8 sps:$4 sm:$0xff]  }
 0x801   : > { %v6431_v3 = vld [vmem:[#allocation2 + $0x79] ss:$8 sps:$4 sm:$0xff]  }
 0x802   : > { %v5614_v36 = vld [vmem:[%s9172_s8 + $0x20] sm:$0xff] }
 0x803   : > { %3915 = vrot.lane.b32.xlu1 %v6392_v56, %s9391_s18  ;;  %v6659_v56 = vmov 0.0|0.0   ;;  %v6436_v58 = vld [vmem:[#allocation2 + $0x40] ss:$8 sps:$4 sm:$0xff]  }
 0x804   : > { %4990 = vrot.lane.b32.xlu0 %v6391_v32, %s9390_s25  ;;  %6010 = vmatprep.subr.bf16.mxu1 %v6659_v56  ;;  %v5610_v32 = vld [vmem:[%s9172_s8] sm:$0xff] }
 0x805   : > { %v6437_v29 = vld [vmem:[#allocation2 + $0x3a] ss:$8 sps:$4 sm:$0xff]  }
 0x806   : > { %v6443_v51 = vld [vmem:[#allocation2 + $0x9a] ss:$8 sps:$4 sm:$0xff]  }
 0x807   : > { %3919 = vrot.lane.b32.xlu1 %v6394_v11, %s9391_s18  ;;  %v5611_v11 = vld [vmem:[%s9172_s8 + $0x8] sm:$0xff]  ;;  %v5626_v16 = vld [vmem:[%s9172_s8 + $0x80] sm:$0xff] }
 0x808   : > { %5062 = vrot.lane.b32.xlu0 %v6393_v42, %s9391_s18  ;;  %v6430_v42 = vld [vmem:[#allocation2 + $0x69] ss:$8 sps:$4 sm:$0xff]  }
 0x80b   : > { %3923 = vrot.lane.b32.xlu1 %v6396_v53, %s9391_s18  ;;  %v6011_v53 = vpack.c.bf16 %v5611_v11, %v5610_v32  ;;  %v5622_v32 = vld [vmem:[%s9172_s8 + $0x60] sm:$0xff]  ;;  %v5623_v11 = vld [vmem:[%s9172_s8 + $0x68] sm:$0xff] }
 0x80c   : > { %5134 = vrot.lane.b32.xlu0 %v6395_v55, %s9392_s19  ;;  %v5612_v55 = vld [vmem:[%s9172_s8 + $0x10] sm:$0xff] }
 0x80d   : > { %6012 = vmatpush1.bf16.msra.mxu1 %v6011_v53  ;;  %v5624_v53 = vld [vmem:[%s9172_s8 + $0x70] sm:$0xff] }
 0x80e   : > { %6013 = vmatprep.subr.bf16.mxu1 %v6659_v56 }
 0x80f   : > { %3988 = vrot.lane.b32.xlu1 %v6398_v41, %s9392_s19 }
 0x810   : > { %4351 = vrot.lane.b32.xlu0 %v6397_v34, %s9246_s30  ;;  %v5613_v34 = vld [vmem:[%s9172_s8 + $0x18] sm:$0xff] }
 0x811   : > { %v6014_v41 = vpack.c.bf16 %v5613_v34, %v5612_v55  ;;  %v5625_v55 = vld [vmem:[%s9172_s8 + $0x78] sm:$0xff] }
 0x813   : > { %3992 = vrot.lane.b32.xlu1 %v6400_v0, %s9392_s19  ;;  %v6433_v0 = vld [vmem:[#allocation2 + $0x41] ss:$8 sps:$4 sm:$0xff]   ;;  %6015 = vmatpush1.bf16.msra.mxu1 %v6014_v41 }
 0x814   : > { %4424 = vrot.lane.b32.xlu0 %v6399_v28, %s9378_s28  ;;  %v6434_v28 = vld [vmem:[#allocation2 + $0x99] ss:$8 sps:$4 sm:$0xff]   ;;  %6016 = vmatprep.subr.bf16.mxu1 %v6659_v56 }
 0x815   : > { %v6450_v41 = vld [vmem:[#allocation2 + $0x98] ss:$8 sps:$4 sm:$0xff]  }
 0x817   : > { %3996 = vrot.lane.b32.xlu1 %v6402_v8, %s9392_s19 }
 0x818   : > { %4497 = vrot.lane.b32.xlu0 %v6401_v25, %s9381_s22  ;;  %v5615_v25 = vld [vmem:[%s9172_s8 + $0x28] sm:$0xff] }
 0x819   : > { %v6017_v8 = vpack.c.bf16 %v5615_v25, %v5614_v36  ;;  %v6452_v36 = vld [vmem:[#allocation2 + $0x50] ss:$8 sps:$4 sm:$0xff]  }
 0x81a   : > { %v6453_v25 = vld [vmem:[#allocation2 + $0x72] ss:$8 sps:$4 sm:$0xff]  }
 0x81b   : > { %4061 = vrot.lane.b32.xlu1 %v6404_v4, %s9393_s23  ;;  %6018 = vmatpush1.bf16.msra.mxu1 %v6017_v8 }
 0x81c   : > { %4994 = vrot.lane.b32.xlu0 %v6403_v37, %s9390_s25  ;;  %6019 = vmatprep.subr.bf16.mxu1 %v6659_v56 }
 0x81f   : > { %4065 = vrot.lane.b32.xlu1 %v6407_v1, %s9393_s23  ;;  %v5616_v1 = vld [vmem:[%s9172_s8 + $0x30] sm:$0xff] }
 0x820   : > { %5066 = vrot.lane.b32.xlu0 %v6406_v10, %s9391_s18  ;;  %v5617_v10 = vld [vmem:[%s9172_s8 + $0x38] sm:$0xff] }
 0x823   : > { %4069 = vrot.lane.b32.xlu1 %v6409_v27, %s9393_s23  ;;  %v6020_v27 = vpack.c.bf16 %v5617_v10, %v5616_v1  ;;  %v5629_v1 = vld [vmem:[%s9172_s8 + $0x98] sm:$0xff] }
 0x824   : > { %5138 = vrot.lane.b32.xlu0 %v6408_v24, %s9392_s19 }
 0x825   : > { %6021 = vmatpush1.bf16.msra.mxu1 %v6020_v27  ;;  %v6454_v27 = vld [vmem:[#allocation2 + $0x4a] ss:$8 sps:$4 sm:$0xff]  }
 0x826   : > { %6022 = vmatprep.subr.bf16.mxu1 %v6659_v56 }
 0x827   : > { %4914 = vrot.lane.b32.xlu1 %v6411_v9, %s9389_s21  ;;  %v6439_v9 = vld [vmem:[#allocation2 + $0x7a] ss:$8 sps:$4 sm:$0xff]  }
 0x828   : > { %4355 = vrot.lane.b32.xlu0 %v6410_v52, %s9246_s30 }
 0x82b   : > { %5202 = vrot.lane.b32.xlu1 %v6413_v47, %s9393_s23  ;;  %v6440_v47 = vld [vmem:[#allocation2 + $0x6a] ss:$8 sps:$4 sm:$0xff]  }
 0x82c   : > { %4428 = vrot.lane.b32.xlu0 %v6412_v54, %s9378_s28  ;;  %v5618_v54 = vld [vmem:[%s9172_s8 + $0x40] sm:$0xff] }
 0x82f   : > { %5274 = vrot.lane.b32.xlu1 %v6415_v38, %s9394_s20  ;;  %v5619_v38 = vld [vmem:[%s9172_s8 + $0x48] sm:$0xff] }
 0x830   : > { %4501 = vrot.lane.b32.xlu0 %v6414_v23, %s9381_s22  ;;  %v6023_v23 = vpack.c.bf16 %v5619_v38, %v5618_v54  ;;  %v5631_v54 = vld [vmem:[%s9172_s8 + $0xa8] sm:$0xff] }
 0x832   : > { %6024 = vmatpush1.bf16.msra.mxu1 %v6023_v23  ;;  %v6456_v23 = vld [vmem:[#allocation2 + $0x99] ss:$8 sps:$4 sm:$0xff]  }
 0x833   : > { %5346 = vrot.lane.b32.xlu1 %v6417_v17, %s9248_s16  ;;  %6025 = vmatprep.subr.bf16.mxu1 %v6659_v56 }
 0x834   : > { %4359 = vrot.lane.b32.xlu0 %v6416_v33, %s9246_s30  ;;  %v6442_v33 = vld [vmem:[#allocation2 + $0x48] ss:$8 sps:$4 sm:$0xff]  }
 0x837   : > { %4566 = vrot.lane.b32.xlu1 %v6419_v7, %s9383_s12 }
 0x838   : > { %4432 = vrot.lane.b32.xlu0 %v6418_v14, %s9378_s28  ;;  %v5620_v14 = vld [vmem:[%s9172_s8 + $0x50] sm:$0xff] }
 0x83b   : > { %5418 = vrot.lane.b32.xlu1 %v6421_v60, %s9385_s26  ;;  %v5621_v60 = vld [vmem:[%s9172_s8 + $0x58] sm:$0xff] }
 0x83c   : > { %4505 = vrot.lane.b32.xlu0 %v6420_v15, %s9381_s22  ;;  %v6026_v15 = vpack.c.bf16 %v5621_v60, %v5620_v14  ;;  %v5633_v14 = vld [vmem:[%s9172_s8 + $0xb8] sm:$0xff] }
 0x83e   : > { %6027 = vmatpush1.bf16.msra.mxu1 %v6026_v15  ;;  %v6458_v15 = vld [vmem:[#allocation2 + $0x51] ss:$8 sps:$4 sm:$0xff]  }
 0x83f   : > { %4639 = vrot.lane.b32.xlu1 %v6423_v13, %s9395_s24  ;;  %v6516_v13 = vld [vmem:[#allocation2 + $0x71] ss:$8 sps:$4 sm:$0xff]   ;;  %6028 = vmatprep.subr.bf16.mxu1 %v6659_v56 }
 0x840   : > { %3913 = vrot.lane.b32.xlu0 %v6422_v57, %s9391_s18  ;;  %4868 = vst.msk [vmem:[#allocation3 + $0x28] sm:$0xff] %vm3380_vm5, %v6516_v13 }
 0x843   : > { %5204 = vrot.lane.b32.xlu1 %v6425_v40, %s9393_s23  ;;  %v6445_v40 = vld [vmem:[#allocation2 + $0x80] ss:$8 sps:$4 sm:$0xff]  }
 0x844   : > { %3917 = vrot.lane.b32.xlu0 %v6424_v19, %s9391_s18 }
 0x847   : > { %4132 = vrot.lane.b32.xlu1 %v6427_v63, %s9394_s20  ;;  %v6446_v63 = vld [vmem:[#allocation2 + $0x52] ss:$8 sps:$4 sm:$0xff]  }
 0x848   : > { %3921 = vrot.lane.b32.xlu0 %v6426_v22, %s9391_s18  ;;  %v6448_v22 = vld [vmem:[#allocation2 + $0x49] ss:$8 sps:$4 sm:$0xff]  }
 0x84b   : > { %4712 = vrot.lane.b32.xlu1 %v6429_v61, %s9250_s29  ;;  %s9252_s29 = smov 120  }
 0x84c   : > { %3986 = vrot.lane.b32.xlu0 %v6428_v39, %s9392_s19  ;;  %v6449_v39 = vld [vmem:[#allocation2 + $0x70] ss:$8 sps:$4 sm:$0xff]  }
 0x84f   : > { %5276 = vrot.lane.b32.xlu1 %v6431_v3, %s9394_s20 }
 0x850   : > { %3990 = vrot.lane.b32.xlu0 %v6430_v42, %s9392_s19  ;;  %v6029_v42 = vpack.c.bf16 %v5623_v11, %v5622_v32  ;;  %v5635_v32 = vld [vmem:[%s9172_s8 + $0xc8] sm:$0xff] }
 0x851   : > { %v4348_v46 = vpop.permute.xlu1 %4347 }
 0x852   : > { %4372 = vst.msk [vmem:[#allocation3] sm:$0xff] %vm4371_vm15, %v4348_v46  ;;  %v3768_v49 = vpop.permute.xlu0 %3767  ;;  %6030 = vmatpush1.bf16.msra.mxu1 %v6029_v42  ;;  %v6032_v46 = vpack.c.bf16 %v5625_v55, %v5624_v53  ;;  %v6462_v53 = vld [vmem:[#allocation2 + $0x9a] ss:$8 sps:$4 sm:$0xff]  }
 0x853   : > { %3790 = vst.msk [vmem:[#allocation3 + $0x20] sm:$0xff] %vm3787_vm6, %v3768_v49  ;;  %4205 = vrot.lane.b32.xlu1 %v6433_v0, %s9396_s0  ;;  %v6451_v49 = vld [vmem:[#allocation2 + $0x71] ss:$8 sps:$4 sm:$0xff]   ;;  %6031 = vmatprep.subr.bf16.mxu1 %v6659_v56 }
 0x854   : > { %3994 = vrot.lane.b32.xlu0 %v6434_v28, %s9392_s19  ;;  %v6463_v55 = vld [vmem:[#allocation2 + $0x72] ss:$8 sps:$4 sm:$0xff]  }
 0x855   : > { %v4421_v4 = vpop.permute.xlu1 %4420 }
 0x856   : > { %4445 = vst.msk [vmem:[#allocation3] sm:$0xff] %vm4444_vm2, %v4421_v4  ;;  %v3772_v37 = vpop.permute.xlu0 %3771  ;;  %6033 = vmatpush1.bf16.msra.mxu1 %v6032_v46  ;;  %v5627_v4 = vld [vmem:[%s9172_s8 + $0x88] sm:$0xff] }
 0x857   : > { %3792 = vst.msk [vmem:[#allocation3 + $0x40] sm:$0xff] %vm3787_vm6, %v3772_v37  ;;  %4785 = vrot.lane.b32.xlu1 %v6436_v58, %s9252_s29  ;;  %6034 = vmatprep.subr.bf16.mxu1 %v6659_v56  ;;  %v6035_v58 = vpack.c.bf16 %v5627_v4, %v5626_v16  ;;  %v6529_v37 = vld [vmem:[#allocation2 + $0x81] ss:$8 sps:$4 sm:$0xff]  }
 0x858   : > { %4059 = vrot.lane.b32.xlu0 %v6437_v29, %s9393_s23  ;;  %v5628_v29 = vld [vmem:[%s9172_s8 + $0x90] sm:$0xff]  ;;  %4869 = vst.msk [vmem:[#allocation3 + $0x38] sm:$0xff] %vm3380_vm5, %v6529_v37  ;;  %v6465_v46 = vld [vmem:[#allocation2 + $0x42] ss:$8 sps:$4 sm:$0xff]  }
 0x859   : > { %v4494_v24 = vpop.permute.xlu1 %4493  ;;  %v6466_v4 = vld [vmem:[#allocation2 + $0xa0] ss:$8 sps:$4 sm:$0xff]  }
 0x85a   : > { %4518 = vst.msk [vmem:[#allocation3] sm:$0xff] %vm4517_vm3, %v4494_v24  ;;  %v3776_v52 = vpop.permute.xlu0 %3775  ;;  %6036 = vmatpush1.bf16.msra.mxu1 %v6035_v58  ;;  %v6038_v24 = vpack.c.bf16 %v5629_v1, %v5628_v29  ;;  %v6467_v37 = vld [vmem:[#allocation2 + $0x42] ss:$8 sps:$4 sm:$0xff]  }
 0x85b   : > { %3794 = vst.msk [vmem:[#allocation3 + $0x60] sm:$0xff] %vm3787_vm6, %v3776_v52  ;;  %5348 = vrot.lane.b32.xlu1 %v6439_v9, %s9396_s0  ;;  %v6455_v52 = vld [vmem:[#allocation2 + $0x40] ss:$8 sps:$4 sm:$0xff]   ;;  %6037 = vmatprep.subr.bf16.mxu1 %v6659_v56 }
 0x85c   : > { %4063 = vrot.lane.b32.xlu0 %v6440_v47, %s9393_s23  ;;  %v5630_v47 = vld [vmem:[%s9172_s8 + $0xa0] sm:$0xff]  ;;  %v6468_v1 = vld [vmem:[#allocation2 + $0x69] ss:$8 sps:$4 sm:$0xff]  }
 0x85d   : > { %v3770_v17 = vpop.permute.xlu1 %3769 }
 0x85e   : > { %3791 = vst.msk [vmem:[#allocation3 + $0x30] sm:$0xff] %vm3787_vm6, %v3770_v17  ;;  %v3841_v7 = vpop.permute.xlu0 %3840  ;;  %6039 = vmatpush1.bf16.msra.mxu1 %v6038_v24  ;;  %v6041_v17 = vpack.c.bf16 %v5631_v54, %v5630_v47  ;;  %v6471_v54 = vld [vmem:[#allocation2 + $0x81] ss:$8 sps:$4 sm:$0xff]  }
 0x85f   : > { %3863 = vst.msk [vmem:[#allocation3 + $0x20] sm:$0xff] %vm3860_vm13, %v3841_v7  ;;  %4568 = vrot.lane.b32.xlu1 %v6442_v33, %s9383_s12  ;;  %v6457_v7 = vld [vmem:[#allocation2 + $0x72] ss:$8 sps:$4 sm:$0xff]   ;;  %6040 = vmatprep.subr.bf16.mxu1 %v6659_v56 }
 0x860   : > { %4067 = vrot.lane.b32.xlu0 %v6443_v51, %s9393_s23  ;;  %v5632_v51 = vld [vmem:[%s9172_s8 + $0xb0] sm:$0xff] }
 0x861   : > { %v3774_v57 = vpop.permute.xlu1 %3773  ;;  %v6044_v13 = vpack.c.bf16 %v5633_v14, %v5632_v51  ;;  %v6475_v14 = vld [vmem:[#allocation2 + $0x6a] ss:$8 sps:$4 sm:$0xff]  }
 0x862   : > { %3793 = vst.msk [vmem:[#allocation3 + $0x50] sm:$0xff] %vm3787_vm6, %v3774_v57  ;;  %v3845_v19 = vpop.permute.xlu0 %3844  ;;  %6042 = vmatpush1.bf16.msra.mxu1 %v6041_v17 }
 0x863   : > { %3865 = vst.msk [vmem:[#allocation3 + $0x40] sm:$0xff] %vm3860_vm13, %v3845_v19  ;;  %5420 = vrot.lane.b32.xlu1 %v6445_v40, %s9385_s26  ;;  %v6459_v40 = vld [vmem:[#allocation2 + $0x71] ss:$8 sps:$4 sm:$0xff]   ;;  %6043 = vmatprep.subr.bf16.mxu1 %v6659_v56 }
 0x864   : > { %4916 = vrot.lane.b32.xlu0 %v6446_v63, %s9389_s21  ;;  %v6460_v19 = vld [vmem:[#allocation2 + $0x50] ss:$8 sps:$4 sm:$0xff]  }
 0x865   : > { %v3778_v61 = vpop.permute.xlu1 %3777 }
 0x866   : > { %3795 = vst.msk [vmem:[#allocation3 + $0x70] sm:$0xff] %vm3787_vm6, %v3778_v61  ;;  %v3849_v3 = vpop.permute.xlu0 %3848  ;;  %6045 = vmatpush1.bf16.msra.mxu1 %v6044_v13 }
 0x867   : > { %3867 = vst.msk [vmem:[#allocation3 + $0x60] sm:$0xff] %vm3860_vm13, %v3849_v3  ;;  %4641 = vrot.lane.b32.xlu1 %v6448_v22, %s9395_s24  ;;  %v6544_v22 = vld [vmem:[#allocation2 + $0xa1] ss:$8 sps:$4 sm:$0xff]   ;;  %6046 = vmatprep.subr.bf16.mxu1 %v6659_v56 }
 0x868   : > { %4988 = vrot.lane.b32.xlu0 %v6449_v39, %s9390_s25  ;;  %v6461_v39 = vld [vmem:[#allocation2 + $0x41] ss:$8 sps:$4 sm:$0xff]   ;;  %4870 = vst.msk [vmem:[#allocation3 + $0x48] sm:$0xff] %vm3380_vm5, %v6544_v22  ;;  %v6479_v22 = vld [vmem:[#allocation2 + $0x71] ss:$8 sps:$4 sm:$0xff]  }
 0x869   : > { %v3843_v34 = vpop.permute.xlu1 %3842  ;;  %v5634_v3 = vld [vmem:[%s9172_s8 + $0xc0] sm:$0xff] }
 0x86a   : > { %3864 = vst.msk [vmem:[#allocation3 + $0x30] sm:$0xff] %vm3860_vm13, %v3843_v34  ;;  %v8724_v0 = vpop.permute.xlu0 %4986  ;;  %v6047_v11 = vpack.c.bf16 %v5635_v32, %v5634_v3  ;;  %v5636_v34 = vld [vmem:[%s9172_s8 + $0xd0] sm:$0xff] }
 0x86b   : > { %5206 = vrot.lane.b32.xlu1 %v6450_v41, %s9393_s23  ;;  %v6464_v41 = vld [vmem:[#allocation2 + $0x68] ss:$8 sps:$4 sm:$0xff]  }
 0x86c   : > { %5060 = vrot.lane.b32.xlu0 %v6451_v49, %s9391_s18  ;;  %6048 = vmatpush1.bf16.msra.mxu1 %v6047_v11  ;;  %v6481_v3 = vld [vmem:[#allocation2 + $0x70] ss:$8 sps:$4 sm:$0xff]   ;;  %v6482_v11 = vld [vmem:[#allocation2 + $0xa2] ss:$8 sps:$4 sm:$0xff]  }
 0x86d   : > { %v3847_v28 = vpop.permute.xlu1 %3846  ;;  %5714 = vmatprep.subr.mxu1 %v9375_v5  ;;  %v6554_v5 = vld [vmem:[#allocation2 + $0xe1] ss:$8 sps:$4 sm:$0xff]  }
 0x86e   : > { %3866 = vst.msk [vmem:[#allocation3 + $0x50] sm:$0xff] %vm3860_vm13, %v3847_v28  ;;  %v8730_v8 = vpop.permute.xlu0 %5058  ;;  %v6552_v28 = vld [vmem:[#allocation2 + $0xb1] ss:$8 sps:$4 sm:$0xff]  }
 0x86f   : > { %4134 = vrot.lane.b32.xlu1 %v6452_v36, %s9394_s20  ;;  %4871 = vst.msk [vmem:[#allocation3 + $0x58] sm:$0xff] %vm3380_vm5, %v6552_v28  ;;  %4873 = vst.msk [vmem:[#allocation3 + $0x78] sm:$0xff] %vm3380_vm5, %v6554_v5  ;;  %v6486_v28 = vld [vmem:[#allocation2 + $0xa2] ss:$8 sps:$4 sm:$0xff]   ;;  %v6487_v5 = vld [vmem:[#allocation2 + $0xb0] ss:$8 sps:$4 sm:$0xff]  }
 0x870   : > { %5132 = vrot.lane.b32.xlu0 %v6453_v25, %s9392_s19  ;;  %5715 = vmatpush1.msra.mxu1 %v5636_v34  ;;  %v6553_v25 = vld [vmem:[#allocation2 + $0xd1] ss:$8 sps:$4 sm:$0xff]  }
 0x871   : > { %v3851_v10 = vpop.permute.xlu1 %3850  ;;  %4872 = vst.msk [vmem:[#allocation3 + $0x68] sm:$0xff] %vm3380_vm5, %v6553_v25  ;;  %v6484_v34 = vld [vmem:[#allocation2 + $0x70] ss:$8 sps:$4 sm:$0xff]   ;;  %vm4809_vm5 = vcmask 1048512  }
 0x872   : > { %3868 = vst.msk [vmem:[#allocation3 + $0x70] sm:$0xff] %vm3860_vm13, %v3851_v10  ;;  %v8749_v9 = vpop.permute.xlu0 %5130 }
 0x873   : > { %4714 = vrot.lane.b32.xlu1 %v6454_v27, %s9397_s3  ;;  %v6469_v27 = vld [vmem:[#allocation2 + $0x82] ss:$8 sps:$4 sm:$0xff]  }
 0x874   : > { %4349 = vrot.lane.b32.xlu0 %v6455_v52, %s9398_s1  ;;  %v6470_v52 = vld [vmem:[#allocation2 + $0xa8] ss:$8 sps:$4 sm:$0xff]  }
 0x875   : > { %v3916_v38 = vpop.permute.xlu1 %3915 }
 0x876   : > { %3937 = vst.msk [vmem:[#allocation3 + $0x30] sm:$0xff] %vm3933_vm7, %v3916_v38  ;;  %v8761_v33 = vpop.permute.xlu0 %4990 }
 0x877   : > { %5278 = vrot.lane.b32.xlu1 %v6456_v23, %s9394_s20  ;;  %v6472_v23 = vld [vmem:[#allocation2 + $0x70] ss:$8 sps:$4 sm:$0xff]  }
 0x878   : > { %4918 = vrot.lane.b32.xlu0 %v6457_v7, %s9389_s21  ;;  %v6473_v7 = vld [vmem:[#allocation2 + $0xa0] ss:$8 sps:$4 sm:$0xff]  }
 0x879   : > { %v3920_v60 = vpop.permute.xlu1 %3919 }
 0x87a   : > { %3939 = vst.msk [vmem:[#allocation3 + $0x50] sm:$0xff] %vm3933_vm7, %v3920_v60  ;;  %v8773_v57 = vpop.permute.xlu0 %5062 }
 0x87b   : > { %4207 = vrot.lane.b32.xlu1 %v6458_v15, %s9396_s0  ;;  %v6476_v15 = vld [vmem:[#allocation2 + $0x82] ss:$8 sps:$4 sm:$0xff]  }
 0x87c   : > { %5490 = vrot.lane.b32.xlu0 %v6459_v40, %s9398_s1  ;;  %v6477_v40 = vld [vmem:[#allocation2 + $0xa9] ss:$8 sps:$4 sm:$0xff]  }
 0x87d   : > { %v3924_v63 = vpop.permute.xlu1 %3923 }
 0x87e   : > { %3941 = vst.msk [vmem:[#allocation3 + $0x70] sm:$0xff] %vm3933_vm7, %v3924_v63  ;;  %v8779_v61 = vpop.permute.xlu0 %5134  ;;  %v6478_v63 = vld [vmem:[#allocation2 + $0xa1] ss:$8 sps:$4 sm:$0xff]  }
 0x87f   : > { %4787 = vrot.lane.b32.xlu1 %v6460_v19, %s9399_s15 }
 0x880   : > { %4422 = vrot.lane.b32.xlu0 %v6461_v39, %s9378_s28  ;;  %v6480_v39 = vld [vmem:[#allocation2 + $0x52] ss:$8 sps:$4 sm:$0xff]  }
 0x881   : > { %v3989_v42 = vpop.permute.xlu1 %3988 }
 0x882   : > { %4010 = vst.msk [vmem:[#allocation3 + $0x30] sm:$0xff] %vm4006_vm0, %v3989_v42  ;;  %v8792_v56 = vpop.permute.xlu0 %4351 }
 0x883   : > { %5350 = vrot.lane.b32.xlu1 %v6462_v53, %s9396_s0  ;;  %v6483_v53 = vld [vmem:[#allocation2 + $0xaa] ss:$8 sps:$4 sm:$0xff]  }
 0x884   : > { %5562 = vrot.lane.b32.xlu0 %v6463_v55, %s9378_s28 }
 0x885   : > { %v3993_v49 = vpop.permute.xlu1 %3992 }
 0x886   : > { %4012 = vst.msk [vmem:[#allocation3 + $0x50] sm:$0xff] %vm4006_vm0, %v3993_v49  ;;  %v8801_v36 = vpop.permute.xlu0 %4424 }
 0x887   : > { %4570 = vrot.lane.b32.xlu1 %v6464_v41, %s9383_s12 }
 0x888   : > { %4495 = vrot.lane.b32.xlu0 %v6465_v46, %s9381_s22  ;;  %v6485_v46 = vld [vmem:[#allocation2 + $0x78] ss:$8 sps:$4 sm:$0xff]  }
 0x889   : > { %v3997_v16 = vpop.permute.xlu1 %3996 }
 0x88a   : > { %4014 = vst.msk [vmem:[#allocation3 + $0x70] sm:$0xff] %vm4006_vm0, %v3997_v16  ;;  %v8809_v58 = vpop.permute.xlu0 %4497 }
 0x88b   : > { %5422 = vrot.lane.b32.xlu1 %v6466_v4, %s9385_s26  ;;  %v6488_v4 = vld [vmem:[#allocation2 + $0xa1] ss:$8 sps:$4 sm:$0xff]  }
 0x88c   : > { %4278 = vrot.lane.b32.xlu0 %v6467_v37, %s9385_s26 }
 0x88d   : > { %v4062_v29 = vpop.permute.xlu1 %4061 }
 0x88e   : > { %4083 = vst.msk [vmem:[#allocation3 + $0x30] sm:$0xff] %vm4079_vm9, %v4062_v29  ;;  %v8814_v10 = vpop.permute.xlu0 %4994  ;;  %v6489_v29 = vld [vmem:[#allocation2 + $0x79] ss:$8 sps:$4 sm:$0xff]  }
 0x88f   : > { %4643 = vrot.lane.b32.xlu1 %v6468_v1, %s9395_s24 }
 0x890   : > { %4920 = vrot.lane.b32.xlu0 %v6469_v27, %s9389_s21  ;;  %v6490_v27 = vld [vmem:[#allocation2 + $0x71] ss:$8 sps:$4 sm:$0xff]  }
 0x891   : > { %v4066_v24 = vpop.permute.xlu1 %4065 }
 0x892   : > { %4085 = vst.msk [vmem:[#allocation3 + $0x50] sm:$0xff] %vm4079_vm9, %v4066_v24  ;;  %v8819_v47 = vpop.permute.xlu0 %5066 }
 0x893   : > { %5208 = vrot.lane.b32.xlu1 %v6470_v52, %s9393_s23  ;;  %v6491_v52 = vld [vmem:[#allocation2 + $0xc8] ss:$8 sps:$4 sm:$0xff]  }
 0x894   : > { %5492 = vrot.lane.b32.xlu0 %v6471_v54, %s9398_s1 }
 0x895   : > { %v4070_v38 = vpop.permute.xlu1 %4069 }
 0x896   : > { %4087 = vst.msk [vmem:[#allocation3 + $0x70] sm:$0xff] %vm4079_vm9, %v4070_v38  ;;  %v8824_v17 = vpop.permute.xlu0 %5138  ;;  %v6492_v38 = vld [vmem:[#allocation2 + $0xa2] ss:$8 sps:$4 sm:$0xff]  }
 0x897   : > { %4136 = vrot.lane.b32.xlu1 %v6472_v23, %s9394_s20 }
 0x898   : > { %4992 = vrot.lane.b32.xlu0 %v6473_v7, %s9390_s25  ;;  %v6493_v7 = vld [vmem:[#allocation2 + $0x80] ss:$8 sps:$4 sm:$0xff]  }
 0x899   : > { %v4915_v51 = vpop.permute.xlu1 %4914 }
 0x89a   : > { %4938 = vst.msk [vmem:[#allocation3 + $0x8] sm:$0xff] %vm3787_vm6, %v4915_v51  ;;  %v8829_v60 = vpop.permute.xlu0 %4355 }
 0x89b   : > { %5010 = vst.msk [vmem:[#allocation3 + $0x8] sm:$0xff] %vm3860_vm13, %v8724_v0  ;;  %4716 = vrot.lane.b32.xlu1 %v6475_v14, %s9397_s3  ;;  %v6494_v14 = vld [vmem:[#allocation2 + $0x72] ss:$8 sps:$4 sm:$0xff]  }
 0x89c   : > { %5082 = vst.msk [vmem:[#allocation3 + $0x8] sm:$0xff] %vm3933_vm7, %v8730_v8  ;;  %5564 = vrot.lane.b32.xlu0 %v6476_v15, %s9378_s28 }
 0x89d   : > { %5154 = vst.msk [vmem:[#allocation3 + $0x8] sm:$0xff] %vm4006_vm0, %v8749_v9  ;;  %v5203_v13 = vpop.permute.xlu1 %5202 }
 0x89e   : > { %5226 = vst.msk [vmem:[#allocation3 + $0x8] sm:$0xff] %vm4079_vm9, %v5203_v13  ;;  %v8840_v19 = vpop.permute.xlu0 %4428  ;;  %v6495_v13 = vld [vmem:[#allocation2 + $0x7a] ss:$8 sps:$4 sm:$0xff]  }
 0x89f   : > { %5280 = vrot.lane.b32.xlu1 %v6477_v40, %s9394_s20 }
 0x8a0   : > { %5064 = vrot.lane.b32.xlu0 %v6478_v63, %s9391_s18  ;;  %v6496_v63 = vld [vmem:[#allocation2 + $0x72] ss:$8 sps:$4 sm:$0xff]  }
 0x8a1   : > { %v5275_v0 = vpop.permute.xlu1 %5274 }
 0x8a2   : > { %5298 = vst.msk [vmem:[#allocation3 + $0x8] sm:$0xff] %vm4152_vm10, %v5275_v0  ;;  %v8845_v8 = vpop.permute.xlu0 %4501 }
 0x8a3   : > { %4209 = vrot.lane.b32.xlu1 %v6479_v22, %s9396_s0  ;;  %v6497_v22 = vld [vmem:[#allocation2 + $0xc9] ss:$8 sps:$4 sm:$0xff]  }
 0x8a4   : > { %4280 = vrot.lane.b32.xlu0 %v6480_v39, %s9385_s26 }
 0x8a5   : > { %v5347_v9 = vpop.permute.xlu1 %5346 }
 0x8a6   : > { %5370 = vst.msk [vmem:[#allocation3 + $0x8] sm:$0xff] %vm4225_vm11, %v5347_v9  ;;  %v8850_v32 = vpop.permute.xlu0 %4359  ;;  %v6498_v9 = vld [vmem:[#allocation2 + $0xb2] ss:$8 sps:$4 sm:$0xff]  }
 0x8a7   : > { %4789 = vrot.lane.b32.xlu1 %v6481_v3, %s9399_s15 }
 0x8a8   : > { %5136 = vrot.lane.b32.xlu0 %v6482_v11, %s9392_s19  ;;  %v6499_v11 = vld [vmem:[#allocation2 + $0x81] ss:$8 sps:$4 sm:$0xff]  }
 0x8a9   : > { %v4567_v42 = vpop.permute.xlu1 %4566 }
 0x8aa   : > { %4591 = vst.msk [vmem:[#allocation3] sm:$0xff] %vm4590_vm8, %v4567_v42  ;;  %v8855_v55 = vpop.permute.xlu0 %4432 }
 0x8ab   : > { %5352 = vrot.lane.b32.xlu1 %v6483_v53, %s9396_s0  ;;  %v6500_v53 = vld [vmem:[#allocation2 + $0xb1] ss:$8 sps:$4 sm:$0xff]  }
 0x8ac   : > { %4353 = vrot.lane.b32.xlu0 %v6484_v34, %s9398_s1 }
 0x8ad   : > { %v5419_v41 = vpop.permute.xlu1 %5418 }
 0x8ae   : > { %5442 = vst.msk [vmem:[#allocation3 + $0x8] sm:$0xff] %vm4298_vm12, %v5419_v41  ;;  %v8860_v49 = vpop.permute.xlu0 %4505  ;;  %v6501_v41 = vld [vmem:[#allocation2 + $0x80] ss:$8 sps:$4 sm:$0xff]  }
 0x8af   : > { %4572 = vrot.lane.b32.xlu1 %v6485_v46, %s9383_s12 }
 0x8b0   : > { %4922 = vrot.lane.b32.xlu0 %v6486_v28, %s9389_s21  ;;  %v6502_v28 = vld [vmem:[#allocation2 + $0xd0] ss:$8 sps:$4 sm:$0xff]  }
 0x8b1   : > { %v4640_v25 = vpop.permute.xlu1 %4639 }
 0x8b2   : > { %4664 = vst.msk [vmem:[#allocation3] sm:$0xff] %vm4663_vm4, %v4640_v25  ;;  %v3914_v16 = vpop.permute.xlu0 %3913 }
 0x8b3   : > { %3936 = vst.msk [vmem:[#allocation3 + $0x20] sm:$0xff] %vm3933_vm7, %v3914_v16  ;;  %5424 = vrot.lane.b32.xlu1 %v6487_v5, %s9385_s26  ;;  %v6503_v5 = vld [vmem:[#allocation2 + $0xca] ss:$8 sps:$4 sm:$0xff]  }
 0x8b4   : > { %5494 = vrot.lane.b32.xlu0 %v6488_v4, %s9398_s1  ;;  %v6504_v4 = vld [vmem:[#allocation2 + $0xb2] ss:$8 sps:$4 sm:$0xff]  }
 0x8b5   : > { %v8868_v37 = vpop.permute.xlu1 %5204 }
 0x8b6   : > { %v3918_v1 = vpop.permute.xlu0 %3917 }
 0x8b7   : > { %3938 = vst.msk [vmem:[#allocation3 + $0x40] sm:$0xff] %vm3933_vm7, %v3918_v1  ;;  %4645 = vrot.lane.b32.xlu1 %v6489_v29, %s9395_s24  ;;  %v6506_v1 = vld [vmem:[#allocation2 + $0x98] ss:$8 sps:$4 sm:$0xff]  }
 0x8b8   : > { %4426 = vrot.lane.b32.xlu0 %v6490_v27, %s9378_s28 }
 0x8b9   : > { %v4133_v24 = vpop.permute.xlu1 %4132 }
 0x8ba   : > { %v3922_v54 = vpop.permute.xlu0 %3921 }
 0x8bb   : > { %3940 = vst.msk [vmem:[#allocation3 + $0x60] sm:$0xff] %vm3933_vm7, %v3922_v54  ;;  %5210 = vrot.lane.b32.xlu1 %v6491_v52, %s9393_s23  ;;  %v6508_v54 = vld [vmem:[#allocation2 + $0xd0] ss:$8 sps:$4 sm:$0xff]  }
 0x8bc   : > { %5566 = vrot.lane.b32.xlu0 %v6492_v38, %s9378_s28 }
 0x8bd   : > { %v4713_v23 = vpop.permute.xlu1 %4712 }
 0x8be   : > { %4737 = vst.msk [vmem:[#allocation3] sm:$0xff] %vm4736_vm1, %v4713_v23  ;;  %v3987_v51 = vpop.permute.xlu0 %3986  ;;  %v6509_v23 = vld [vmem:[#allocation2 + $0x82] ss:$8 sps:$4 sm:$0xff]  }
 0x8bf   : > { %4009 = vst.msk [vmem:[#allocation3 + $0x20] sm:$0xff] %vm4006_vm0, %v3987_v51  ;;  %4138 = vrot.lane.b32.xlu1 %v6493_v7, %s9394_s20  ;;  %v6510_v51 = vld [vmem:[#allocation2 + $0x99] ss:$8 sps:$4 sm:$0xff]  }
 0x8c0   : > { %4499 = vrot.lane.b32.xlu0 %v6494_v14, %s9381_s22 }
 0x8c1   : > { %v8880_v15 = vpop.permute.xlu1 %5276 }
 0x8c2   : > { %v3991_v40 = vpop.permute.xlu0 %3990 }
 0x8c3   : > { %4011 = vst.msk [vmem:[#allocation3 + $0x40] sm:$0xff] %vm4006_vm0, %v3991_v40  ;;  %4718 = vrot.lane.b32.xlu1 %v6495_v13, %s9397_s3  ;;  %v6511_v13 = vld [vmem:[#allocation2 + $0xd2] ss:$8 sps:$4 sm:$0xff]  }
 0x8c4   : > { %4282 = vrot.lane.b32.xlu0 %v6496_v63, %s9385_s26  ;;  %v6512_v63 = vld [vmem:[#allocation2 + $0xd8] ss:$8 sps:$4 sm:$0xff]  }
 0x8c5   : > { %v4206_v0 = vpop.permute.xlu1 %4205 }
 0x8c6   : > { %v3995_v39 = vpop.permute.xlu0 %3994 }
 0x8c7   : > { %4013 = vst.msk [vmem:[#allocation3 + $0x60] sm:$0xff] %vm4006_vm0, %v3995_v39  ;;  %5282 = vrot.lane.b32.xlu1 %v6497_v22, %s9394_s20  ;;  %v6513_v22 = vld [vmem:[#allocation2 + $0xa0] ss:$8 sps:$4 sm:$0xff]  }
 0x8c8   : > { %4924 = vrot.lane.b32.xlu0 %v6498_v9, %s9389_s21  ;;  %v6514_v9 = vld [vmem:[#allocation2 + $0xa0] ss:$8 sps:$4 sm:$0xff]  }
 0x8c9   : > { %v4786_v3 = vpop.permute.xlu1 %4785 }
 0x8ca   : > { %4810 = vst.msk [vmem:[#allocation3] sm:$0xff] %vm4809_vm5, %v4786_v3  ;;  %v4060_v42 = vpop.permute.xlu0 %4059 }
 0x8cb   : > { %4082 = vst.msk [vmem:[#allocation3 + $0x20] sm:$0xff] %vm4079_vm9, %v4060_v42  ;;  %4211 = vrot.lane.b32.xlu1 %v6499_v11, %s9396_s0  ;;  %v6515_v11 = vld [vmem:[#allocation2 + $0xd2] ss:$8 sps:$4 sm:$0xff]  }
 0x8cc   : > { %4155 = vst.msk [vmem:[#allocation3 + $0x20] sm:$0xff] %vm4152_vm10, %v4133_v24  ;;  %5496 = vrot.lane.b32.xlu0 %v6500_v53, %s9398_s1  ;;  %v6507_v24 = vld [vmem:[#allocation2 + $0xd1] ss:$8 sps:$4 sm:$0xff]  }
 0x8cd   : > { %4228 = vst.msk [vmem:[#allocation3 + $0x20] sm:$0xff] %vm4225_vm11, %v4206_v0  ;;  %v5349_v34 = vpop.permute.xlu1 %5348  ;;  %v6517_v42 = vld [vmem:[#allocation2 + $0x9a] ss:$8 sps:$4 sm:$0xff]  }
 0x8ce   : > { %v4064_v46 = vpop.permute.xlu0 %4063 }
 0x8cf   : > { %4084 = vst.msk [vmem:[#allocation3 + $0x40] sm:$0xff] %vm4079_vm9, %v4064_v46  ;;  %4791 = vrot.lane.b32.xlu1 %v6501_v41, %s9399_s15  ;;  %v6518_v41 = vld [vmem:[#allocation2 + $0xd1] ss:$8 sps:$4 sm:$0xff]  }
 0x8d0   : > { %4996 = vrot.lane.b32.xlu0 %v6502_v28, %s9390_s25  ;;  %v6520_v28 = vld [vmem:[#allocation2 + $0xa1] ss:$8 sps:$4 sm:$0xff]  }
 0x8d1   : > { %v8897_v25 = vpop.permute.xlu1 %4568 }
 0x8d2   : > { %v4068_v16 = vpop.permute.xlu0 %4067 }
 0x8d3   : > { %4086 = vst.msk [vmem:[#allocation3 + $0x60] sm:$0xff] %vm4079_vm9, %v4068_v16  ;;  %5354 = vrot.lane.b32.xlu1 %v6503_v5, %s9396_s0  ;;  %v6522_v16 = vld [vmem:[#allocation2 + $0xd2] ss:$8 sps:$4 sm:$0xff]  }
 0x8d4   : > { %5568 = vrot.lane.b32.xlu0 %v6504_v4, %s9378_s28  ;;  %v6523_v4 = vld [vmem:[#allocation2 + $0xa0] ss:$8 sps:$4 sm:$0xff]  }
 0x8d5   : > { %v5421_v29 = vpop.permute.xlu1 %5420 }
 0x8d6   : > { %v4917_v27 = vpop.permute.xlu0 %4916 }
 0x8d7   : > { %4939 = vst.msk [vmem:[#allocation3 + $0x18] sm:$0xff] %vm3787_vm6, %v4917_v27  ;;  %4574 = vrot.lane.b32.xlu1 %v6506_v1, %s9383_s12  ;;  %v6524_v1 = vld [vmem:[#allocation2 + $0xa2] ss:$8 sps:$4 sm:$0xff]  }
 0x8d8   : > { %5068 = vrot.lane.b32.xlu0 %v6507_v24, %s9391_s18  ;;  %v6525_v24 = vld [vmem:[#allocation2 + $0xda] ss:$8 sps:$4 sm:$0xff]  }
 0x8d9   : > { %v8905_v52 = vpop.permute.xlu1 %4641 }
 0x8da   : > { %v4989_v38 = vpop.permute.xlu0 %4988 }
 0x8db   : > { %5011 = vst.msk [vmem:[#allocation3 + $0x18] sm:$0xff] %vm3860_vm13, %v4989_v38  ;;  %5426 = vrot.lane.b32.xlu1 %v6508_v54, %s9385_s26  ;;  %v6526_v38 = vld [vmem:[#allocation2 + $0xa2] ss:$8 sps:$4 sm:$0xff]  }
 0x8dc   : > { %4284 = vrot.lane.b32.xlu0 %v6509_v23, %s9385_s26 }
 0x8dd   : > { %v5207_v7 = vpop.permute.xlu1 %5206 }
 0x8de   : > { %v5061_v14 = vpop.permute.xlu0 %5060 }
 0x8df   : > { %5083 = vst.msk [vmem:[#allocation3 + $0x18] sm:$0xff] %vm3933_vm7, %v5061_v14  ;;  %4647 = vrot.lane.b32.xlu1 %v6510_v51, %s9395_s24 }
 0x8e0   : > { %5140 = vrot.lane.b32.xlu0 %v6511_v13, %s9392_s19  ;;  %v6528_v13 = vld [vmem:[#allocation2 + $0xe2] ss:$8 sps:$4 sm:$0xff]  }
 0x8e1   : > { %v4135_v40 = vpop.permute.xlu1 %4134 }
 0x8e2   : > { %4156 = vst.msk [vmem:[#allocation3 + $0x30] sm:$0xff] %vm4152_vm10, %v4135_v40  ;;  %v5133_v0 = vpop.permute.xlu0 %5132  ;;  %v6530_v40 = vld [vmem:[#allocation2 + $0xe0] ss:$8 sps:$4 sm:$0xff]  }
 0x8e3   : > { %5155 = vst.msk [vmem:[#allocation3 + $0x18] sm:$0xff] %vm4006_vm0, %v5133_v0  ;;  %5212 = vrot.lane.b32.xlu1 %v6512_v63, %s9393_s23  ;;  %v6531_v0 = vld [vmem:[#allocation2 + $0xe1] ss:$8 sps:$4 sm:$0xff]  }
 0x8e4   : > { %5227 = vst.msk [vmem:[#allocation3 + $0x18] sm:$0xff] %vm4079_vm9, %v8868_v37  ;;  %4357 = vrot.lane.b32.xlu0 %v6513_v22, %s9398_s1  ;;  %v6532_v22 = vld [vmem:[#allocation2 + $0xa9] ss:$8 sps:$4 sm:$0xff]  }
 0x8e5   : > { %5299 = vst.msk [vmem:[#allocation3 + $0x18] sm:$0xff] %vm4152_vm10, %v8880_v15  ;;  %v4715_v39 = vpop.permute.xlu1 %4714 }
 0x8e6   : > { %5371 = vst.msk [vmem:[#allocation3 + $0x18] sm:$0xff] %vm4225_vm11, %v5349_v34  ;;  %v4350_v3 = vpop.permute.xlu0 %4349  ;;  %v6519_v34 = vld [vmem:[#allocation2 + $0xd9] ss:$8 sps:$4 sm:$0xff]  }
 0x8e7   : > { %5443 = vst.msk [vmem:[#allocation3 + $0x18] sm:$0xff] %vm4298_vm12, %v5421_v29  ;;  %4140 = vrot.lane.b32.xlu1 %v6514_v9, %s9394_s20  ;;  %v6534_v9 = vld [vmem:[#allocation2 + $0xb0] ss:$8 sps:$4 sm:$0xff]  }
 0x8e8   : > { %4373 = vst.msk [vmem:[#allocation3 + $0x10] sm:$0xff] %vm4371_vm15, %v4350_v3  ;;  %4926 = vrot.lane.b32.xlu0 %v6515_v11, %s9389_s21  ;;  %v6535_v11 = vld [vmem:[#allocation2 + $0xb2] ss:$8 sps:$4 sm:$0xff]  }
 0x8e9   : > { %v5279_v37 = vpop.permute.xlu1 %5278 }
 0x8ea   : > { %v4919_v53 = vpop.permute.xlu0 %4918 }
 0x8eb   : > { %4940 = vst.msk [vmem:[#allocation3 + $0x28] sm:$0xff] %vm3787_vm6, %v4919_v53  ;;  %4720 = vrot.lane.b32.xlu1 %v6517_v42, %s9397_s3  ;;  %v6536_v42 = vld [vmem:[#allocation2 + $0xaa] ss:$8 sps:$4 sm:$0xff]  }
 0x8ec   : > { %5012 = vst.msk [vmem:[#allocation3 + $0x28] sm:$0xff] %vm3860_vm13, %v8761_v33  ;;  %5498 = vrot.lane.b32.xlu0 %v6518_v41, %s9398_s1  ;;  %v6537_v41 = vld [vmem:[#allocation2 + $0xd0] ss:$8 sps:$4 sm:$0xff]  }
 0x8ed   : > { %5084 = vst.msk [vmem:[#allocation3 + $0x28] sm:$0xff] %vm3933_vm7, %v8773_v57  ;;  %v4208_v15 = vpop.permute.xlu1 %4207  ;;  %v6521_v57 = vld [vmem:[#allocation2 + $0xa1] ss:$8 sps:$4 sm:$0xff]  }
 0x8ee   : > { %5156 = vst.msk [vmem:[#allocation3 + $0x28] sm:$0xff] %vm4006_vm0, %v8779_v61  ;;  %v5491_v46 = vpop.permute.xlu0 %5490 }
 0x8ef   : > { %4229 = vst.msk [vmem:[#allocation3 + $0x30] sm:$0xff] %vm4225_vm11, %v4208_v15  ;;  %5284 = vrot.lane.b32.xlu1 %v6519_v34, %s9394_s20  ;;  %v6538_v34 = vld [vmem:[#allocation2 + $0xb1] ss:$8 sps:$4 sm:$0xff]  }
 0x8f0   : > { %5228 = vst.msk [vmem:[#allocation3 + $0x28] sm:$0xff] %vm4079_vm9, %v5207_v7  ;;  %4430 = vrot.lane.b32.xlu0 %v6520_v28, %s9378_s28  ;;  %v6527_v7 = vld [vmem:[#allocation2 + $0xa8] ss:$8 sps:$4 sm:$0xff]  }
 0x8f1   : > { %5514 = vst.msk [vmem:[#allocation3 + $0x8] sm:$0xff] %vm4371_vm15, %v5491_v46  ;;  %v4788_v33 = vpop.permute.xlu1 %4787  ;;  %v6539_v28 = vld [vmem:[#allocation2 + $0xd1] ss:$8 sps:$4 sm:$0xff]  }
 0x8f2   : > { %5300 = vst.msk [vmem:[#allocation3 + $0x28] sm:$0xff] %vm4152_vm10, %v5279_v37  ;;  %v4423_v5 = vpop.permute.xlu0 %4422 }
 0x8f3   : > { %4446 = vst.msk [vmem:[#allocation3 + $0x10] sm:$0xff] %vm4444_vm2, %v4423_v5  ;;  %4213 = vrot.lane.b32.xlu1 %v6521_v57, %s9396_s0  ;;  %v6540_v57 = vld [vmem:[#allocation2 + $0xb0] ss:$8 sps:$4 sm:$0xff]  }
 0x8f4   : > { %5570 = vrot.lane.b32.xlu0 %v6522_v16, %s9378_s28 }
 0x8f5   : > { %v5351_v61 = vpop.permute.xlu1 %5350 }
 0x8f6   : > { %5372 = vst.msk [vmem:[#allocation3 + $0x28] sm:$0xff] %vm4225_vm11, %v5351_v61  ;;  %v5563_v29 = vpop.permute.xlu0 %5562  ;;  %v6541_v61 = vld [vmem:[#allocation2 + $0xd2] ss:$8 sps:$4 sm:$0xff]  }
 0x8f7   : > { %5586 = vst.msk [vmem:[#allocation3 + $0x8] sm:$0xff] %vm4444_vm2, %v5563_v29  ;;  %4793 = vrot.lane.b32.xlu1 %v6523_v4, %s9399_s15  ;;  %v6550_v29 = vld [vmem:[#allocation2 + $0x112] ss:$8 sps:$4 sm:$0xff]  }
 0x8f8   : > { %4503 = vrot.lane.b32.xlu0 %v6524_v1, %s9381_s22 }
 0x8f9   : > { %v4571_v27 = vpop.permute.xlu1 %4570 }
 0x8fa   : > { %v4496_v54 = vpop.permute.xlu0 %4495 }
 0x8fb   : > { %4519 = vst.msk [vmem:[#allocation3 + $0x10] sm:$0xff] %vm4517_vm3, %v4496_v54  ;;  %5356 = vrot.lane.b32.xlu1 %v6525_v24, %s9396_s0 }
 0x8fc   : > { %4592 = vst.msk [vmem:[#allocation3 + $0x10] sm:$0xff] %vm4590_vm8, %v8897_v25  ;;  %4286 = vrot.lane.b32.xlu0 %v6526_v38, %s9385_s26  ;;  %v5594_v25 = vld [vmem:[#allocation3] sm:$0xff]  ;;  %v6543_v38 = vld [vmem:[#allocation2 + $0xc9] ss:$8 sps:$4 sm:$0xff]  }
 0x8fd   : > { %4665 = vst.msk [vmem:[#allocation3 + $0x10] sm:$0xff] %vm4663_vm4, %v8905_v52  ;;  %v5423_v23 = vpop.permute.xlu1 %5422 }
 0x8fe   : > { %4738 = vst.msk [vmem:[#allocation3 + $0x10] sm:$0xff] %vm4736_vm1, %v4715_v39  ;;  %v4279_v51 = vpop.permute.xlu0 %4278  ;;  %v5595_v14 = vld [vmem:[#allocation3 + $0x8] sm:$0xff] }
 0x8ff   : > { %5444 = vst.msk [vmem:[#allocation3 + $0x28] sm:$0xff] %vm4298_vm12, %v5423_v23  ;;  %4301 = vst.msk [vmem:[#allocation3 + $0x20] sm:$0xff] %vm4298_vm12, %v4279_v51  ;;  %5878 = vmatprep.mubr.msk.f32.mxu1 %vm5637_vm14, %v5595_v14  ;;  %4576 = vrot.lane.b32.xlu1 %v6527_v7, %s9383_s12  ;;  %v6533_v39 = vld [vmem:[#allocation2 + $0xe2] ss:$8 sps:$4 sm:$0xff]  }
 0x900   : > { %4811 = vst.msk [vmem:[#allocation3 + $0x10] sm:$0xff] %vm4809_vm5, %v4788_v33  ;;  %4928 = vrot.lane.b32.xlu0 %v6528_v13, %s9389_s21  ;;  %5727 = vmatmul.mubr.f32.vlgmr.msra.gmra.mrb[0].mxu1 %v5594_v25  ;;  %v6545_v51 = vld [vmem:[#allocation2 + $0xca] ss:$8 sps:$4 sm:$0xff]  }
 0x901   : > { %4374 = vst.msk [vmem:[#allocation3 + $0x20] sm:$0xff] %vm4371_vm15, %v8792_v56  ;;  %v4644_v52 = vpop.permute.xlu1 %4643  ;;  %v6546_v25 = vld [vmem:[#allocation2 + $0xd0] ss:$8 sps:$4 sm:$0xff]  }
 0x902   : > { %4447 = vst.msk [vmem:[#allocation3 + $0x20] sm:$0xff] %vm4444_vm2, %v8801_v36  ;;  %v4921_v63 = vpop.permute.xlu0 %4920 }
 0x903   : > { %4520 = vst.msk [vmem:[#allocation3 + $0x20] sm:$0xff] %vm4517_vm3, %v8809_v58  ;;  %5428 = vrot.lane.b32.xlu1 %v6530_v40, %s9385_s26 }
 0x904   : > { %4593 = vst.msk [vmem:[#allocation3 + $0x20] sm:$0xff] %vm4590_vm8, %v4571_v27  ;;  %5500 = vrot.lane.b32.xlu0 %v6531_v0, %s9398_s1  ;;  %v6542_v27 = vld [vmem:[#allocation2 + $0xc8] ss:$8 sps:$4 sm:$0xff]  }
 0x905   : > { %4941 = vst.msk [vmem:[#allocation3 + $0x38] sm:$0xff] %vm3787_vm6, %v4921_v63  ;;  %v5209_v56 = vpop.permute.xlu1 %5208  ;;  %v6547_v63 = vld [vmem:[#allocation2 + $0xd8] ss:$8 sps:$4 sm:$0xff]  }
 0x906   : > { %4666 = vst.msk [vmem:[#allocation3 + $0x20] sm:$0xff] %vm4663_vm4, %v4644_v52  ;;  %v5493_v36 = vpop.permute.xlu0 %5492 }
 0x907   : > { %5515 = vst.msk [vmem:[#allocation3 + $0x18] sm:$0xff] %vm4371_vm15, %v5493_v36  ;;  %4649 = vrot.lane.b32.xlu1 %v6532_v22, %s9395_s24  ;;  %v5596_v4 = vld [vmem:[#allocation3 + $0x10] sm:$0xff]  ;;  %v6549_v22 = vld [vmem:[#allocation2 + $0xda] ss:$8 sps:$4 sm:$0xff]  }
 0x908   : > { %5572 = vrot.lane.b32.xlu0 %v6533_v39, %s9378_s28 }
 0x909   : > { %v4137_v58 = vpop.permute.xlu1 %4136 }
 0x90a   : > { %4157 = vst.msk [vmem:[#allocation3 + $0x40] sm:$0xff] %vm4152_vm10, %v4137_v58  ;;  %v4993_v3 = vpop.permute.xlu0 %4992  ;;  %v6551_v58 = vld [vmem:[#allocation2 + $0xe0] ss:$8 sps:$4 sm:$0xff]  }
 0x90b   : > { %5013 = vst.msk [vmem:[#allocation3 + $0x38] sm:$0xff] %vm3860_vm13, %v4993_v3  ;;  %4142 = vrot.lane.b32.xlu1 %v6534_v9, %s9394_s20 }
 0x90c   : > { %4288 = vrot.lane.b32.xlu0 %v6535_v11, %s9385_s26 }
 0x90d   : > { %v4717_v37 = vpop.permute.xlu1 %4716 }
 0x90e   : > { %4739 = vst.msk [vmem:[#allocation3 + $0x20] sm:$0xff] %vm4736_vm1, %v4717_v37  ;;  %v5565_v53 = vpop.permute.xlu0 %5564 }
 0x90f   : > { %5587 = vst.msk [vmem:[#allocation3 + $0x18] sm:$0xff] %vm4444_vm2, %v5565_v53  ;;  %4722 = vrot.lane.b32.xlu1 %v6536_v42, %s9397_s3 }
 0x910   : > { %4361 = vrot.lane.b32.xlu0 %v6537_v41, %s9398_s1 }
 0x911   : > { %v5281_v15 = vpop.permute.xlu1 %5280 }
 0x912   : > { %v5065_v46 = vpop.permute.xlu0 %5064 }
 0x913   : > { %5085 = vst.msk [vmem:[#allocation3 + $0x38] sm:$0xff] %vm3933_vm7, %v5065_v46  ;;  %4215 = vrot.lane.b32.xlu1 %v6538_v34, %s9396_s0 }
 0x914   : > { %4434 = vrot.lane.b32.xlu0 %v6539_v28, %s9378_s28 }
 0x915   : > { %v4210_v33 = vpop.permute.xlu1 %4209 }
 0x916   : > { %4230 = vst.msk [vmem:[#allocation3 + $0x40] sm:$0xff] %vm4225_vm11, %v4210_v33  ;;  %v4281_v5 = vpop.permute.xlu0 %4280  ;;  %v5597_v16 = vld [vmem:[#allocation3 + $0x18] sm:$0xff] }
 0x917   : > { %4302 = vst.msk [vmem:[#allocation3 + $0x30] sm:$0xff] %vm4298_vm12, %v4281_v5  ;;  %5879 = vmatprep.mubr.msk.f32.mxu1 %vm5637_vm14, %v5597_v16  ;;  %4795 = vrot.lane.b32.xlu1 %v6540_v57, %s9399_s15 }
 0x918   : > { %4507 = vrot.lane.b32.xlu0 %v6541_v61, %s9381_s22  ;;  %5732 = vmatmul.mubr.f32.gmra.mrb[2].mxu1 %v5596_v4 }
 0x919   : > { %v4790_v1 = vpop.permute.xlu1 %4789 }
 0x91a   : > { %4812 = vst.msk [vmem:[#allocation3 + $0x20] sm:$0xff] %vm4809_vm5, %v4790_v1  ;;  %v5137_v24 = vpop.permute.xlu0 %5136 }
 0x91b   : > { %5157 = vst.msk [vmem:[#allocation3 + $0x38] sm:$0xff] %vm4006_vm0, %v5137_v24  ;;  %4578 = vrot.lane.b32.xlu1 %v6542_v27, %s9383_s12 }
 0x91c   : > { %5229 = vst.msk [vmem:[#allocation3 + $0x38] sm:$0xff] %vm4079_vm9, %v5209_v56  ;;  %5576 = vrot.lane.b32.xlu0 %v6550_v29, %s9378_s28 }
 0x91d   : > { %5301 = vst.msk [vmem:[#allocation3 + $0x38] sm:$0xff] %vm4152_vm10, %v5281_v15  ;;  %v5353_v54 = vpop.permute.xlu1 %5352 }
 0x91e   : > { %5373 = vst.msk [vmem:[#allocation3 + $0x38] sm:$0xff] %vm4225_vm11, %v5353_v54  ;;  %v4354_v23 = vpop.permute.xlu0 %4353 }
 0x91f   : > { %4375 = vst.msk [vmem:[#allocation3 + $0x30] sm:$0xff] %vm4371_vm15, %v4354_v23  ;;  %4651 = vrot.lane.b32.xlu1 %v6543_v38, %s9395_s24 }
 0x921   : > { %v4573_v7 = vpop.permute.xlu1 %4572  ;;  %v5598_v11 = vld [vmem:[#allocation3 + $0x20] sm:$0xff] }
 0x922   : > { %v4923_v14 = vpop.permute.xlu0 %4922 }
 0x923   : > { %4942 = vst.msk [vmem:[#allocation3 + $0x48] sm:$0xff] %vm3787_vm6, %v4923_v14  ;;  %4724 = vrot.lane.b32.xlu1 %v6545_v51, %s9397_s3 }
 0x924   : > { %5014 = vst.msk [vmem:[#allocation3 + $0x48] sm:$0xff] %vm3860_vm13, %v8814_v10 }
 0x925   : > { %5086 = vst.msk [vmem:[#allocation3 + $0x48] sm:$0xff] %vm3933_vm7, %v8819_v47  ;;  %v5425_v13 = vpop.permute.xlu1 %5424  ;;  %v6548_v47 = vld [vmem:[#allocation2 + $0xd9] ss:$8 sps:$4 sm:$0xff]  }
 0x926   : > { %5158 = vst.msk [vmem:[#allocation3 + $0x48] sm:$0xff] %vm4006_vm0, %v8824_v17  ;;  %v5495_v52 = vpop.permute.xlu0 %5494 }
 0x927   : > { %5445 = vst.msk [vmem:[#allocation3 + $0x38] sm:$0xff] %vm4298_vm12, %v5425_v13  ;;  %4797 = vrot.lane.b32.xlu1 %v6546_v25, %s9399_s15 }
 0x928   : > { %5516 = vst.msk [vmem:[#allocation3 + $0x28] sm:$0xff] %vm4371_vm15, %v5495_v52 }
 0x929   : > { %v4646_v40 = vpop.permute.xlu1 %4645 }
 0x92a   : > { %v4427_v0 = vpop.permute.xlu0 %4426 }
 0x92b   : > { %4448 = vst.msk [vmem:[#allocation3 + $0x30] sm:$0xff] %vm4444_vm2, %v4427_v0  ;;  %4580 = vrot.lane.b32.xlu1 %v6547_v63, %s9383_s12  ;;  %s5889_s12 = sshll.u32 %s9405_s13, 6 }
 0x92c   : > { %s9133_s26 = scalar_lea.vmem %s9173_s9, %s5889_s12 }
 0x92d   : > { %v5211_v10 = vpop.permute.xlu1 %5210 }
 0x92e   : > { %5230 = vst.msk [vmem:[#allocation3 + $0x48] sm:$0xff] %vm4079_vm9, %v5211_v10  ;;  %v5567_v56 = vpop.permute.xlu0 %5566 }
 0x92f   : > { %5588 = vst.msk [vmem:[#allocation3 + $0x28] sm:$0xff] %vm4444_vm2, %v5567_v56  ;;  %4653 = vrot.lane.b32.xlu1 %v6548_v47, %s9395_s24 }
 0x931   : > { %v4139_v17 = vpop.permute.xlu1 %4138 }
 0x932   : > { %4158 = vst.msk [vmem:[#allocation3 + $0x50] sm:$0xff] %vm4152_vm10, %v4139_v17  ;;  %v4500_v36 = vpop.permute.xlu0 %4499 }
 0x933   : > { %4521 = vst.msk [vmem:[#allocation3 + $0x30] sm:$0xff] %vm4517_vm3, %v4500_v36  ;;  %4726 = vrot.lane.b32.xlu1 %v6549_v22, %s9397_s3 }
 0x934   : > { %4594 = vst.msk [vmem:[#allocation3 + $0x30] sm:$0xff] %vm4590_vm8, %v4573_v7 }
 0x935   : > { %4667 = vst.msk [vmem:[#allocation3 + $0x30] sm:$0xff] %vm4663_vm4, %v4646_v40  ;;  %v4719_v39 = vpop.permute.xlu1 %4718 }
 0x936   : > { %4740 = vst.msk [vmem:[#allocation3 + $0x30] sm:$0xff] %vm4736_vm1, %v4719_v39  ;;  %v4283_v9 = vpop.permute.xlu0 %4282  ;;  %v5599_v3 = vld [vmem:[#allocation3 + $0x28] sm:$0xff] }
 0x937   : > { %4303 = vst.msk [vmem:[#allocation3 + $0x40] sm:$0xff] %vm4298_vm12, %v4283_v9  ;;  %5880 = vmatprep.mubr.msk.f32.mxu1 %vm5637_vm14, %v5599_v3  ;;  %4799 = vrot.lane.b32.xlu1 %v6551_v58, %s9399_s15 }
 0x938   : > { %4376 = vst.msk [vmem:[#allocation3 + $0x40] sm:$0xff] %vm4371_vm15, %v8829_v60  ;;  %5737 = vmatmul.mubr.f32.gmra.mrb[4].mxu1 %v5598_v11 }
 0x939   : > { %4449 = vst.msk [vmem:[#allocation3 + $0x40] sm:$0xff] %vm4444_vm2, %v8840_v19  ;;  %v5283_v37 = vpop.permute.xlu1 %5282 }
 0x93a   : > { %4522 = vst.msk [vmem:[#allocation3 + $0x40] sm:$0xff] %vm4517_vm3, %v8845_v8  ;;  %v4925_v42 = vpop.permute.xlu0 %4924 }
 0x93b   : > { %5302 = vst.msk [vmem:[#allocation3 + $0x48] sm:$0xff] %vm4152_vm10, %v5283_v37 }
 0x93c   : > { %4943 = vst.msk [vmem:[#allocation3 + $0x58] sm:$0xff] %vm3787_vm6, %v4925_v42 }
 0x93d   : > { %v4212_v53 = vpop.permute.xlu1 %4211 }
 0x93e   : > { %4231 = vst.msk [vmem:[#allocation3 + $0x50] sm:$0xff] %vm4225_vm11, %v4212_v53  ;;  %v5497_v41 = vpop.permute.xlu0 %5496 }
 0x93f   : > { %5517 = vst.msk [vmem:[#allocation3 + $0x38] sm:$0xff] %vm4371_vm15, %v5497_v41 }
 0x941   : > { %v4792_v60 = vpop.permute.xlu1 %4791 }
 0x942   : > { %4813 = vst.msk [vmem:[#allocation3 + $0x30] sm:$0xff] %vm4809_vm5, %v4792_v60  ;;  %v4997_v15 = vpop.permute.xlu0 %4996 }
 0x943   : > { %5015 = vst.msk [vmem:[#allocation3 + $0x58] sm:$0xff] %vm3860_vm13, %v4997_v15 }
 0x945   : > { %v5355_v19 = vpop.permute.xlu1 %5354 }
 0x946   : > { %5374 = vst.msk [vmem:[#allocation3 + $0x48] sm:$0xff] %vm4225_vm11, %v5355_v19  ;;  %v5569_v8 = vpop.permute.xlu0 %5568 }
 0x947   : > { %5589 = vst.msk [vmem:[#allocation3 + $0x38] sm:$0xff] %vm4444_vm2, %v5569_v8 }
 0x949   : > { %v4575_v34 = vpop.permute.xlu1 %4574  ;;  %v5600_v5 = vld [vmem:[#allocation3 + $0x30] sm:$0xff] }
 0x94a   : > { %4595 = vst.msk [vmem:[#allocation3 + $0x40] sm:$0xff] %vm4590_vm8, %v4575_v34  ;;  %v5069_v46 = vpop.permute.xlu0 %5068 }
 0x94b   : > { %5087 = vst.msk [vmem:[#allocation3 + $0x58] sm:$0xff] %vm3933_vm7, %v5069_v46 }
 0x94d   : > { %v5427_v28 = vpop.permute.xlu1 %5426 }
 0x94e   : > { %5446 = vst.msk [vmem:[#allocation3 + $0x48] sm:$0xff] %vm4298_vm12, %v5427_v28  ;;  %v4285_v33 = vpop.permute.xlu0 %4284  ;;  %v5601_v57 = vld [vmem:[#allocation3 + $0x38] sm:$0xff] }
 0x94f   : > { %4304 = vst.msk [vmem:[#allocation3 + $0x50] sm:$0xff] %vm4298_vm12, %v4285_v33  ;;  %5881 = vmatprep.mubr.msk.f32.mxu1 %vm5637_vm14, %v5601_v57 }
 0x950   : > { %5742 = vmatmul.mubr.f32.gmra.mrb[6].mxu1 %v5600_v5 }
 0x951   : > { %v4648_v16 = vpop.permute.xlu1 %4647 }
 0x952   : > { %4668 = vst.msk [vmem:[#allocation3 + $0x40] sm:$0xff] %vm4663_vm4, %v4648_v16  ;;  %v5141_v61 = vpop.permute.xlu0 %5140 }
 0x953   : > { %5159 = vst.msk [vmem:[#allocation3 + $0x58] sm:$0xff] %vm4006_vm0, %v5141_v61 }
 0x955   : > { %v5213_v4 = vpop.permute.xlu1 %5212 }
 0x956   : > { %5231 = vst.msk [vmem:[#allocation3 + $0x58] sm:$0xff] %vm4079_vm9, %v5213_v4  ;;  %v4358_v29 = vpop.permute.xlu0 %4357 }
 0x957   : > { %4377 = vst.msk [vmem:[#allocation3 + $0x50] sm:$0xff] %vm4371_vm15, %v4358_v29 }
 0x959   : > { %v4141_v1 = vpop.permute.xlu1 %4140 }
 0x95a   : > { %4159 = vst.msk [vmem:[#allocation3 + $0x60] sm:$0xff] %vm4152_vm10, %v4141_v1  ;;  %v4927_v27 = vpop.permute.xlu0 %4926 }
 0x95b   : > { %4944 = vst.msk [vmem:[#allocation3 + $0x68] sm:$0xff] %vm3787_vm6, %v4927_v27 }
 0x95c   : > { %5016 = vst.msk [vmem:[#allocation3 + $0x68] sm:$0xff] %vm3860_vm13, %v8569_v12 }
 0x95d   : > { %5088 = vst.msk [vmem:[#allocation3 + $0x68] sm:$0xff] %vm3933_vm7, %v8576_v44  ;;  %v4721_v24 = vpop.permute.xlu1 %4720 }
 0x95e   : > { %5160 = vst.msk [vmem:[#allocation3 + $0x68] sm:$0xff] %vm4006_vm0, %v8584_v35  ;;  %v5499_v54 = vpop.permute.xlu0 %5498 }
 0x95f   : > { %4741 = vst.msk [vmem:[#allocation3 + $0x40] sm:$0xff] %vm4736_vm1, %v4721_v24 }
 0x960   : > { %5232 = vst.msk [vmem:[#allocation3 + $0x68] sm:$0xff] %vm4079_vm9, %v8599_v62 }
 0x961   : > { %5518 = vst.msk [vmem:[#allocation3 + $0x48] sm:$0xff] %vm4371_vm15, %v5499_v54  ;;  %v5285_v12 = vpop.permute.xlu1 %5284 }
 0x962   : > { %5304 = vst.msk [vmem:[#allocation3 + $0x68] sm:$0xff] %vm4152_vm10, %v8606_v20  ;;  %5303 = vst.msk [vmem:[#allocation3 + $0x58] sm:$0xff] %vm4152_vm10, %v5285_v12  ;;  %v4431_v44 = vpop.permute.xlu0 %4430 }
 0x963   : > { %5376 = vst.msk [vmem:[#allocation3 + $0x68] sm:$0xff] %vm4225_vm11, %v8614_v45 }
 0x964   : > { %5448 = vst.msk [vmem:[#allocation3 + $0x68] sm:$0xff] %vm4298_vm12, %v8621_v18 }
 0x965   : > { %5520 = vst.msk [vmem:[#allocation3 + $0x68] sm:$0xff] %vm4371_vm15, %v8628_v48  ;;  %v4214_v35 = vpop.permute.xlu1 %4213 }
 0x966   : > { %4450 = vst.msk [vmem:[#allocation3 + $0x50] sm:$0xff] %vm4444_vm2, %v4431_v44  ;;  %5592 = vst.msk [vmem:[#allocation3 + $0x68] sm:$0xff] %vm4444_vm2, %v8635_v26  ;;  %v5571_v62 = vpop.permute.xlu0 %5570 }
 0x967   : > { %4232 = vst.msk [vmem:[#allocation3 + $0x60] sm:$0xff] %vm4225_vm11, %v4214_v35 }
 0x968   : > { %5590 = vst.msk [vmem:[#allocation3 + $0x48] sm:$0xff] %vm4444_vm2, %v5571_v62 }
 0x969   : > { %v4794_v20 = vpop.permute.xlu1 %4793 }
 0x96a   : > { %4814 = vst.msk [vmem:[#allocation3 + $0x40] sm:$0xff] %vm4809_vm5, %v4794_v20  ;;  %v4504_v45 = vpop.permute.xlu0 %4503 }
 0x96b   : > { %4523 = vst.msk [vmem:[#allocation3 + $0x50] sm:$0xff] %vm4517_vm3, %v4504_v45 }
 0x96d   : > { %v5357_v18 = vpop.permute.xlu1 %5356  ;;  %v5607_v63 = vld [vmem:[#allocation3 + $0x68] sm:$0xff] }
 0x96e   : > { %5375 = vst.msk [vmem:[#allocation3 + $0x58] sm:$0xff] %vm4225_vm11, %v5357_v18  ;;  %v4287_v48 = vpop.permute.xlu0 %4286 }
 0x96f   : > { %v5603_v38 = vld [vmem:[#allocation3 + $0x48] sm:$0xff]  ;;  %4305 = vst.msk [vmem:[#allocation3 + $0x60] sm:$0xff] %vm4298_vm12, %v4287_v48 }
 0x970   : > { %5882 = vmatprep.mubr.msk.f32.mxu1 %vm5637_vm14, %v5603_v38  ;;  %4378 = vst.msk [vmem:[#allocation3 + $0x60] sm:$0xff] %vm4371_vm15, %v8850_v32 }
 0x971   : > { %4451 = vst.msk [vmem:[#allocation3 + $0x60] sm:$0xff] %vm4444_vm2, %v8855_v55  ;;  %v4577_v26 = vpop.permute.xlu1 %4576  ;;  %v5602_v23 = vld [vmem:[#allocation3 + $0x40] sm:$0xff] }
 0x972   : > { %4524 = vst.msk [vmem:[#allocation3 + $0x60] sm:$0xff] %vm4517_vm3, %v8860_v49  ;;  %v4929_v7 = vpop.permute.xlu0 %4928  ;;  %5747 = vmatmul.mubr.f32.gmra.mrb[8].mxu1 %v5602_v23 }
 0x973   : > { %4596 = vst.msk [vmem:[#allocation3 + $0x50] sm:$0xff] %vm4590_vm8, %v4577_v26 }
 0x974   : > { %4945 = vst.msk [vmem:[#allocation3 + $0x78] sm:$0xff] %vm3787_vm6, %v4929_v7  ;;  %vm5775_vm6 = vcmask 130048  }
 0x975   : > { %5017 = vst.msk [vmem:[#allocation3 + $0x78] sm:$0xff] %vm3860_vm13, %v8589_v21  ;;  %v5429_v32 = vpop.permute.xlu1 %5428 }
 0x976   : > { %5089 = vst.msk [vmem:[#allocation3 + $0x78] sm:$0xff] %vm3933_vm7, %v8595_v30  ;;  %v5501_v55 = vpop.permute.xlu0 %5500 }
 0x977   : > { %5161 = vst.msk [vmem:[#allocation3 + $0x78] sm:$0xff] %vm4006_vm0, %v8601_v6 }
 0x978   : > { %5447 = vst.msk [vmem:[#allocation3 + $0x58] sm:$0xff] %vm4298_vm12, %v5429_v32 }
 0x979   : > { %5233 = vst.msk [vmem:[#allocation3 + $0x78] sm:$0xff] %vm4079_vm9, %v8609_v59  ;;  %v4650_v21 = vpop.permute.xlu1 %4649 }
 0x97a   : > { %5519 = vst.msk [vmem:[#allocation3 + $0x58] sm:$0xff] %vm4371_vm15, %v5501_v55  ;;  %v5573_v30 = vpop.permute.xlu0 %5572 }
 0x97b   : > { %5305 = vst.msk [vmem:[#allocation3 + $0x78] sm:$0xff] %vm4152_vm10, %v8616_v31 }
 0x97c   : > { %5377 = vst.msk [vmem:[#allocation3 + $0x78] sm:$0xff] %vm4225_vm11, %v8624_v50 }
 0x97d   : > { %5449 = vst.msk [vmem:[#allocation3 + $0x78] sm:$0xff] %vm4298_vm12, %v8630_v43  ;;  %v4143_v6 = vpop.permute.xlu1 %4142 }
 0x97e   : > { %4669 = vst.msk [vmem:[#allocation3 + $0x50] sm:$0xff] %vm4663_vm4, %v4650_v21  ;;  %v4289_v59 = vpop.permute.xlu0 %4288 }
 0x97f   : > { %5521 = vst.msk [vmem:[#allocation3 + $0x78] sm:$0xff] %vm4371_vm15, %v8638_v2 }
 0x980   : > { %5591 = vst.msk [vmem:[#allocation3 + $0x58] sm:$0xff] %vm4444_vm2, %v5573_v30 }
 0x981   : > { %4160 = vst.msk [vmem:[#allocation3 + $0x70] sm:$0xff] %vm4152_vm10, %v4143_v6  ;;  %v4723_v31 = vpop.permute.xlu1 %4722 }
 0x982   : > { %4742 = vst.msk [vmem:[#allocation3 + $0x50] sm:$0xff] %vm4736_vm1, %v4723_v31  ;;  %v4362_v50 = vpop.permute.xlu0 %4361 }
 0x985   : > { %v4216_v43 = vpop.permute.xlu1 %4215 }
 0x986   : > { %4233 = vst.msk [vmem:[#allocation3 + $0x70] sm:$0xff] %vm4225_vm11, %v4216_v43  ;;  %v4435_v51 = vpop.permute.xlu0 %4434 }
 0x987   : > { %v5605_v49 = vld [vmem:[#allocation3 + $0x58] sm:$0xff]  ;;  %4306 = vst.msk [vmem:[#allocation3 + $0x70] sm:$0xff] %vm4298_vm12, %v4289_v59 }
 0x988   : > { %5883 = vmatprep.mubr.msk.f32.mxu1 %vm5637_vm14, %v5605_v49  ;;  %4379 = vst.msk [vmem:[#allocation3 + $0x70] sm:$0xff] %vm4371_vm15, %v4362_v50 }
 0x989   : > { %4452 = vst.msk [vmem:[#allocation3 + $0x70] sm:$0xff] %vm4444_vm2, %v4435_v51  ;;  %v4796_v2 = vpop.permute.xlu1 %4795 }
 0x98a   : > { %4815 = vst.msk [vmem:[#allocation3 + $0x50] sm:$0xff] %vm4809_vm5, %v4796_v2  ;;  %v4508_v14 = vpop.permute.xlu0 %4507 }
 0x98b   : > { %4525 = vst.msk [vmem:[#allocation3 + $0x70] sm:$0xff] %vm4517_vm3, %v4508_v14 }
 0x98d   : > { %v4579_v13 = vpop.permute.xlu1 %4578 }
 0x98e   : > { %4597 = vst.msk [vmem:[#allocation3 + $0x60] sm:$0xff] %vm4590_vm8, %v4579_v13  ;;  %v5577_v25 = vpop.permute.xlu0 %5576 }
 0x98f   : > { %5593 = vst.msk [vmem:[#allocation3 + $0x78] sm:$0xff] %vm4444_vm2, %v5577_v25 }
 0x991   : > { %v4652_v52 = vpop.permute.xlu1 %4651  ;;  %v5604_v40 = vld [vmem:[#allocation3 + $0x50] sm:$0xff] }
 0x992   : > { %4670 = vst.msk [vmem:[#allocation3 + $0x60] sm:$0xff] %vm4663_vm4, %v4652_v52  ;;  %5752 = vmatmul.mubr.f32.gmra.mrb[10].mxu1 %v5604_v40 }
 0x993   : > { %5884 = vmatprep.mubr.msk.f32.mxu1 %vm5637_vm14, %v5607_v63 }
 0x995   : > { %v4725_v0 = vpop.permute.xlu1 %4724 }
 0x996   : > { %4743 = vst.msk [vmem:[#allocation3 + $0x60] sm:$0xff] %vm4736_vm1, %v4725_v0  ;;  %v5609_v56 = vld [vmem:[#allocation3 + $0x78] sm:$0xff] }
 0x999   : > { %v4798_v10 = vpop.permute.xlu1 %4797 }
 0x99a   : > { %4816 = vst.msk [vmem:[#allocation3 + $0x60] sm:$0xff] %vm4809_vm5, %v4798_v10 }
 0x99d   : > { %v4581_v47 = vpop.permute.xlu1 %4580 }
 0x99e   : > { %4598 = vst.msk [vmem:[#allocation3 + $0x70] sm:$0xff] %vm4590_vm8, %v4581_v47 }
 0x9a1   : > { %v4654_v17 = vpop.permute.xlu1 %4653  ;;  %v5606_v22 = vld [vmem:[#allocation3 + $0x60] sm:$0xff] }
 0x9a2   : > { %4671 = vst.msk [vmem:[#allocation3 + $0x70] sm:$0xff] %vm4663_vm4, %v4654_v17  ;;  %5757 = vmatmul.mubr.f32.gmra.mrb[12].mxu1 %v5606_v22 }
 0x9a3   : > { %5885 = vmatprep.mubr.msk.f32.mxu1 %vm5637_vm14, %v5609_v56 }
 0x9a5   : > { %v4727_v36 = vpop.permute.xlu1 %4726 }
 0x9a6   : > { %4744 = vst.msk [vmem:[#allocation3 + $0x70] sm:$0xff] %vm4736_vm1, %v4727_v36 }
 0x9a9   : > { %v4800_v39 = vpop.permute.xlu1 %4799 }
 0x9aa   : > { %4817 = vst.msk [vmem:[#allocation3 + $0x70] sm:$0xff] %vm4809_vm5, %v4800_v39 }
 0x9b1   : > { %v5608_v58 = vld [vmem:[#allocation3 + $0x70] sm:$0xff] }
 0x9b2   : > { %5762 = vmatmul.mubr.f32.gmra.mrb[14].mxu1 %v5608_v58 }
 0x9d3   : > { %v5728_v9 = vpop.f32.mrb[0].mxu1 }
 0x9d4   : > { %v5767_v3 = vmax.f32 %v5728_v9, 0.0  ;;  %v5730_v11 = vpop.f32.mrb[1].mxu1 }
 0x9d6   : > { %5776 = vst.msk [vmem:[%s9133_s26] sm:$0xff] %vm5775_vm6, %v5767_v3 }
 0x9eb   : > { %v5733_v37 = vpop.f32.mrb[2].mxu1 }
 0x9ec   : > { %v5768_v42 = vmax.f32 %v5733_v37, 0.0  ;;  %v5735_v53 = vpop.f32.mrb[3].mxu1 }
 0x9ee   : > { %5777 = vst.msk [vmem:[%s9133_s26 + $0x8] sm:$0xff] %vm5775_vm6, %v5768_v42 }
 0xa0b   : > { %v5738_v41 = vpop.f32.mrb[4].mxu1 }
 0xa0c   : > { %v5769_v60 = vmax.f32 %v5738_v41, 0.0  ;;  %v5740_v15 = vpop.f32.mrb[5].mxu1 }
 0xa0e   : > { %5778 = vst.msk [vmem:[%s9133_s26 + $0x10] sm:$0xff] %vm5775_vm6, %v5769_v60 }
 0xa23   : > { %v5743_v19 = vpop.f32.mrb[6].mxu1 }
 0xa24   : > { %v5770_v8 = vmax.f32 %v5743_v19, 0.0  ;;  %v5745_v34 = vpop.f32.mrb[7].mxu1 }
 0xa26   : > { %5779 = vst.msk [vmem:[%s9133_s26 + $0x18] sm:$0xff] %vm5775_vm6, %v5770_v8 }
 0xa45   : > { %v5748_v46 = vpop.f32.mrb[8].mxu1 }
 0xa46   : > { %v5771_v28 = vmax.f32 %v5748_v46, 0.0  ;;  %v5750_v33 = vpop.f32.mrb[9].mxu1 }
 0xa48   : > { %5780 = vst.msk [vmem:[%s9133_s26 + $0x20] sm:$0xff] %vm5775_vm6, %v5771_v28 }
 0xa65   : > { %v5753_v57 = vpop.f32.mrb[10].mxu1 }
 0xa66   : > { %v5772_v5 = vmax.f32 %v5753_v57, 0.0  ;;  %v5755_v16 = vpop.f32.mrb[11].mxu1 }
 0xa68   : > { %5781 = vst.msk [vmem:[%s9133_s26 + $0x28] sm:$0xff] %vm5775_vm6, %v5772_v5 }
 0xa75   : > { %v5758_v61 = vpop.f32.mrb[12].mxu1 }
 0xa76   : > { %v5773_v4 = vmax.f32 %v5758_v61, 0.0  ;;  %v5760_v29 = vpop.f32.mrb[13].mxu1 }
 0xa78   : > { %5782 = vst.msk [vmem:[%s9133_s26 + $0x30] sm:$0xff] %vm5775_vm6, %v5773_v4 }
 0xa85   : > { %v5763_v1 = vpop.f32.mrb[14].mxu1 }
 0xa86   : > { %v5774_v27 = vmax.f32 %v5763_v1, 0.0  ;;  %v5765_v24 = vpop.f32.mrb[15].mxu1 }
 0xa88   : > { %5783 = vst.msk [vmem:[%s9133_s26 + $0x38] sm:$0xff] %vm5775_vm6, %v5774_v27 }
 0xa89 PF: > { %p19_p8 = scmp.ge.s32.totalorder %s6733_s14, 4   ;;  %s9400_s30 = smov %s6615_s10 }
 0xa8a   : > { %s9401_s10 = smov %s6619_s11  ;;  %s9402_s11 = smov %s6743_s17 }
 0xa8b   : > { %s9403_s12 = smov %s6733_s14  ;;  %21 = sbr.rel (!%p19_p8) target bundleno = 8 (0x8), region = 106 }
 0xa92   :  { %5805 = vsyncpa [#allocation5], 1 }
 0xa93   :  { %5807 = vsyncpa [#allocation5 + $0x1], 1 }

</bundles_post_ra>
